<compile_context>
chip_gen: v7x
topology: tpu7x:2x2x1
jax: 0.10.0
libtpu: 0.0.40
codegen_flags: <defaults>
</compile_context>

<pallas_src>
import functools

import jax
import jax.numpy as jnp
from jax.experimental import pallas as pl
from jax.experimental.pallas import tpu as pltpu


# ----------------------------------------------------------------------------
# Pallas kernel: fused GEMM (bf16 -> f32 acc) + bias + activation
# ----------------------------------------------------------------------------
def _gemm_bias_act_kernel(a_ref, w_ref, b_ref, o_ref, *, act):
    acc = jnp.dot(a_ref[...], w_ref[...], preferred_element_type=jnp.float32)
    acc = acc + b_ref[...]                     # f32 bias broadcast over rows
    if act == "relu":
        acc = jnp.maximum(acc, 0.0)
    elif act == "tanh":
        acc = jnp.tanh(acc)
    # act == "none": identity
    o_ref[...] = acc


def _ceil_to(x, m):
    return ((x + m - 1) // m) * m


def gemm_bias_act(a, w_p, b_p, act, *, n_valid, tm_max=256):
    """act(a @ w + b) with pre-packed/padded bf16 weights.

    a   : [M, K]   f32 patches (cast to bf16 here, fuses with im2col copy)
    w_p : [Kp, Np] bf16, K/N padded to 128 multiples with zeros (done at init)
    b_p : [1, Np]  f32,  padded with zeros (done at init)
    returns [M, n_valid] f32
    """
    M, K = a.shape
    Kp, Np = w_p.shape
    assert Kp >= K and Np >= n_valid

    # M tile: multiple of 16 (bf16 sublane packing), capped at 256.
    tm = min(tm_max, _ceil_to(M, 16))
    Mp = _ceil_to(M, tm)

    a_p = jnp.pad(a.astype(jnp.bfloat16), ((0, Mp - M), (0, Kp - K)))

    out = pl.pallas_call(
        functools.partial(_gemm_bias_act_kernel, act=act),
        out_shape=jax.ShapeDtypeStruct((Mp, Np), jnp.float32),
        grid=(Mp // tm,),
        in_specs=[
            pl.BlockSpec((tm, Kp), lambda i: (i, 0)),   # patches: tiled over M
            pl.BlockSpec((Kp, Np), lambda i: (0, 0)),   # weights: resident
            pl.BlockSpec((1, Np), lambda i: (0, 0)),    # bias:    resident
        ],
        out_specs=pl.BlockSpec((tm, Np), lambda i: (i, 0)),
        compiler_params=pltpu.CompilerParams(
            dimension_semantics=("parallel",),          # pipeline + 2-TC on v7x
        ),
    )(a_p, w_p, b_p)
    return out[:M, :n_valid]


# ----------------------------------------------------------------------------
# Plain-JAX glue: im2col / dilation (layout plumbing only, no heavy compute)
# ----------------------------------------------------------------------------
def _im2col(x_nhwc, kh, kw, stride, padding):
    x = jnp.pad(x_nhwc, ((0, 0), (padding, padding), (padding, padding), (0, 0)))
    n, h, w, c = x.shape
    oh = (h - kh) // stride + 1
    ow = (w - kw) // stride + 1
    patches = []
    for i in range(kh):
        for j in range(kw):
            patches.append(x[:, i:i + stride * oh:stride, j:j + stride * ow:stride, :])
    patches = jnp.stack(patches, axis=3)            # [N, oh, ow, kh*kw, C]
    patches = patches.reshape(n * oh * ow, kh * kw * c)
    return patches, (n, oh, ow)


def _dilate(x_nhwc, stride):
    if stride == 1:
        return x_nhwc
    n, h, w, c = x_nhwc.shape
    out = jnp.zeros((n, (h - 1) * stride + 1, (w - 1) * stride + 1, c), x_nhwc.dtype)
    return out.at[:, ::stride, ::stride, :].set(x_nhwc)


def conv2d(x_nhwc, w_p, b_p, *, k, cout, stride, padding, act):
    patches, (n, oh, ow) = _im2col(x_nhwc, k, k, stride, padding)
    out = gemm_bias_act(patches, w_p, b_p, act, n_valid=cout)
    return out.reshape(n, oh, ow, cout)


def conv_transpose2d(x_nhwc, w_p, b_p, *, k, cout, stride, padding,
                     output_padding, act):
    # Weight was pre-flipped / channel-swapped & packed at init; here we only
    # zero-insert (dilate) + pad the input and run a stride-1 convolution.
    x_d = _dilate(x_nhwc, stride)
    lo = k - 1 - padding
    hi = k - 1 - padding + output_padding
    x_p = jnp.pad(x_d, ((0, 0), (lo, hi), (lo, hi), (0, 0)))
    return conv2d(x_p, w_p, b_p, k=k, cout=cout, stride=1, padding=0, act=act)


# ----------------------------------------------------------------------------
# Parameter init + one-time packing (transpose/flip/pad/bf16 cast hoisted here)
# ----------------------------------------------------------------------------
def _pack_conv(w_oihw, b):
    cout, cin, kh, kw = w_oihw.shape
    K, N = kh * kw * cin, cout
    Kp, Np = _ceil_to(K, 128), _ceil_to(N, 128)
    w_mat = jnp.transpose(w_oihw, (2, 3, 1, 0)).reshape(K, N)       # (i,j,cin)->cout
    w_p = jnp.pad(w_mat, ((0, Kp - K), (0, Np - N))).astype(jnp.bfloat16)
    b_p = jnp.pad(b.astype(jnp.float32), (0, Np - N)).reshape(1, Np)
    return w_p, b_p


def _pack_convT(w_iohw, b):
    # flip spatially, swap in/out channels -> regular conv weight [cout,cin,kh,kw]
    w_conv = jnp.transpose(w_iohw[:, :, ::-1, ::-1], (1, 0, 2, 3))
    return _pack_conv(w_conv, b)


def _init_conv(key, cout, cin, k):
    kw_, kb_ = jax.random.split(key)
    bound = 1.0 / jnp.sqrt(cin * k * k)
    w = jax.random.uniform(kw_, (cout, cin, k, k), jnp.float32, -bound, bound)
    b = jax.random.uniform(kb_, (cout,), jnp.float32, -bound, bound)
    return w, b


def _init_convT(key, cin, cout, k):
    kw_, kb_ = jax.random.split(key)
    bound = 1.0 / jnp.sqrt(cout * k * k)
    w = jax.random.uniform(kw_, (cin, cout, k, k), jnp.float32, -bound, bound)
    b = jax.random.uniform(kb_, (cout,), jnp.float32, -bound, bound)
    return w, b


def init_params(key):
    keys = jax.random.split(key, 6)
    return {
        # Encoder
        "e1": _pack_conv(*_init_conv(keys[0], 16, 1, 3)),
        "e2": _pack_conv(*_init_conv(keys[1], 32, 16, 3)),
        "e3": _pack_conv(*_init_conv(keys[2], 64, 32, 7)),
        # Decoder (ConvTranspose2d weights pre-flipped/swapped here)
        "d1": _pack_convT(*_init_convT(keys[3], 64, 32, 7)),
        "d2": _pack_convT(*_init_convT(keys[4], 32, 16, 3)),
        "d3": _pack_convT(*_init_convT(keys[5], 16, 1, 3)),
    }


# ----------------------------------------------------------------------------
# AutoEncoder forward (PyTorch-equivalent semantics), NCHW in / NCHW out
# ----------------------------------------------------------------------------
@jax.jit
def autoencoder_forward(params, x_nchw):
    x = jnp.transpose(x_nchw.astype(jnp.float32), (0, 2, 3, 1))      # NCHW -> NHWC

    # Encoder
    x = conv2d(x, *params["e1"], k=3, cout=16, stride=2, padding=1, act="relu")  # 28->14
    x = conv2d(x, *params["e2"], k=3, cout=32, stride=2, padding=1, act="relu")  # 14->7
    x = conv2d(x, *params["e3"], k=7, cout=64, stride=1, padding=0, act="none")  # 7 ->1

    # Decoder
    x = conv_transpose2d(x, *params["d1"], k=7, cout=32, stride=1, padding=0,
                         output_padding=0, act="relu")                           # 1 ->7
    x = conv_transpose2d(x, *params["d2"], k=3, cout=16, stride=2, padding=1,
                         output_padding=1, act="relu")                           # 7 ->14
    x = conv_transpose2d(x, *params["d3"], k=3, cout=1, stride=2, padding=1,
                         output_padding=1, act="tanh")                           # 14->28

    return jnp.transpose(x, (0, 3, 1, 2))                            # NHWC -> NCHW


if __name__ == "__main__":
    # MNIST-shaped input: 28x28 is required because the encoder's final
    # Conv2d(32, 64, 7) consumes the full 7x7 feature map.
    key = jax.random.PRNGKey(0)
    kx, kp = jax.random.split(key)
    x = jax.random.normal(kx, (2, 1, 28, 28), dtype=jnp.float32)

    params = init_params(kp)
    y = autoencoder_forward(params, x)
    jax.block_until_ready(y)

    assert y.shape == (2, 1, 28, 28), y.shape
    assert y.dtype == jnp.float32
    print("KERNEL_OK")
</pallas_src>

<mosaic_0001>
module attributes {stable_mosaic.version = 11 : i64} {
  func.func @_gemm_bias_act_kernel(%arg0: i32, %arg1: memref<256x128xbf16, #tpu.memory_space<vmem>>, %arg2: memref<128x128xbf16, #tpu.memory_space<vmem>>, %arg3: memref<1x128xf32, #tpu.memory_space<vmem>>, %arg4: memref<256x128xf32, #tpu.memory_space<vmem>>) attributes {dimension_semantics = [#tpu.dimension_semantics<parallel>], iteration_bounds = array<i64: 2>, scalar_prefetch = 0 : i64, scratch_operands = 0 : i64, tpu.core_type = #tpu.core_type<tc>, window_params = [{transform_indices = @transform_0, window_bounds = array<i64: 256, 128>}, {pipeline_mode = #tpu.pipeline_mode<synchronous>, transform_indices = @transform_1, window_bounds = array<i64: 128, 128>}, {pipeline_mode = #tpu.pipeline_mode<synchronous>, transform_indices = @transform_2, window_bounds = array<i64: 1, 128>}, {transform_indices = @transform_3, window_bounds = array<i64: 256, 128>}]} {
    %c0 = arith.constant 0 : index
    %c0_0 = arith.constant 0 : index
    %0 = vector.load %arg1[%c0, %c0_0] : memref<256x128xbf16, #tpu.memory_space<vmem>>, vector<256x128xbf16>
    %c0_1 = arith.constant 0 : index
    %c0_2 = arith.constant 0 : index
    %1 = vector.load %arg2[%c0_1, %c0_2] : memref<128x128xbf16, #tpu.memory_space<vmem>>, vector<128x128xbf16>
    %cst = arith.constant dense<0.000000e+00> : vector<256x128xf32>
    %2 = tpu.matmul %0, %1, %cst {dimension_numbers = #tpu.dot_dimension_numbers<[1], [0], [0], [1], [0, 0, 1, 1], [], []>} : vector<256x128xbf16>, vector<128x128xbf16>, vector<256x128xf32> -> vector<256x128xf32>
    %c0_3 = arith.constant 0 : index
    %c0_4 = arith.constant 0 : index
    %3 = vector.load %arg3[%c0_3, %c0_4] : memref<1x128xf32, #tpu.memory_space<vmem>>, vector<1x128xf32>
    %4 = vector.broadcast %3 : vector<1x128xf32> to vector<256x128xf32>
    %5 = arith.addf %2, %4 : vector<256x128xf32>
    %cst_5 = arith.constant 0.000000e+00 : f32
    %6 = vector.broadcast %cst_5 : f32 to vector<256x128xf32>
    %7 = arith.maximumf %5, %6 : vector<256x128xf32>
    %c0_6 = arith.constant 0 : index
    %c0_7 = arith.constant 0 : index
    %8 = vector.load %arg4[%c0_6, %c0_7] : memref<256x128xf32, #tpu.memory_space<vmem>>, vector<256x128xf32>
    tpu.vector_store %arg4[%c0_6, %c0_7], %7 {strides = array<i32>} : memref<256x128xf32, #tpu.memory_space<vmem>>, vector<256x128xf32>,
    return
  }
  func.func @transform_0(%arg0: i32) -> (i32, i32) {
    %c0_i32 = arith.constant 0 : i32
    %c0_i32_0 = arith.constant 0 : i32
    return %arg0, %c0_i32 : i32, i32
  }
  func.func @transform_1(%arg0: i32) -> (i32, i32) {
    %c0_i32 = arith.constant 0 : i32
    %c0_i32_0 = arith.constant 0 : i32
    %c0_i32_1 = arith.constant 0 : i32
    return %c0_i32, %c0_i32_0 : i32, i32
  }
  func.func @transform_2(%arg0: i32) -> (i32, i32) {
    %c0_i32 = arith.constant 0 : i32
    %c0_i32_0 = arith.constant 0 : i32
    %c0_i32_1 = arith.constant 0 : i32
    return %c0_i32, %c0_i32_0 : i32, i32
  }
  func.func @transform_3(%arg0: i32) -> (i32, i32) {
    %c0_i32 = arith.constant 0 : i32
    %c0_i32_0 = arith.constant 0 : i32
    return %arg0, %c0_i32 : i32, i32
  }
}

module attributes {stable_mosaic.version = 11 : i64} {
  func.func @_gemm_bias_act_kernel(%arg0: i32, %arg1: memref<112x256xbf16, #tpu.memory_space<vmem>>, %arg2: memref<256x128xbf16, #tpu.memory_space<vmem>>, %arg3: memref<1x128xf32, #tpu.memory_space<vmem>>, %arg4: memref<112x128xf32, #tpu.memory_space<vmem>>) attributes {dimension_semantics = [#tpu.dimension_semantics<parallel>], iteration_bounds = array<i64: 1>, scalar_prefetch = 0 : i64, scratch_operands = 0 : i64, tpu.core_type = #tpu.core_type<tc>, window_params = [{transform_indices = @transform_0, window_bounds = array<i64: 112, 256>}, {pipeline_mode = #tpu.pipeline_mode<synchronous>, transform_indices = @transform_1, window_bounds = array<i64: 256, 128>}, {pipeline_mode = #tpu.pipeline_mode<synchronous>, transform_indices = @transform_2, window_bounds = array<i64: 1, 128>}, {transform_indices = @transform_3, window_bounds = array<i64: 112, 128>}]} {
    %c0 = arith.constant 0 : index
    %c0_0 = arith.constant 0 : index
    %0 = vector.load %arg1[%c0, %c0_0] : memref<112x256xbf16, #tpu.memory_space<vmem>>, vector<112x256xbf16>
    %c0_1 = arith.constant 0 : index
    %c0_2 = arith.constant 0 : index
    %1 = vector.load %arg2[%c0_1, %c0_2] : memref<256x128xbf16, #tpu.memory_space<vmem>>, vector<256x128xbf16>
    %cst = arith.constant dense<0.000000e+00> : vector<112x128xf32>
    %2 = tpu.matmul %0, %1, %cst {dimension_numbers = #tpu.dot_dimension_numbers<[1], [0], [0], [1], [0, 0, 1, 1], [], []>} : vector<112x256xbf16>, vector<256x128xbf16>, vector<112x128xf32> -> vector<112x128xf32>
    %c0_3 = arith.constant 0 : index
    %c0_4 = arith.constant 0 : index
    %3 = vector.load %arg3[%c0_3, %c0_4] : memref<1x128xf32, #tpu.memory_space<vmem>>, vector<1x128xf32>
    %4 = vector.broadcast %3 : vector<1x128xf32> to vector<112x128xf32>
    %5 = arith.addf %2, %4 : vector<112x128xf32>
    %cst_5 = arith.constant 0.000000e+00 : f32
    %6 = vector.broadcast %cst_5 : f32 to vector<112x128xf32>
    %7 = arith.maximumf %5, %6 : vector<112x128xf32>
    %c0_6 = arith.constant 0 : index
    %c0_7 = arith.constant 0 : index
    %8 = vector.load %arg4[%c0_6, %c0_7] : memref<112x128xf32, #tpu.memory_space<vmem>>, vector<112x128xf32>
    tpu.vector_store %arg4[%c0_6, %c0_7], %7 {strides = array<i32>} : memref<112x128xf32, #tpu.memory_space<vmem>>, vector<112x128xf32>,
    return
  }
  func.func @transform_0(%arg0: i32) -> (i32, i32) {
    %c0_i32 = arith.constant 0 : i32
    %c0_i32_0 = arith.constant 0 : i32
    return %arg0, %c0_i32 : i32, i32
  }
  func.func @transform_1(%arg0: i32) -> (i32, i32) {
    %c0_i32 = arith.constant 0 : i32
    %c0_i32_0 = arith.constant 0 : i32
    %c0_i32_1 = arith.constant 0 : i32
    return %c0_i32, %c0_i32_0 : i32, i32
  }
  func.func @transform_2(%arg0: i32) -> (i32, i32) {
    %c0_i32 = arith.constant 0 : i32
    %c0_i32_0 = arith.constant 0 : i32
    %c0_i32_1 = arith.constant 0 : i32
    return %c0_i32, %c0_i32_0 : i32, i32
  }
  func.func @transform_3(%arg0: i32) -> (i32, i32) {
    %c0_i32 = arith.constant 0 : i32
    %c0_i32_0 = arith.constant 0 : i32
    return %arg0, %c0_i32 : i32, i32
  }
}

module attributes {stable_mosaic.version = 11 : i64} {
  func.func @_gemm_bias_act_kernel(%arg0: i32, %arg1: memref<16x1664xbf16, #tpu.memory_space<vmem>>, %arg2: memref<1664x128xbf16, #tpu.memory_space<vmem>>, %arg3: memref<1x128xf32, #tpu.memory_space<vmem>>, %arg4: memref<16x128xf32, #tpu.memory_space<vmem>>) attributes {dimension_semantics = [#tpu.dimension_semantics<parallel>], iteration_bounds = array<i64: 1>, scalar_prefetch = 0 : i64, scratch_operands = 0 : i64, tpu.core_type = #tpu.core_type<tc>, window_params = [{transform_indices = @transform_0, window_bounds = array<i64: 16, 1664>}, {pipeline_mode = #tpu.pipeline_mode<synchronous>, transform_indices = @transform_1, window_bounds = array<i64: 1664, 128>}, {pipeline_mode = #tpu.pipeline_mode<synchronous>, transform_indices = @transform_2, window_bounds = array<i64: 1, 128>}, {transform_indices = @transform_3, window_bounds = array<i64: 16, 128>}]} {
    %c0 = arith.constant 0 : index
    %c0_0 = arith.constant 0 : index
    %0 = vector.load %arg1[%c0, %c0_0] : memref<16x1664xbf16, #tpu.memory_space<vmem>>, vector<16x1664xbf16>
    %c0_1 = arith.constant 0 : index
    %c0_2 = arith.constant 0 : index
    %1 = vector.load %arg2[%c0_1, %c0_2] : memref<1664x128xbf16, #tpu.memory_space<vmem>>, vector<1664x128xbf16>
    %cst = arith.constant dense<0.000000e+00> : vector<16x128xf32>
    %2 = tpu.matmul %0, %1, %cst {dimension_numbers = #tpu.dot_dimension_numbers<[1], [0], [0], [1], [0, 0, 1, 1], [], []>} : vector<16x1664xbf16>, vector<1664x128xbf16>, vector<16x128xf32> -> vector<16x128xf32>
    %c0_3 = arith.constant 0 : index
    %c0_4 = arith.constant 0 : index
    %3 = vector.load %arg3[%c0_3, %c0_4] : memref<1x128xf32, #tpu.memory_space<vmem>>, vector<1x128xf32>
    %4 = vector.broadcast %3 : vector<1x128xf32> to vector<16x128xf32>
    %5 = arith.addf %2, %4 : vector<16x128xf32>
    %c0_5 = arith.constant 0 : index
    %c0_6 = arith.constant 0 : index
    %6 = vector.load %arg4[%c0_5, %c0_6] : memref<16x128xf32, #tpu.memory_space<vmem>>, vector<16x128xf32>
    tpu.vector_store %arg4[%c0_5, %c0_6], %5 {strides = array<i32>} : memref<16x128xf32, #tpu.memory_space<vmem>>, vector<16x128xf32>,
    return
  }
  func.func @transform_0(%arg0: i32) -> (i32, i32) {
    %c0_i32 = arith.constant 0 : i32
    %c0_i32_0 = arith.constant 0 : i32
    return %arg0, %c0_i32 : i32, i32
  }
  func.func @transform_1(%arg0: i32) -> (i32, i32) {
    %c0_i32 = arith.constant 0 : i32
    %c0_i32_0 = arith.constant 0 : i32
    %c0_i32_1 = arith.constant 0 : i32
    return %c0_i32, %c0_i32_0 : i32, i32
  }
  func.func @transform_2(%arg0: i32) -> (i32, i32) {
    %c0_i32 = arith.constant 0 : i32
    %c0_i32_0 = arith.constant 0 : i32
    %c0_i32_1 = arith.constant 0 : i32
    return %c0_i32, %c0_i32_0 : i32, i32
  }
  func.func @transform_3(%arg0: i32) -> (i32, i32) {
    %c0_i32 = arith.constant 0 : i32
    %c0_i32_0 = arith.constant 0 : i32
    return %arg0, %c0_i32 : i32, i32
  }
}

module attributes {stable_mosaic.version = 11 : i64} {
  func.func @_gemm_bias_act_kernel(%arg0: i32, %arg1: memref<112x3200xbf16, #tpu.memory_space<vmem>>, %arg2: memref<3200x128xbf16, #tpu.memory_space<vmem>>, %arg3: memref<1x128xf32, #tpu.memory_space<vmem>>, %arg4: memref<112x128xf32, #tpu.memory_space<vmem>>) attributes {dimension_semantics = [#tpu.dimension_semantics<parallel>], iteration_bounds = array<i64: 1>, scalar_prefetch = 0 : i64, scratch_operands = 0 : i64, tpu.core_type = #tpu.core_type<tc>, window_params = [{transform_indices = @transform_0, window_bounds = array<i64: 112, 3200>}, {pipeline_mode = #tpu.pipeline_mode<synchronous>, transform_indices = @transform_1, window_bounds = array<i64: 3200, 128>}, {pipeline_mode = #tpu.pipeline_mode<synchronous>, transform_indices = @transform_2, window_bounds = array<i64: 1, 128>}, {transform_indices = @transform_3, window_bounds = array<i64: 112, 128>}]} {
    %c0 = arith.constant 0 : index
    %c0_0 = arith.constant 0 : index
    %0 = vector.load %arg1[%c0, %c0_0] : memref<112x3200xbf16, #tpu.memory_space<vmem>>, vector<112x3200xbf16>
    %c0_1 = arith.constant 0 : index
    %c0_2 = arith.constant 0 : index
    %1 = vector.load %arg2[%c0_1, %c0_2] : memref<3200x128xbf16, #tpu.memory_space<vmem>>, vector<3200x128xbf16>
    %cst = arith.constant dense<0.000000e+00> : vector<112x128xf32>
    %2 = tpu.matmul %0, %1, %cst {dimension_numbers = #tpu.dot_dimension_numbers<[1], [0], [0], [1], [0, 0, 1, 1], [], []>} : vector<112x3200xbf16>, vector<3200x128xbf16>, vector<112x128xf32> -> vector<112x128xf32>
    %c0_3 = arith.constant 0 : index
    %c0_4 = arith.constant 0 : index
    %3 = vector.load %arg3[%c0_3, %c0_4] : memref<1x128xf32, #tpu.memory_space<vmem>>, vector<1x128xf32>
    %4 = vector.broadcast %3 : vector<1x128xf32> to vector<112x128xf32>
    %5 = arith.addf %2, %4 : vector<112x128xf32>
    %cst_5 = arith.constant 0.000000e+00 : f32
    %6 = vector.broadcast %cst_5 : f32 to vector<112x128xf32>
    %7 = arith.maximumf %5, %6 : vector<112x128xf32>
    %c0_6 = arith.constant 0 : index
    %c0_7 = arith.constant 0 : index
    %8 = vector.load %arg4[%c0_6, %c0_7] : memref<112x128xf32, #tpu.memory_space<vmem>>, vector<112x128xf32>
    tpu.vector_store %arg4[%c0_6, %c0_7], %7 {strides = array<i32>} : memref<112x128xf32, #tpu.memory_space<vmem>>, vector<112x128xf32>,
    return
  }
  func.func @transform_0(%arg0: i32) -> (i32, i32) {
    %c0_i32 = arith.constant 0 : i32
    %c0_i32_0 = arith.constant 0 : i32
    return %arg0, %c0_i32 : i32, i32
  }
  func.func @transform_1(%arg0: i32) -> (i32, i32) {
    %c0_i32 = arith.constant 0 : i32
    %c0_i32_0 = arith.constant 0 : i32
    %c0_i32_1 = arith.constant 0 : i32
    return %c0_i32, %c0_i32_0 : i32, i32
  }
  func.func @transform_2(%arg0: i32) -> (i32, i32) {
    %c0_i32 = arith.constant 0 : i32
    %c0_i32_0 = arith.constant 0 : i32
    %c0_i32_1 = arith.constant 0 : i32
    return %c0_i32, %c0_i32_0 : i32, i32
  }
  func.func @transform_3(%arg0: i32) -> (i32, i32) {
    %c0_i32 = arith.constant 0 : i32
    %c0_i32_0 = arith.constant 0 : i32
    return %arg0, %c0_i32 : i32, i32
  }
}

module attributes {stable_mosaic.version = 11 : i64} {
  func.func @_gemm_bias_act_kernel(%arg0: i32, %arg1: memref<256x384xbf16, #tpu.memory_space<vmem>>, %arg2: memref<384x128xbf16, #tpu.memory_space<vmem>>, %arg3: memref<1x128xf32, #tpu.memory_space<vmem>>, %arg4: memref<256x128xf32, #tpu.memory_space<vmem>>) attributes {dimension_semantics = [#tpu.dimension_semantics<parallel>], iteration_bounds = array<i64: 2>, scalar_prefetch = 0 : i64, scratch_operands = 0 : i64, tpu.core_type = #tpu.core_type<tc>, window_params = [{transform_indices = @transform_0, window_bounds = array<i64: 256, 384>}, {pipeline_mode = #tpu.pipeline_mode<synchronous>, transform_indices = @transform_1, window_bounds = array<i64: 384, 128>}, {pipeline_mode = #tpu.pipeline_mode<synchronous>, transform_indices = @transform_2, window_bounds = array<i64: 1, 128>}, {transform_indices = @transform_3, window_bounds = array<i64: 256, 128>}]} {
    %c0 = arith.constant 0 : index
    %c0_0 = arith.constant 0 : index
    %0 = vector.load %arg1[%c0, %c0_0] : memref<256x384xbf16, #tpu.memory_space<vmem>>, vector<256x384xbf16>
    %c0_1 = arith.constant 0 : index
    %c0_2 = arith.constant 0 : index
    %1 = vector.load %arg2[%c0_1, %c0_2] : memref<384x128xbf16, #tpu.memory_space<vmem>>, vector<384x128xbf16>
    %cst = arith.constant dense<0.000000e+00> : vector<256x128xf32>
    %2 = tpu.matmul %0, %1, %cst {dimension_numbers = #tpu.dot_dimension_numbers<[1], [0], [0], [1], [0, 0, 1, 1], [], []>} : vector<256x384xbf16>, vector<384x128xbf16>, vector<256x128xf32> -> vector<256x128xf32>
    %c0_3 = arith.constant 0 : index
    %c0_4 = arith.constant 0 : index
    %3 = vector.load %arg3[%c0_3, %c0_4] : memref<1x128xf32, #tpu.memory_space<vmem>>, vector<1x128xf32>
    %4 = vector.broadcast %3 : vector<1x128xf32> to vector<256x128xf32>
    %5 = arith.addf %2, %4 : vector<256x128xf32>
    %cst_5 = arith.constant 0.000000e+00 : f32
    %6 = vector.broadcast %cst_5 : f32 to vector<256x128xf32>
    %7 = arith.maximumf %5, %6 : vector<256x128xf32>
    %c0_6 = arith.constant 0 : index
    %c0_7 = arith.constant 0 : index
    %8 = vector.load %arg4[%c0_6, %c0_7] : memref<256x128xf32, #tpu.memory_space<vmem>>, vector<256x128xf32>
    tpu.vector_store %arg4[%c0_6, %c0_7], %7 {strides = array<i32>} : memref<256x128xf32, #tpu.memory_space<vmem>>, vector<256x128xf32>,
    return
  }
  func.func @transform_0(%arg0: i32) -> (i32, i32) {
    %c0_i32 = arith.constant 0 : i32
    %c0_i32_0 = arith.constant 0 : i32
    return %arg0, %c0_i32 : i32, i32
  }
  func.func @transform_1(%arg0: i32) -> (i32, i32) {
    %c0_i32 = arith.constant 0 : i32
    %c0_i32_0 = arith.constant 0 : i32
    %c0_i32_1 = arith.constant 0 : i32
    return %c0_i32, %c0_i32_0 : i32, i32
  }
  func.func @transform_2(%arg0: i32) -> (i32, i32) {
    %c0_i32 = arith.constant 0 : i32
    %c0_i32_0 = arith.constant 0 : i32
    %c0_i32_1 = arith.constant 0 : i32
    return %c0_i32, %c0_i32_0 : i32, i32
  }
  func.func @transform_3(%arg0: i32) -> (i32, i32) {
    %c0_i32 = arith.constant 0 : i32
    %c0_i32_0 = arith.constant 0 : i32
    return %arg0, %c0_i32 : i32, i32
  }
}

module attributes {stable_mosaic.version = 11 : i64} {
  func.func @_gemm_bias_act_kernel(%arg0: i32, %arg1: memref<256x256xbf16, #tpu.memory_space<vmem>>, %arg2: memref<256x128xbf16, #tpu.memory_space<vmem>>, %arg3: memref<1x128xf32, #tpu.memory_space<vmem>>, %arg4: memref<256x128xf32, #tpu.memory_space<vmem>>) attributes {dimension_semantics = [#tpu.dimension_semantics<parallel>], iteration_bounds = array<i64: 7>, scalar_prefetch = 0 : i64, scratch_operands = 0 : i64, tpu.core_type = #tpu.core_type<tc>, window_params = [{transform_indices = @transform_0, window_bounds = array<i64: 256, 256>}, {pipeline_mode = #tpu.pipeline_mode<synchronous>, transform_indices = @transform_1, window_bounds = array<i64: 256, 128>}, {pipeline_mode = #tpu.pipeline_mode<synchronous>, transform_indices = @transform_2, window_bounds = array<i64: 1, 128>}, {transform_indices = @transform_3, window_bounds = array<i64: 256, 128>}]} {
    %c0 = arith.constant 0 : index
    %c0_0 = arith.constant 0 : index
    %0 = vector.load %arg1[%c0, %c0_0] : memref<256x256xbf16, #tpu.memory_space<vmem>>, vector<256x256xbf16>
    %c0_1 = arith.constant 0 : index
    %c0_2 = arith.constant 0 : index
    %1 = vector.load %arg2[%c0_1, %c0_2] : memref<256x128xbf16, #tpu.memory_space<vmem>>, vector<256x128xbf16>
    %cst = arith.constant dense<0.000000e+00> : vector<256x128xf32>
    %2 = tpu.matmul %0, %1, %cst {dimension_numbers = #tpu.dot_dimension_numbers<[1], [0], [0], [1], [0, 0, 1, 1], [], []>} : vector<256x256xbf16>, vector<256x128xbf16>, vector<256x128xf32> -> vector<256x128xf32>
    %c0_3 = arith.constant 0 : index
    %c0_4 = arith.constant 0 : index
    %3 = vector.load %arg3[%c0_3, %c0_4] : memref<1x128xf32, #tpu.memory_space<vmem>>, vector<1x128xf32>
    %4 = vector.broadcast %3 : vector<1x128xf32> to vector<256x128xf32>
    %5 = arith.addf %2, %4 : vector<256x128xf32>
    %6 = math.tanh %5 : vector<256x128xf32>
    %c0_5 = arith.constant 0 : index
    %c0_6 = arith.constant 0 : index
    %7 = vector.load %arg4[%c0_5, %c0_6] : memref<256x128xf32, #tpu.memory_space<vmem>>, vector<256x128xf32>
    tpu.vector_store %arg4[%c0_5, %c0_6], %6 {strides = array<i32>} : memref<256x128xf32, #tpu.memory_space<vmem>>, vector<256x128xf32>,
    return
  }
  func.func @transform_0(%arg0: i32) -> (i32, i32) {
    %c0_i32 = arith.constant 0 : i32
    %c0_i32_0 = arith.constant 0 : i32
    return %arg0, %c0_i32 : i32, i32
  }
  func.func @transform_1(%arg0: i32) -> (i32, i32) {
    %c0_i32 = arith.constant 0 : i32
    %c0_i32_0 = arith.constant 0 : i32
    %c0_i32_1 = arith.constant 0 : i32
    return %c0_i32, %c0_i32_0 : i32, i32
  }
  func.func @transform_2(%arg0: i32) -> (i32, i32) {
    %c0_i32 = arith.constant 0 : i32
    %c0_i32_0 = arith.constant 0 : i32
    %c0_i32_1 = arith.constant 0 : i32
    return %c0_i32, %c0_i32_0 : i32, i32
  }
  func.func @transform_3(%arg0: i32) -> (i32, i32) {
    %c0_i32 = arith.constant 0 : i32
    %c0_i32_0 = arith.constant 0 : i32
    return %arg0, %c0_i32 : i32, i32
  }
}

</mosaic_0001>

<bundles_post_ra>
// kernel: autoencoder_forward.6
= control target key start
LH: loop header
LB: loop body
LE: loop exit
PB: predicated region body
PF: predicated region fallthrough
CT: control target
= control target key end

     0   :  { %8 = vsyncpa [#allocation3], 0  ;;  %s1171_s0 = inlined_call_operand.vmem [shape: bf16[512,128], index: 0, kind: input, shape index: {}]   ;;  %s1172_s1 = inlined_call_operand.hbm [shape: bf16[128,128], index: 1, kind: input, shape index: {}]   ;;  %s1173_s2 = inlined_call_operand.hbm [shape: f32[1,128], index: 2, kind: input, shape index: {}]   ;;  %s1174_s3 = inlined_call_operand.vmem [shape: f32[512,128], index: 3, kind: output, shape index: {}]  }
   0x1   :  { %9 = vsyncpa [#allocation5], 0  ;;  %s984_s12 = smov 0  }
   0x2 LB: > { %s705_s13 = sadd.s32 4294967295, %s958_s12   ;;  %p707_p0 = scmp.ge.s32.totalorder %s958_s12, 1  ;;  %s958_s12 = sphi %s984_s12, %s15_s12  }
   0x3   : > { %p114_p1 = scmp.lt.s32.totalorder %s958_s12, 3  ;;  %s960_s14 = smov [#allocation2]  }
   0x4   : > { %s126_s15 = sshll.u32 %s960_s14, 4  ;;  %p998_p3 = scmp.eq.s32.totalorder %s705_s13, 0  ;;  %s127_s15 = int_to_ptr.vmem [resolvable:$true] %s126_s15 }
   0x5   : > { %p992_p2 = pnand %p707_p0, %p114_p1  ;;  %s961_s18 = smov [#allocation4]  }
   0x6   : > { %s1179_s17 = scalar_select %p998_p3, 1, 0 }
   0x7   : > { %s1178_s16 = scalar_select %p992_p2, 1, 0 }
   0x8   : > { %p841_p4 = pneg %p992_p2  ;;  %s140_s19 = sshll.u32 %s961_s18, 4  ;;  %s1010_s19 = int_to_ptr.vmem [resolvable:$true] %s140_s19 }
   0x9   : > { %s888_s23 = scalar_lea.hbm %s1172_s1, 1024 }
   0xa   : > { %p1006_p5 = pnand %p998_p3, %p841_p4  ;;  %p889_p6 = scmp.ne.s32.totalorder %s1172_s1, %s888_s23 }
   0xb   : > { %p895_p10 = scmp.lt.u32.totalorder %s888_s23, %s1172_s1 }
   0xc   : > { %p890_p7 = pneg %p1006_p5 }
   0xe   : > { %p891_p8 = pnand %p890_p7, %p889_p6 }
  0x10   : > { %p892_p9 = pneg %p891_p8 }
  0x12   : > { %p897_p11 = pnand %p895_p10, %p892_p9 }
  0x14   : > { %900 = shalt.err (!%p897_p11)
}
  0x15   : > { %s901_s28 = scalar_lea.vmem %s127_s15, 1024  ;;  %p909_p1 = scmp.lt.s32.totalorder %s127_s15, %s127_s15 }
  0x16   : > { %p902_p12 = scmp.ne.s32.totalorder %s127_s15, %s901_s28  ;;  %p910_p4 = scmp.lt.s32.totalorder %s901_s28, %s901_s28 }
  0x18   : > { %p904_p13 = pnand %p902_p12, %p890_p7  ;;  %p911_p3 = por %p910_p4, %p909_p1 }
  0x1a   : > { %p905_p0 = pneg %p904_p13 }
  0x1c   : > { %p912_p2 = pnand %p911_p3, %p905_p0 }
  0x1e   : > { %915 = shalt.err (!%p912_p2)
}
  0x1f   : > { %s962_s29 = smov 64   ;;  %s963_s30 = smov 4  }
  0x20   : > { %844 = dma.hbm_to_vmem [thread:$0]  (!%p1006_p5), %s1172_s1, 1024, %s127_s15, [#allocation3], %s962_s29, %s962_s29, %s963_s30  }
  0x21   : > { %s916_s8 = scalar_lea.hbm %s1173_s2, 16 }
  0x22   : > { %p917_p6 = scmp.ne.s32.totalorder %s1173_s2, %s916_s8  ;;  %p923_p8 = scmp.lt.u32.totalorder %s916_s8, %s1173_s2 }
  0x24   : > { %p919_p2 = pnand %p917_p6, %p890_p7 }
  0x26   : > { %p920_p3 = pneg %p919_p2 }
  0x28   : > { %p925_p9 = pnand %p923_p8, %p920_p3 }
  0x2a   : > { %928 = shalt.err (!%p925_p9)
}
  0x2b   : > { %s929_s15 = scalar_lea.vmem %s1010_s19, 16  ;;  %s936_s18 = scalar_lea.vmem %s1010_s19, 32 }
  0x2c   : > { %p930_p10 = scmp.ne.s32.totalorder %s1010_s19, %s929_s15  ;;  %p937_p13 = scmp.lt.s32.totalorder %s1010_s19, %s1010_s19 }
  0x2d   : > { %p938_p0 = scmp.lt.s32.totalorder %s936_s18, %s929_s15 }
  0x2e   : > { %p932_p11 = pnand %p930_p10, %p890_p7 }
  0x2f   : > { %p939_p1 = por %p938_p0, %p937_p13 }
  0x30   : > { %p933_p12 = pneg %p932_p11 }
  0x32   : > { %p940_p4 = pnand %p939_p1, %p933_p12 }
  0x34   : > { %943 = shalt.err (!%p940_p4)
}
  0x35   : > { %847 = dma.hbm_to_vmem [thread:$0]  (!%p1006_p5), %s1173_s2, 16, %s1010_s19, [#allocation5]  }
  0x36   : > { %p1181_p6 = scmp.ne.s32.totalorder %s1178_s16, 0 }
  0x37   : > { %p1182_p7 = scmp.ne.s32.totalorder (!%p1181_p6), %s1179_s17, 0 }
  0x38   : > { %162 = sbr.rel (%p1181_p6) target bundleno = 343 (0x157), region = 32 }
  0x3f   : > { %949 = dma.done.wait (%p1182_p7), [#allocation3], 1024  }
  0x40   : > { %951 = vsyncadd (%p1182_p7), [#allocation3], 4294966272 }
  0x41   : > { %953 = dma.done.wait (%p1182_p7), [#allocation5], 16  }
  0x42   : > { %955 = vsyncadd (%p1182_p7), [#allocation5], 4294967280  ;;  %s714_s20 = sshll.u32 %s705_s13, 5  ;;  %v864_v0 = vld [vmem:[#allocation2] sm:$0xff]   ;;  %v865_v1 = vld [vmem:[#allocation2 + $0x8] sm:$0xff]  }
  0x43   : > { %p191_p2 = scmp.lt.s32.totalorder %s714_s20, 63  ;;  %769 = vmatprep.subr.bf16.mxu0 %v864_v0  ;;  %817 = vmatprep.subr.bf16.mxu1 %v864_v0  ;;  %v866_v2 = vld [vmem:[#allocation2 + $0x10] sm:$0xff]   ;;  %v867_v3 = vld [vmem:[#allocation2 + $0x18] sm:$0xff]   ;;  %v868_v6 = vld [vmem:[#allocation2 + $0x20] sm:$0xff]  }
  0x44   : > { %770 = vmatpush3.bf16.msra.mxu0 %v864_v0  ;;  %825 = vmatpush3.bf16.msra.mxu1 %v864_v0  ;;  %v869_v7 = vld [vmem:[#allocation2 + $0x28] sm:$0xff]   ;;  %v870_v8 = vld [vmem:[#allocation2 + $0x30] sm:$0xff]   ;;  %v871_v9 = vld [vmem:[#allocation2 + $0x38] sm:$0xff]  }
  0x45   : > { %s1184_s20 = smov (!%p191_p2, %s714_s20), 63  ;;  %771 = vmatprep.subr.bf16.mxu0 %v865_v1  ;;  %818 = vmatprep.subr.bf16.mxu1 %v865_v1  ;;  %v1096_v24 = vld [vmem:[#allocation4] ss:$0 sm:$0xff] }
  0x46   : > { %s715_s16 = sshll.u32 %s1184_s20, 2  ;;  %s717_s13 = sshll.u32 %s1184_s20, 3 }
  0x47   : > { %s1078_s23 = scalar_lea.vmem %s1171_s0, %s715_s16  ;;  %s1104_s26 = scalar_lea.vmem %s1174_s3, %s717_s13 }
  0x48   : > { %772 = vmatpush3.bf16.msra.mxu0 %v865_v1  ;;  %826 = vmatpush3.bf16.msra.mxu1 %v865_v1  ;;  %v872_v4 = vld [vmem:[%s1078_s23] sm:$0xff]   ;;  %v874_v10 = vld [vmem:[%s1078_s23 + $0x8] sm:$0xff]   ;;  %v876_v12 = vld [vmem:[%s1078_s23 + $0x10] sm:$0xff]  }
  0x49   : > { %773 = vmatprep.subr.bf16.mxu0 %v866_v2  ;;  %819 = vmatprep.subr.bf16.mxu1 %v866_v2  ;;  %v873_v5 = vld [vmem:[%s1078_s23 + $0x40] sm:$0xff]   ;;  %v875_v11 = vld [vmem:[%s1078_s23 + $0x48] sm:$0xff]   ;;  %v877_v13 = vld [vmem:[%s1078_s23 + $0x50] sm:$0xff]  }
  0x4a   : > { %785 = vmatprep.mubr.bf16.mxu0 %v872_v4  ;;  %801 = vmatprep.mubr.bf16.mxu1 %v873_v5  ;;  %v878_v14 = vld [vmem:[%s1078_s23 + $0x18] sm:$0xff]   ;;  %v880_v16 = vld [vmem:[%s1078_s23 + $0x20] sm:$0xff]   ;;  %v882_v18 = vld [vmem:[%s1078_s23 + $0x28] sm:$0xff]  }
  0x4b   : > { %v879_v15 = vld [vmem:[%s1078_s23 + $0x58] sm:$0xff]   ;;  %v881_v17 = vld [vmem:[%s1078_s23 + $0x60] sm:$0xff]   ;;  %v883_v19 = vld [vmem:[%s1078_s23 + $0x68] sm:$0xff]  }
  0x4c   : > { %774 = vmatpush3.bf16.msra.mxu0 %v866_v2  ;;  %827 = vmatpush3.bf16.msra.mxu1 %v866_v2  ;;  %v884_v20 = vld [vmem:[%s1078_s23 + $0x30] sm:$0xff]   ;;  %v886_v22 = vld [vmem:[%s1078_s23 + $0x38] sm:$0xff]  }
  0x4d   : > { %775 = vmatprep.subr.bf16.mxu0 %v867_v3  ;;  %820 = vmatprep.subr.bf16.mxu1 %v867_v3  ;;  %v885_v21 = vld [vmem:[%s1078_s23 + $0x70] sm:$0xff]   ;;  %v887_v23 = vld [vmem:[%s1078_s23 + $0x78] sm:$0xff]  }
  0x50   : > { %776 = vmatpush3.bf16.msra.mxu0 %v867_v3  ;;  %828 = vmatpush3.bf16.msra.mxu1 %v867_v3 }
  0x51   : > { %777 = vmatprep.subr.bf16.mxu0 %v868_v6  ;;  %821 = vmatprep.subr.bf16.mxu1 %v868_v6 }
  0x54   : > { %778 = vmatpush3.bf16.msra.mxu0 %v868_v6  ;;  %829 = vmatpush3.bf16.msra.mxu1 %v868_v6 }
  0x55   : > { %779 = vmatprep.subr.bf16.mxu0 %v869_v7  ;;  %822 = vmatprep.subr.bf16.mxu1 %v869_v7 }
  0x58   : > { %780 = vmatpush3.bf16.msra.mxu0 %v869_v7  ;;  %830 = vmatpush3.bf16.msra.mxu1 %v869_v7 }
  0x59   : > { %781 = vmatprep.subr.bf16.mxu0 %v870_v8  ;;  %823 = vmatprep.subr.bf16.mxu1 %v870_v8 }
  0x5c   : > { %782 = vmatpush3.bf16.msra.mxu0 %v870_v8  ;;  %831 = vmatpush3.bf16.msra.mxu1 %v870_v8 }
  0x5d   : > { %783 = vmatprep.subr.bf16.mxu0 %v871_v9  ;;  %824 = vmatprep.subr.bf16.mxu1 %v871_v9 }
  0x60   : > { %784 = vmatpush3.bf16.msra.mxu0 %v871_v9  ;;  %832 = vmatpush3.bf16.msra.mxu1 %v871_v9 }
  0x63   : > { %786 = vmatmul.mubr.bf16.vlgmr.msra.gmra.mrb[0].mxu0 %v874_v10  ;;  %802 = vmatmul.mubr.bf16.vlgmr.msra.gmra.mrb[0].mxu1 %v875_v11 }
  0x64   : > { %789 = vmatprep.mubr.bf16.mxu0 %v876_v12  ;;  %805 = vmatprep.mubr.bf16.mxu1 %v877_v13 }
  0x6b   : > { %790 = vmatmul.mubr.bf16.gmra.mrb[4].mxu0 %v878_v14  ;;  %806 = vmatmul.mubr.bf16.gmra.mrb[4].mxu1 %v879_v15 }
  0x6c   : > { %793 = vmatprep.mubr.bf16.mxu0 %v880_v16  ;;  %809 = vmatprep.mubr.bf16.mxu1 %v881_v17 }
  0x73   : > { %794 = vmatmul.mubr.bf16.gmra.mrb[8].mxu0 %v882_v18  ;;  %810 = vmatmul.mubr.bf16.gmra.mrb[8].mxu1 %v883_v19 }
  0x74   : > { %797 = vmatprep.mubr.bf16.mxu0 %v884_v20  ;;  %813 = vmatprep.mubr.bf16.mxu1 %v885_v21 }
  0x7b   : > { %798 = vmatmul.mubr.bf16.gmra.mrb[12].mxu0 %v886_v22  ;;  %814 = vmatmul.mubr.bf16.gmra.mrb[12].mxu1 %v887_v23 }
 0x136   : > { %v787_v25 = vpop.f32.mrb[0].mxu0  ;;  %v803_v26 = vpop.f32.mrb[0].mxu1 }
 0x137   : > { %v445_v27 = vadd.f32 %v787_v25, %v1096_v24  ;;  %v509_v28 = vadd.f32 %v803_v26, %v1096_v24  ;;  %v436_v29 = vpop.f32.mrb[1].mxu0  ;;  %v500_v30 = vpop.f32.mrb[1].mxu1 }
 0x138   : > { %v437_v31 = vadd.f32 %v1096_v24, %v436_v29  ;;  %v501_v32 = vadd.f32 %v1096_v24, %v500_v30  ;;  %v788_v33 = vpop.f32.mrb[2].mxu0  ;;  %v804_v34 = vpop.f32.mrb[2].mxu1 }
 0x139   : > { %v565_v35 = vmax.f32 %v445_v27, 0.0  ;;  %v581_v36 = vmax.f32 %v509_v28, 0.0  ;;  %v448_v37 = vadd.f32 %v788_v33, %v1096_v24  ;;  %v512_v38 = vadd.f32 %v804_v34, %v1096_v24  ;;  %v439_v39 = vpop.f32.mrb[3].mxu0  ;;  %v503_v40 = vpop.f32.mrb[3].mxu1 }
 0x13a   : > { %v563_v41 = vmax.f32 %v437_v31, 0.0  ;;  %v579_v42 = vmax.f32 %v501_v32, 0.0  ;;  %v440_v43 = vadd.f32 %v1096_v24, %v439_v39  ;;  %v504_v44 = vadd.f32 %v1096_v24, %v503_v40 }
 0x13b   : > { %597 = vst [vmem:[%s1104_s26 + $0x10] sm:$0xff] %v565_v35  ;;  %613 = vst [vmem:[%s1104_s26 + $0x90] sm:$0xff] %v581_v36  ;;  %v566_v45 = vmax.f32 %v448_v37, 0.0  ;;  %v582_v46 = vmax.f32 %v512_v38, 0.0 }
 0x13c   : > { %595 = vst [vmem:[%s1104_s26] sm:$0xff] %v563_v41  ;;  %611 = vst [vmem:[%s1104_s26 + $0x80] sm:$0xff] %v579_v42  ;;  %v564_v47 = vmax.f32 %v440_v43, 0.0  ;;  %v580_v48 = vmax.f32 %v504_v44, 0.0 }
 0x13d   : > { %598 = vst [vmem:[%s1104_s26 + $0x18] sm:$0xff] %v566_v45  ;;  %614 = vst [vmem:[%s1104_s26 + $0x98] sm:$0xff] %v582_v46 }
 0x13e   : > { %596 = vst [vmem:[%s1104_s26 + $0x8] sm:$0xff] %v564_v47  ;;  %612 = vst [vmem:[%s1104_s26 + $0x88] sm:$0xff] %v580_v48  ;;  %v791_v49 = vpop.f32.mrb[4].mxu0  ;;  %v807_v50 = vpop.f32.mrb[4].mxu1 }
 0x13f   : > { %v461_v51 = vadd.f32 %v791_v49, %v1096_v24  ;;  %v525_v52 = vadd.f32 %v807_v50, %v1096_v24  ;;  %v452_v53 = vpop.f32.mrb[5].mxu0  ;;  %v516_v54 = vpop.f32.mrb[5].mxu1 }
 0x140   : > { %v453_v55 = vadd.f32 %v1096_v24, %v452_v53  ;;  %v517_v56 = vadd.f32 %v1096_v24, %v516_v54  ;;  %v792_v57 = vpop.f32.mrb[6].mxu0  ;;  %v808_v58 = vpop.f32.mrb[6].mxu1 }
 0x141   : > { %v569_v59 = vmax.f32 %v461_v51, 0.0  ;;  %v585_v60 = vmax.f32 %v525_v52, 0.0  ;;  %v464_v61 = vadd.f32 %v792_v57, %v1096_v24  ;;  %v528_v62 = vadd.f32 %v808_v58, %v1096_v24  ;;  %v455_v63 = vpop.f32.mrb[7].mxu0  ;;  %v519_v0 = vpop.f32.mrb[7].mxu1 }
 0x142   : > { %v567_v1 = vmax.f32 %v453_v55, 0.0  ;;  %v583_v2 = vmax.f32 %v517_v56, 0.0  ;;  %v456_v3 = vadd.f32 %v1096_v24, %v455_v63  ;;  %v520_v4 = vadd.f32 %v1096_v24, %v519_v0 }
 0x143   : > { %601 = vst [vmem:[%s1104_s26 + $0x30] sm:$0xff] %v569_v59  ;;  %617 = vst [vmem:[%s1104_s26 + $0xb0] sm:$0xff] %v585_v60  ;;  %v570_v5 = vmax.f32 %v464_v61, 0.0  ;;  %v586_v6 = vmax.f32 %v528_v62, 0.0 }
 0x144   : > { %599 = vst [vmem:[%s1104_s26 + $0x20] sm:$0xff] %v567_v1  ;;  %615 = vst [vmem:[%s1104_s26 + $0xa0] sm:$0xff] %v583_v2  ;;  %v568_v7 = vmax.f32 %v456_v3, 0.0  ;;  %v584_v8 = vmax.f32 %v520_v4, 0.0 }
 0x145   : > { %602 = vst [vmem:[%s1104_s26 + $0x38] sm:$0xff] %v570_v5  ;;  %618 = vst [vmem:[%s1104_s26 + $0xb8] sm:$0xff] %v586_v6 }
 0x146   : > { %600 = vst [vmem:[%s1104_s26 + $0x28] sm:$0xff] %v568_v7  ;;  %616 = vst [vmem:[%s1104_s26 + $0xa8] sm:$0xff] %v584_v8  ;;  %v795_v9 = vpop.f32.mrb[8].mxu0  ;;  %v811_v10 = vpop.f32.mrb[8].mxu1 }
 0x147   : > { %v477_v11 = vadd.f32 %v795_v9, %v1096_v24  ;;  %v541_v12 = vadd.f32 %v811_v10, %v1096_v24  ;;  %v468_v13 = vpop.f32.mrb[9].mxu0  ;;  %v532_v14 = vpop.f32.mrb[9].mxu1 }
 0x148   : > { %v469_v15 = vadd.f32 %v1096_v24, %v468_v13  ;;  %v533_v16 = vadd.f32 %v1096_v24, %v532_v14  ;;  %v796_v17 = vpop.f32.mrb[10].mxu0  ;;  %v812_v18 = vpop.f32.mrb[10].mxu1 }
 0x149   : > { %v573_v19 = vmax.f32 %v477_v11, 0.0  ;;  %v589_v20 = vmax.f32 %v541_v12, 0.0  ;;  %v480_v21 = vadd.f32 %v796_v17, %v1096_v24  ;;  %v544_v22 = vadd.f32 %v812_v18, %v1096_v24  ;;  %v471_v23 = vpop.f32.mrb[11].mxu0  ;;  %v535_v25 = vpop.f32.mrb[11].mxu1 }
 0x14a   : > { %v571_v26 = vmax.f32 %v469_v15, 0.0  ;;  %v587_v27 = vmax.f32 %v533_v16, 0.0  ;;  %v472_v28 = vadd.f32 %v1096_v24, %v471_v23  ;;  %v536_v29 = vadd.f32 %v1096_v24, %v535_v25 }
 0x14b   : > { %605 = vst [vmem:[%s1104_s26 + $0x50] sm:$0xff] %v573_v19  ;;  %621 = vst [vmem:[%s1104_s26 + $0xd0] sm:$0xff] %v589_v20  ;;  %v574_v30 = vmax.f32 %v480_v21, 0.0  ;;  %v590_v31 = vmax.f32 %v544_v22, 0.0 }
 0x14c   : > { %603 = vst [vmem:[%s1104_s26 + $0x40] sm:$0xff] %v571_v26  ;;  %619 = vst [vmem:[%s1104_s26 + $0xc0] sm:$0xff] %v587_v27  ;;  %v572_v32 = vmax.f32 %v472_v28, 0.0  ;;  %v588_v33 = vmax.f32 %v536_v29, 0.0 }
 0x14d   : > { %606 = vst [vmem:[%s1104_s26 + $0x58] sm:$0xff] %v574_v30  ;;  %622 = vst [vmem:[%s1104_s26 + $0xd8] sm:$0xff] %v590_v31 }
 0x14e   : > { %604 = vst [vmem:[%s1104_s26 + $0x48] sm:$0xff] %v572_v32  ;;  %620 = vst [vmem:[%s1104_s26 + $0xc8] sm:$0xff] %v588_v33  ;;  %v799_v34 = vpop.f32.mrb[12].mxu0  ;;  %v815_v35 = vpop.f32.mrb[12].mxu1 }
 0x14f   : > { %v493_v36 = vadd.f32 %v799_v34, %v1096_v24  ;;  %v557_v37 = vadd.f32 %v815_v35, %v1096_v24  ;;  %v484_v38 = vpop.f32.mrb[13].mxu0  ;;  %v548_v39 = vpop.f32.mrb[13].mxu1 }
 0x150   : > { %v485_v40 = vadd.f32 %v1096_v24, %v484_v38  ;;  %v549_v41 = vadd.f32 %v1096_v24, %v548_v39  ;;  %v800_v42 = vpop.f32.mrb[14].mxu0  ;;  %v816_v43 = vpop.f32.mrb[14].mxu1 }
 0x151   : > { %v577_v44 = vmax.f32 %v493_v36, 0.0  ;;  %v593_v45 = vmax.f32 %v557_v37, 0.0  ;;  %v496_v46 = vadd.f32 %v800_v42, %v1096_v24  ;;  %v560_v47 = vadd.f32 %v816_v43, %v1096_v24  ;;  %v487_v48 = vpop.f32.mrb[15].mxu0  ;;  %v551_v49 = vpop.f32.mrb[15].mxu1 }
 0x152   : > { %v575_v50 = vmax.f32 %v485_v40, 0.0  ;;  %v591_v51 = vmax.f32 %v549_v41, 0.0  ;;  %v488_v52 = vadd.f32 %v1096_v24, %v487_v48  ;;  %v552_v53 = vadd.f32 %v1096_v24, %v551_v49 }
 0x153   : > { %609 = vst [vmem:[%s1104_s26 + $0x70] sm:$0xff] %v577_v44  ;;  %625 = vst [vmem:[%s1104_s26 + $0xf0] sm:$0xff] %v593_v45  ;;  %v578_v54 = vmax.f32 %v496_v46, 0.0  ;;  %v594_v55 = vmax.f32 %v560_v47, 0.0 }
 0x154   : > { %607 = vst [vmem:[%s1104_s26 + $0x60] sm:$0xff] %v575_v50  ;;  %623 = vst [vmem:[%s1104_s26 + $0xe0] sm:$0xff] %v591_v51  ;;  %v576_v56 = vmax.f32 %v488_v52, 0.0  ;;  %v592_v57 = vmax.f32 %v552_v53, 0.0 }
 0x155   : > { %610 = vst [vmem:[%s1104_s26 + $0x78] sm:$0xff] %v578_v54  ;;  %626 = vst [vmem:[%s1104_s26 + $0xf8] sm:$0xff] %v594_v55 }
 0x156   : > { %608 = vst [vmem:[%s1104_s26 + $0x68] sm:$0xff] %v576_v56  ;;  %624 = vst [vmem:[%s1104_s26 + $0xe8] sm:$0xff] %v592_v57 }
 0x157 PF: > { %s15_s12 = sadd.s32 1, %s958_s12  }
 0x158   : > { %p12_p5 = scmp.ge.s32.totalorder %s15_s12, 4  }
 0x15a   :  { %14 = sbr.rel (!%p12_p5) target bundleno = 2 (0x2), region = 71 }
 0x161   :  { %649 = vsyncpa [#allocation3], 1 }
 0x162   :  { %651 = vsyncpa [#allocation3 + $0x1], 1 }
 0x163   :  { %652 = vsyncpa [#allocation5], 1 }

// kernel: autoencoder_forward.7
= control target key start
LH: loop header
LB: loop body
LE: loop exit
PB: predicated region body
PF: predicated region fallthrough
CT: control target
= control target key end

     0   :  { %s668_s1 = inlined_call_operand.vmem [shape: bf16[256,128], index: 1, kind: input, shape index: {}]   ;;  %s669_s0 = inlined_call_operand.vmem [shape: bf16[112,256], index: 0, kind: input, shape index: {}]   ;;  %s670_s2 = inlined_call_operand.vmem [shape: f32[1,128], index: 2, kind: input, shape index: {}]   ;;  %s671_s3 = inlined_call_operand.vmem [shape: f32[112,128], index: 3, kind: output, shape index: {}]  }
   0x1   :  { %v460_v0 = vld [vmem:[%s668_s1 + $0x40] sm:$0xff]   ;;  %v462_v2 = vld [vmem:[%s668_s1 + $0x48] sm:$0xff]   ;;  %v464_v4 = vld [vmem:[%s668_s1 + $0x50] sm:$0xff]  }
   0x2   :  { %v461_v1 = vld [vmem:[%s668_s1] sm:$0xff]   ;;  %386 = vmatprep.subr.bf16.mxu0 %v460_v0  ;;  %444 = vmatprep.subr.bf16.mxu1 %v460_v0  ;;  %v463_v3 = vld [vmem:[%s668_s1 + $0x8] sm:$0xff]   ;;  %v465_v5 = vld [vmem:[%s668_s1 + $0x10] sm:$0xff]  }
   0x3   :  { %387 = vmatpush3.bf16.msra.mxu0 %v461_v1  ;;  %452 = vmatpush3.bf16.msra.mxu1 %v461_v1  ;;  %v466_v6 = vld [vmem:[%s668_s1 + $0x58] sm:$0xff]   ;;  %v468_v8 = vld [vmem:[%s668_s1 + $0x60] sm:$0xff]   ;;  %v470_v10 = vld [vmem:[%s668_s1 + $0x68] sm:$0xff]  }
   0x4   :  { %388 = vmatprep.subr.bf16.mxu0 %v462_v2  ;;  %445 = vmatprep.subr.bf16.mxu1 %v462_v2  ;;  %v467_v7 = vld [vmem:[%s668_s1 + $0x18] sm:$0xff]   ;;  %v469_v9 = vld [vmem:[%s668_s1 + $0x20] sm:$0xff]   ;;  %v471_v13 = vld [vmem:[%s668_s1 + $0x28] sm:$0xff]  }
   0x5   :  { %v478_v11 = vld [vmem:[%s669_s0 + $0x4] ss:$8 sps:$4 sm:$0xff]   ;;  %v472_v14 = vld [vmem:[%s668_s1 + $0x70] sm:$0xff]   ;;  %v474_v16 = vld [vmem:[%s668_s1 + $0x78] sm:$0xff]  }
   0x6   :  { %v481_v12 = vld [vmem:[%s669_s0 + $0x44] ss:$8 sps:$4 sm:$0xff]   ;;  %266 = vmatprep.mubr.bf16.mxu0 %v478_v11  ;;  %v473_v15 = vld [vmem:[%s668_s1 + $0x30] sm:$0xff]   ;;  %v475_v17 = vld [vmem:[%s668_s1 + $0x38] sm:$0xff]  }
   0x7   :  { %389 = vmatpush3.bf16.msra.mxu0 %v463_v3  ;;  %453 = vmatpush3.bf16.msra.mxu1 %v463_v3  ;;  %v476_v18 = vld [vmem:[%s669_s0] ss:$8 sps:$4 sm:$0xff]   ;;  %v482_v20 = vld [vmem:[%s669_s0 + $0x14] ss:$8 sps:$4 sm:$0xff]   ;;  %v484_v22 = vld [vmem:[%s669_s0 + $0x10] ss:$8 sps:$4 sm:$0xff]  }
   0x8   :  { %390 = vmatprep.subr.bf16.mxu0 %v464_v4  ;;  %446 = vmatprep.subr.bf16.mxu1 %v464_v4  ;;  %v479_v19 = vld [vmem:[%s669_s0 + $0x40] ss:$8 sps:$4 sm:$0xff]   ;;  %v485_v21 = vld [vmem:[%s669_s0 + $0x54] ss:$8 sps:$4 sm:$0xff]   ;;  %v487_v23 = vld [vmem:[%s669_s0 + $0x50] ss:$8 sps:$4 sm:$0xff]  }
   0x9   :  { %298 = vmatprep.mubr.bf16.mxu1 %v481_v12  ;;  %v488_v24 = vld [vmem:[%s669_s0 + $0x24] ss:$8 sps:$4 sm:$0xff]   ;;  %v490_v26 = vld [vmem:[%s669_s0 + $0x20] ss:$8 sps:$4 sm:$0xff]   ;;  %v494_v28 = vld [vmem:[%s669_s0 + $0x34] ss:$8 sps:$4 sm:$0xff]  }
   0xa   :  { %v491_v25 = vld [vmem:[%s669_s0 + $0x64] ss:$8 sps:$4 sm:$0xff]   ;;  %v493_v27 = vld [vmem:[%s669_s0 + $0x60] ss:$8 sps:$4 sm:$0xff]   ;;  %v496_v29 = vld [vmem:[%s669_s0 + $0x30] ss:$8 sps:$4 sm:$0xff]  }
   0xb   :  { %391 = vmatpush3.bf16.msra.mxu0 %v465_v5  ;;  %454 = vmatpush3.bf16.msra.mxu1 %v465_v5  ;;  %v610_v32 = vld [vmem:[%s670_s2] ss:$0 sm:$0xff] }
   0xc   :  { %392 = vmatprep.subr.bf16.mxu0 %v466_v6  ;;  %447 = vmatprep.subr.bf16.mxu1 %v466_v6 }
   0xf   :  { %393 = vmatpush3.bf16.msra.mxu0 %v467_v7  ;;  %455 = vmatpush3.bf16.msra.mxu1 %v467_v7 }
  0x10   :  { %394 = vmatprep.subr.bf16.mxu0 %v468_v8  ;;  %448 = vmatprep.subr.bf16.mxu1 %v468_v8 }
  0x13   :  { %395 = vmatpush3.bf16.msra.mxu0 %v469_v9  ;;  %456 = vmatpush3.bf16.msra.mxu1 %v469_v9 }
  0x14   :  { %396 = vmatprep.subr.bf16.mxu0 %v470_v10  ;;  %449 = vmatprep.subr.bf16.mxu1 %v470_v10 }
  0x17   :  { %397 = vmatpush3.bf16.msra.mxu0 %v471_v13  ;;  %457 = vmatpush3.bf16.msra.mxu1 %v471_v13 }
  0x18   :  { %398 = vmatprep.subr.bf16.mxu0 %v472_v14  ;;  %450 = vmatprep.subr.bf16.mxu1 %v472_v14 }
  0x1b   :  { %399 = vmatpush3.bf16.msra.mxu0 %v473_v15  ;;  %458 = vmatpush3.bf16.msra.mxu1 %v473_v15 }
  0x1c   :  { %400 = vmatprep.subr.bf16.mxu0 %v474_v16  ;;  %451 = vmatprep.subr.bf16.mxu1 %v474_v16 }
  0x1f   :  { %401 = vmatpush3.bf16.msra.mxu0 %v475_v17  ;;  %459 = vmatpush3.bf16.msra.mxu1 %v475_v17 }
  0x22   :  { %267 = vmatmul.mubr.bf16.vlgmr.msra.gmra.mrb[0].mxu0 %v476_v18  ;;  %299 = vmatmul.mubr.bf16.vlgmr.msra.gmra.mrb[0].mxu1 %v479_v19 }
  0x23   :  { %274 = vmatprep.mubr.bf16.mxu0 %v482_v20  ;;  %306 = vmatprep.mubr.bf16.mxu1 %v485_v21 }
  0x2a   :  { %275 = vmatmul.mubr.bf16.gmra.mrb[4].mxu0 %v484_v22  ;;  %307 = vmatmul.mubr.bf16.gmra.mrb[4].mxu1 %v487_v23 }
  0x2b   :  { %282 = vmatprep.mubr.bf16.mxu0 %v488_v24  ;;  %314 = vmatprep.mubr.bf16.mxu1 %v491_v25 }
  0x32   :  { %283 = vmatmul.mubr.bf16.gmra.mrb[8].mxu0 %v490_v26  ;;  %315 = vmatmul.mubr.bf16.gmra.mrb[8].mxu1 %v493_v27 }
  0x33   :  { %290 = vmatprep.mubr.bf16.mxu0 %v494_v28 }
  0x3a   :  { %291 = vmatmul.mubr.bf16.gmra.mrb[12].mxu0 %v496_v29 }
  0xf5   :  { %v402_v30 = vpop.f32.mrb[0].mxu0  ;;  %v426_v31 = vpop.f32.mrb[0].mxu1 }
  0xf6   :  { %v403_v33 = vpop.f32.mrb[1].mxu0  ;;  %v427_v34 = vpop.f32.mrb[1].mxu1 }
  0xf7   :  { %v404_v35 = vadd.f32 %v403_v33, %v402_v30  ;;  %v405_v36 = vpop.f32.mrb[2].mxu0  ;;  %v428_v37 = vadd.f32 %v427_v34, %v426_v31  ;;  %v429_v38 = vpop.f32.mrb[2].mxu1 }
  0xf8   :  { %v406_v39 = vpop.f32.mrb[3].mxu0  ;;  %v430_v40 = vpop.f32.mrb[3].mxu1 }
  0xf9   :  { %v269_v41 = vadd.f32 %v404_v35, %v610_v32  ;;  %v407_v42 = vadd.f32 %v406_v39, %v405_v36  ;;  %v301_v43 = vadd.f32 %v428_v37, %v610_v32  ;;  %v431_v44 = vadd.f32 %v430_v40, %v429_v38 }
  0xfb   :  { %v323_v45 = vmax.f32 %v269_v41, 0.0  ;;  %v272_v46 = vadd.f32 %v407_v42, %v610_v32  ;;  %v331_v47 = vmax.f32 %v301_v43, 0.0  ;;  %v304_v48 = vadd.f32 %v431_v44, %v610_v32 }
  0xfd   :  { %337 = vst [vmem:[%s671_s3] sm:$0xff] %v323_v45  ;;  %v324_v49 = vmax.f32 %v272_v46, 0.0  ;;  %345 = vst [vmem:[%s671_s3 + $0x40] sm:$0xff] %v331_v47  ;;  %v408_v50 = vpop.f32.mrb[4].mxu0  ;;  %v332_v51 = vmax.f32 %v304_v48, 0.0  ;;  %v432_v52 = vpop.f32.mrb[4].mxu1 }
  0xfe   :  { %v409_v53 = vpop.f32.mrb[5].mxu0  ;;  %v433_v54 = vpop.f32.mrb[5].mxu1 }
  0xff   :  { %338 = vst [vmem:[%s671_s3 + $0x8] sm:$0xff] %v324_v49  ;;  %346 = vst [vmem:[%s671_s3 + $0x48] sm:$0xff] %v332_v51  ;;  %v410_v55 = vadd.f32 %v409_v53, %v408_v50  ;;  %v411_v56 = vpop.f32.mrb[6].mxu0  ;;  %v434_v57 = vadd.f32 %v433_v54, %v432_v52  ;;  %v435_v58 = vpop.f32.mrb[6].mxu1 }
 0x100   :  { %v412_v59 = vpop.f32.mrb[7].mxu0  ;;  %v436_v60 = vpop.f32.mrb[7].mxu1 }
 0x101   :  { %v277_v61 = vadd.f32 %v410_v55, %v610_v32  ;;  %v413_v62 = vadd.f32 %v412_v59, %v411_v56  ;;  %v309_v63 = vadd.f32 %v434_v57, %v610_v32  ;;  %v437_v0 = vadd.f32 %v436_v60, %v435_v58 }
 0x103   :  { %v325_v1 = vmax.f32 %v277_v61, 0.0  ;;  %v280_v2 = vadd.f32 %v413_v62, %v610_v32  ;;  %v333_v3 = vmax.f32 %v309_v63, 0.0  ;;  %v312_v4 = vadd.f32 %v437_v0, %v610_v32 }
 0x105   :  { %339 = vst [vmem:[%s671_s3 + $0x10] sm:$0xff] %v325_v1  ;;  %v326_v5 = vmax.f32 %v280_v2, 0.0  ;;  %347 = vst [vmem:[%s671_s3 + $0x50] sm:$0xff] %v333_v3  ;;  %v414_v6 = vpop.f32.mrb[8].mxu0  ;;  %v334_v7 = vmax.f32 %v312_v4, 0.0  ;;  %v438_v8 = vpop.f32.mrb[8].mxu1 }
 0x106   :  { %v415_v9 = vpop.f32.mrb[9].mxu0  ;;  %v439_v10 = vpop.f32.mrb[9].mxu1 }
 0x107   :  { %340 = vst [vmem:[%s671_s3 + $0x18] sm:$0xff] %v326_v5  ;;  %348 = vst [vmem:[%s671_s3 + $0x58] sm:$0xff] %v334_v7  ;;  %v416_v11 = vadd.f32 %v415_v9, %v414_v6  ;;  %v417_v12 = vpop.f32.mrb[10].mxu0  ;;  %v440_v13 = vadd.f32 %v439_v10, %v438_v8  ;;  %v441_v14 = vpop.f32.mrb[10].mxu1 }
 0x108   :  { %v418_v15 = vpop.f32.mrb[11].mxu0  ;;  %v442_v16 = vpop.f32.mrb[11].mxu1 }
 0x109   :  { %v285_v17 = vadd.f32 %v416_v11, %v610_v32  ;;  %v419_v18 = vadd.f32 %v418_v15, %v417_v12  ;;  %v317_v19 = vadd.f32 %v440_v13, %v610_v32  ;;  %v443_v20 = vadd.f32 %v442_v16, %v441_v14 }
 0x10b   :  { %v327_v21 = vmax.f32 %v285_v17, 0.0  ;;  %v288_v22 = vadd.f32 %v419_v18, %v610_v32  ;;  %v335_v23 = vmax.f32 %v317_v19, 0.0  ;;  %v320_v24 = vadd.f32 %v443_v20, %v610_v32 }
 0x10d   :  { %341 = vst [vmem:[%s671_s3 + $0x20] sm:$0xff] %v327_v21  ;;  %v328_v25 = vmax.f32 %v288_v22, 0.0  ;;  %349 = vst [vmem:[%s671_s3 + $0x60] sm:$0xff] %v335_v23  ;;  %v420_v26 = vpop.f32.mrb[12].mxu0  ;;  %v336_v27 = vmax.f32 %v320_v24, 0.0 }
 0x10e   :  { %v421_v28 = vpop.f32.mrb[13].mxu0 }
 0x10f   :  { %342 = vst [vmem:[%s671_s3 + $0x28] sm:$0xff] %v328_v25  ;;  %350 = vst [vmem:[%s671_s3 + $0x68] sm:$0xff] %v336_v27  ;;  %v422_v29 = vadd.f32 %v421_v28, %v420_v26  ;;  %v423_v30 = vpop.f32.mrb[14].mxu0 }
 0x110   :  { %v424_v31 = vpop.f32.mrb[15].mxu0 }
 0x111   :  { %v293_v33 = vadd.f32 %v422_v29, %v610_v32  ;;  %v425_v34 = vadd.f32 %v424_v31, %v423_v30 }
 0x113   :  { %v329_v35 = vmax.f32 %v293_v33, 0.0  ;;  %v296_v36 = vadd.f32 %v425_v34, %v610_v32 }
 0x115   :  { %343 = vst [vmem:[%s671_s3 + $0x30] sm:$0xff] %v329_v35  ;;  %v330_v37 = vmax.f32 %v296_v36, 0.0 }
 0x117   :  { %344 = vst [vmem:[%s671_s3 + $0x38] sm:$0xff] %v330_v37 }

// kernel: autoencoder_forward.8
= control target key start
LH: loop header
LB: loop body
LE: loop exit
PB: predicated region body
PF: predicated region fallthrough
CT: control target
= control target key end

     0   :  { %vm1632_vm0 = vmmov 0   ;;  %s2013_s1 = inlined_call_operand.vmem [shape: bf16[1664,128], index: 1, kind: input, shape index: {}]   ;;  %s2014_s0 = inlined_call_operand.vmem [shape: bf16[16,1664], index: 0, kind: input, shape index: {}]   ;;  %s2015_s2 = inlined_call_operand.vmem [shape: f32[1,128], index: 2, kind: input, shape index: {}]   ;;  %s2016_s3 = inlined_call_operand.vmem [shape: f32[16,128], index: 3, kind: output, shape index: {}]  }
   0x1   :  { %v1508_v0 = vld [vmem:[%s2013_s1 + $0x40] sm:$0xff]   ;;  %v1512_v4 = vld [vmem:[%s2013_s1 + $0x48] sm:$0xff]   ;;  %v1516_v8 = vld [vmem:[%s2013_s1 + $0x50] sm:$0xff]  }
   0x2   :  { %v1509_v1 = vld [vmem:[%s2013_s1] sm:$0xff]   ;;  %1345 = vmatprep.subr.bf16.mxu0 %v1508_v0  ;;  %v1513_v5 = vld [vmem:[%s2013_s1 + $0x8] sm:$0xff]   ;;  %v1517_v9 = vld [vmem:[%s2013_s1 + $0x10] sm:$0xff]  }
   0x3   :  { %v1510_v2 = vld [vmem:[%s2013_s1 + $0xc0] sm:$0xff]   ;;  %1346 = vmatpush3.bf16.msra.mxu0 %v1509_v1  ;;  %v1514_v6 = vld [vmem:[%s2013_s1 + $0xc8] sm:$0xff]   ;;  %v1518_v10 = vld [vmem:[%s2013_s1 + $0xd0] sm:$0xff]  }
   0x4   :  { %v1511_v3 = vld [vmem:[%s2013_s1 + $0x80] sm:$0xff]   ;;  %1367 = vmatprep.subr.bf16.mxu1 %v1510_v2  ;;  %1347 = vmatprep.subr.bf16.mxu0 %v1512_v4  ;;  %v1515_v7 = vld [vmem:[%s2013_s1 + $0x88] sm:$0xff]   ;;  %v1519_v11 = vld [vmem:[%s2013_s1 + $0x90] sm:$0xff]  }
   0x5   :  { %1368 = vmatpush3.bf16.msra.mxu1 %v1511_v3  ;;  %v1520_v12 = vld [vmem:[%s2013_s1 + $0x58] sm:$0xff]   ;;  %v1524_v16 = vld [vmem:[%s2013_s1 + $0x60] sm:$0xff]   ;;  %v1528_v20 = vld [vmem:[%s2013_s1 + $0x68] sm:$0xff]  }
   0x6   :  { %1369 = vmatprep.subr.bf16.mxu1 %v1514_v6  ;;  %v1521_v13 = vld [vmem:[%s2013_s1 + $0x18] sm:$0xff]   ;;  %v1525_v17 = vld [vmem:[%s2013_s1 + $0x20] sm:$0xff]   ;;  %v1529_v21 = vld [vmem:[%s2013_s1 + $0x28] sm:$0xff]  }
   0x7   :  { %1348 = vmatpush3.bf16.msra.mxu0 %v1513_v5  ;;  %v1522_v14 = vld [vmem:[%s2013_s1 + $0xd8] sm:$0xff]   ;;  %v1526_v18 = vld [vmem:[%s2013_s1 + $0xe0] sm:$0xff]   ;;  %v1530_v22 = vld [vmem:[%s2013_s1 + $0xe8] sm:$0xff]  }
   0x8   :  { %1349 = vmatprep.subr.bf16.mxu0 %v1516_v8  ;;  %v1523_v15 = vld [vmem:[%s2013_s1 + $0x98] sm:$0xff]   ;;  %v1527_v19 = vld [vmem:[%s2013_s1 + $0xa0] sm:$0xff]   ;;  %v1531_v23 = vld [vmem:[%s2013_s1 + $0xa8] sm:$0xff]  }
   0x9   :  { %1370 = vmatpush3.bf16.msra.mxu1 %v1515_v7  ;;  %v1532_v24 = vld [vmem:[%s2013_s1 + $0x70] sm:$0xff]   ;;  %v1536_v28 = vld [vmem:[%s2013_s1 + $0x78] sm:$0xff]   ;;  %v1543_v34 = vld [vmem:[%s2013_s1 + $0x140] sm:$0xff]  }
   0xa   :  { %1371 = vmatprep.subr.bf16.mxu1 %v1518_v10  ;;  %v1533_v25 = vld [vmem:[%s2013_s1 + $0x30] sm:$0xff]   ;;  %v1537_v29 = vld [vmem:[%s2013_s1 + $0x38] sm:$0xff]   ;;  %v1546_v36 = vld [vmem:[%s2014_s0 + $0xc] ss:$52 sps:$4 sm:$0xff]  }
   0xb   :  { %1350 = vmatpush3.bf16.msra.mxu0 %v1517_v9  ;;  %v1534_v26 = vld [vmem:[%s2013_s1 + $0xf0] sm:$0xff]   ;;  %v1538_v30 = vld [vmem:[%s2013_s1 + $0xf8] sm:$0xff]   ;;  %v1547_v37 = vld [vmem:[%s2013_s1 + $0x100] sm:$0xff]   ;;  %1007 = vmatprep.mubr.bf16.mxu1 %v1546_v36 }
   0xc   :  { %1351 = vmatprep.subr.bf16.mxu0 %v1520_v12  ;;  %v1535_v27 = vld [vmem:[%s2013_s1 + $0xb0] sm:$0xff]   ;;  %v1541_v32 = vld [vmem:[%s2014_s0 + $0x4] ss:$52 sps:$4 sm:$0xff]   ;;  %v1544_v35 = vld [vmem:[%s2014_s0 + $0x8] ss:$52 sps:$4 sm:$0xff]  }
   0xd   :  { %1372 = vmatpush3.bf16.msra.mxu1 %v1519_v11  ;;  %v1539_v31 = vld [vmem:[%s2014_s0] ss:$52 sps:$4 sm:$0xff]   ;;  %v1542_v33 = vld [vmem:[%s2013_s1 + $0xb8] sm:$0xff]   ;;  %966 = vmatprep.mubr.bf16.mxu0 %v1541_v32  ;;  %v1550_v40 = vld [vmem:[%s2013_s1 + $0x148] sm:$0xff]  }
   0xe   :  { %1373 = vmatprep.subr.bf16.mxu1 %v1522_v14  ;;  %v1548_v38 = vld [vmem:[%s2013_s1 + $0x1c0] sm:$0xff]   ;;  %v1551_v41 = vld [vmem:[%s2013_s1 + $0x108] sm:$0xff]   ;;  %v1554_v44 = vld [vmem:[%s2013_s1 + $0x150] sm:$0xff]  }
   0xf   :  { %1352 = vmatpush3.bf16.msra.mxu0 %v1521_v13  ;;  %v1549_v39 = vld [vmem:[%s2013_s1 + $0x180] sm:$0xff]   ;;  %v1552_v42 = vld [vmem:[%s2013_s1 + $0x1c8] sm:$0xff]   ;;  %v1555_v45 = vld [vmem:[%s2013_s1 + $0x110] sm:$0xff]  }
  0x10   :  { %1353 = vmatprep.subr.bf16.mxu0 %v1524_v16  ;;  %v1553_v43 = vld [vmem:[%s2013_s1 + $0x188] sm:$0xff]   ;;  %v1556_v46 = vld [vmem:[%s2013_s1 + $0x1d0] sm:$0xff]   ;;  %v1558_v48 = vld [vmem:[%s2013_s1 + $0x158] sm:$0xff]  }
  0x11   :  { %1374 = vmatpush3.bf16.msra.mxu1 %v1523_v15  ;;  %v1557_v47 = vld [vmem:[%s2013_s1 + $0x190] sm:$0xff]   ;;  %v1559_v49 = vld [vmem:[%s2013_s1 + $0x118] sm:$0xff]   ;;  %v1562_v52 = vld [vmem:[%s2013_s1 + $0x160] sm:$0xff]  }
  0x12   :  { %1375 = vmatprep.subr.bf16.mxu1 %v1526_v18  ;;  %v1560_v50 = vld [vmem:[%s2013_s1 + $0x1d8] sm:$0xff]   ;;  %v1563_v53 = vld [vmem:[%s2013_s1 + $0x120] sm:$0xff]   ;;  %v1566_v56 = vld [vmem:[%s2013_s1 + $0x168] sm:$0xff]  }
  0x13   :  { %1354 = vmatpush3.bf16.msra.mxu0 %v1525_v17  ;;  %v1561_v51 = vld [vmem:[%s2013_s1 + $0x198] sm:$0xff]   ;;  %v1564_v54 = vld [vmem:[%s2013_s1 + $0x1e0] sm:$0xff]   ;;  %v1567_v57 = vld [vmem:[%s2013_s1 + $0x128] sm:$0xff]  }
  0x14   :  { %1355 = vmatprep.subr.bf16.mxu0 %v1528_v20  ;;  %v1565_v55 = vld [vmem:[%s2013_s1 + $0x1a0] sm:$0xff]   ;;  %v1568_v58 = vld [vmem:[%s2013_s1 + $0x1e8] sm:$0xff]   ;;  %v1570_v60 = vld [vmem:[%s2013_s1 + $0x170] sm:$0xff]  }
  0x15   :  { %1376 = vmatpush3.bf16.msra.mxu1 %v1527_v19  ;;  %v1569_v59 = vld [vmem:[%s2013_s1 + $0x1a8] sm:$0xff]   ;;  %v1571_v61 = vld [vmem:[%s2013_s1 + $0x130] sm:$0xff]   ;;  %v1574_v0 = vld [vmem:[%s2013_s1 + $0x178] sm:$0xff]  }
  0x16   :  { %1377 = vmatprep.subr.bf16.mxu1 %v1530_v22  ;;  %v1572_v62 = vld [vmem:[%s2013_s1 + $0x1f0] sm:$0xff]   ;;  %v1575_v1 = vld [vmem:[%s2013_s1 + $0x138] sm:$0xff]   ;;  %v1581_v6 = vld [vmem:[%s2013_s1 + $0x240] sm:$0xff]  }
  0x17   :  { %1356 = vmatpush3.bf16.msra.mxu0 %v1529_v21  ;;  %v1573_v63 = vld [vmem:[%s2013_s1 + $0x1b0] sm:$0xff]   ;;  %v1576_v2 = vld [vmem:[%s2013_s1 + $0x1f8] sm:$0xff]   ;;  %v1585_v9 = vld [vmem:[%s2013_s1 + $0x200] sm:$0xff]  }
  0x18   :  { %1357 = vmatprep.subr.bf16.mxu0 %v1532_v24  ;;  %v1577_v3 = vld [vmem:[%s2014_s0 + $0x10] ss:$52 sps:$4 sm:$0xff]   ;;  %v1579_v4 = vld [vmem:[%s2014_s0 + $0x14] ss:$52 sps:$4 sm:$0xff]   ;;  %v1580_v5 = vld [vmem:[%s2013_s1 + $0x1b8] sm:$0xff]  }
  0x19   :  { %1378 = vmatpush3.bf16.msra.mxu1 %v1531_v23  ;;  %v1582_v7 = vld [vmem:[%s2014_s0 + $0x18] ss:$52 sps:$4 sm:$0xff]   ;;  %v1584_v8 = vld [vmem:[%s2014_s0 + $0x1c] ss:$52 sps:$4 sm:$0xff]   ;;  %v1586_v10 = vld [vmem:[%s2013_s1 + $0x2c0] sm:$0xff]  }
  0x1a   :  { %1379 = vmatprep.subr.bf16.mxu1 %v1534_v26  ;;  %v1587_v11 = vld [vmem:[%s2013_s1 + $0x280] sm:$0xff]   ;;  %v1588_v12 = vld [vmem:[%s2013_s1 + $0x248] sm:$0xff]   ;;  %v1592_v16 = vld [vmem:[%s2013_s1 + $0x250] sm:$0xff]  }
  0x1b   :  { %1358 = vmatpush3.bf16.msra.mxu0 %v1533_v25  ;;  %v1589_v13 = vld [vmem:[%s2013_s1 + $0x208] sm:$0xff]   ;;  %v1593_v17 = vld [vmem:[%s2013_s1 + $0x210] sm:$0xff]   ;;  %v1596_v20 = vld [vmem:[%s2013_s1 + $0x258] sm:$0xff]  }
  0x1c   :  { %1359 = vmatprep.subr.bf16.mxu0 %v1536_v28  ;;  %v1590_v14 = vld [vmem:[%s2013_s1 + $0x2c8] sm:$0xff]   ;;  %v1594_v18 = vld [vmem:[%s2013_s1 + $0x2d0] sm:$0xff]   ;;  %v1597_v21 = vld [vmem:[%s2013_s1 + $0x218] sm:$0xff]  }
  0x1d   :  { %1380 = vmatpush3.bf16.msra.mxu1 %v1535_v27  ;;  %v1591_v15 = vld [vmem:[%s2013_s1 + $0x288] sm:$0xff]   ;;  %v1595_v19 = vld [vmem:[%s2013_s1 + $0x290] sm:$0xff]   ;;  %v1598_v22 = vld [vmem:[%s2013_s1 + $0x2d8] sm:$0xff]  }
  0x1e   :  { %1381 = vmatprep.subr.bf16.mxu1 %v1538_v30  ;;  %v1599_v23 = vld [vmem:[%s2013_s1 + $0x298] sm:$0xff]   ;;  %v1600_v24 = vld [vmem:[%s2013_s1 + $0x260] sm:$0xff]   ;;  %v1604_v28 = vld [vmem:[%s2013_s1 + $0x268] sm:$0xff]  }
  0x1f   :  { %1360 = vmatpush3.bf16.msra.mxu0 %v1537_v29  ;;  %v1601_v25 = vld [vmem:[%s2013_s1 + $0x220] sm:$0xff]   ;;  %v1605_v29 = vld [vmem:[%s2013_s1 + $0x228] sm:$0xff]   ;;  %v1608_v32 = vld [vmem:[%s2013_s1 + $0x270] sm:$0xff]  }
  0x20   :  { %1389 = vmatprep.subr.bf16.mxu0 %v1543_v34  ;;  %v1602_v26 = vld [vmem:[%s2013_s1 + $0x2e0] sm:$0xff]   ;;  %v1606_v30 = vld [vmem:[%s2013_s1 + $0x2e8] sm:$0xff]   ;;  %v1610_v34 = vld [vmem:[%s2013_s1 + $0x2f0] sm:$0xff]  }
  0x21   :  { %1382 = vmatpush3.bf16.msra.mxu1 %v1542_v33  ;;  %v1603_v27 = vld [vmem:[%s2013_s1 + $0x2a0] sm:$0xff]   ;;  %v1609_v33 = vld [vmem:[%s2013_s1 + $0x230] sm:$0xff]   ;;  %v1612_v36 = vld [vmem:[%s2013_s1 + $0x278] sm:$0xff]  }
  0x22   :  { %967 = vmatmul.mubr.bf16.vlgmr.msra.gmra.mrb[0].mxu0 %v1539_v31  ;;  %1411 = vmatprep.subr.bf16.mxu1 %v1548_v38  ;;  %v1607_v31 = vld [vmem:[%s2013_s1 + $0x2a8] sm:$0xff]   ;;  %v1614_v38 = vld [vmem:[%s2013_s1 + $0x2f8] sm:$0xff]  }
  0x23   :  { %1390 = vmatpush3.bf16.msra.mxu0 %v1547_v37  ;;  %1048 = vmatprep.mubr.bf16.mxu0 %v1579_v4  ;;  %v1613_v37 = vld [vmem:[%s2013_s1 + $0x238] sm:$0xff]  }
  0x24   :  { %1008 = vmatmul.mubr.bf16.vlgmr.msra.gmra.mrb[0].mxu1 %v1544_v35  ;;  %1391 = vmatprep.subr.bf16.mxu0 %v1550_v40  ;;  %v1611_v35 = vld [vmem:[%s2013_s1 + $0x2b0] sm:$0xff]   ;;  %v1617_v40 = vld [vmem:[%s2014_s0 + $0x24] ss:$52 sps:$4 sm:$0xff]  }
  0x25   :  { %1412 = vmatpush3.bf16.msra.mxu1 %v1549_v39  ;;  %1089 = vmatprep.mubr.bf16.mxu1 %v1584_v8  ;;  %v1615_v39 = vld [vmem:[%s2014_s0 + $0x20] ss:$52 sps:$4 sm:$0xff]  }
  0x26   :  { %1413 = vmatprep.subr.bf16.mxu1 %v1552_v42  ;;  %v1631_v42 = vmov 0.0  }
  0x27   :  { %1392 = vmatpush3.bf16.msra.mxu0 %v1551_v41  ;;  %v1618_v41 = vld [vmem:[%s2013_s1 + $0x2b8] sm:$0xff]  }
  0x28   :  { %1393 = vmatprep.subr.bf16.mxu0 %v1554_v44  ;;  %v1621_v44 = vld [vmem:[%s2014_s0 + $0x2c] ss:$52 sps:$4 sm:$0xff]  }
  0x29   :  { %1414 = vmatpush3.bf16.msra.mxu1 %v1553_v43  ;;  %v1619_v43 = vld [vmem:[%s2014_s0 + $0x28] ss:$52 sps:$4 sm:$0xff]  }
  0x2a   :  { %1415 = vmatprep.subr.bf16.mxu1 %v1556_v46  ;;  %v1623_v46 = vld [vmem:[%s2013_s1 + $0x308] sm:$0xff]  }
  0x2b   :  { %1394 = vmatpush3.bf16.msra.mxu0 %v1555_v45  ;;  %v1622_v45 = vld [vmem:[%s2013_s1 + $0x300] sm:$0xff]  }
  0x2c   :  { %1395 = vmatprep.subr.bf16.mxu0 %v1558_v48  ;;  %v1625_v48 = vld [vmem:[%s2013_s1 + $0x318] sm:$0xff]  }
  0x2d   :  { %1416 = vmatpush3.bf16.msra.mxu1 %v1557_v47  ;;  %v1624_v47 = vld [vmem:[%s2013_s1 + $0x310] sm:$0xff]  }
  0x2e   :  { %1417 = vmatprep.subr.bf16.mxu1 %v1560_v50  ;;  %v1627_v50 = vld [vmem:[%s2013_s1 + $0x328] sm:$0xff]  }
  0x2f   :  { %1396 = vmatpush3.bf16.msra.mxu0 %v1559_v49  ;;  %v1626_v49 = vld [vmem:[%s2013_s1 + $0x320] sm:$0xff]  }
  0x30   :  { %1397 = vmatprep.subr.bf16.mxu0 %v1562_v52  ;;  %v1629_v52 = vld [vmem:[%s2013_s1 + $0x338] sm:$0xff]  }
  0x31   :  { %1418 = vmatpush3.bf16.msra.mxu1 %v1561_v51  ;;  %v1628_v51 = vld [vmem:[%s2013_s1 + $0x330] sm:$0xff]  }
  0x32   :  { %1419 = vmatprep.subr.bf16.mxu1 %v1564_v54 }
  0x33   :  { %1398 = vmatpush3.bf16.msra.mxu0 %v1563_v53  ;;  %v1630_v53 = vld [vmem:[%s2014_s0 + $0x30] ss:$52 sps:$4 sm:$0xff]  }
  0x34   :  { %1399 = vmatprep.subr.bf16.mxu0 %v1566_v56 }
  0x35   :  { %1420 = vmatpush3.bf16.msra.mxu1 %v1565_v55  ;;  %v1227_v55 = vld [vmem:[%s2015_s2] ss:$0 sm:$0xff] }
  0x36   :  { %1421 = vmatprep.subr.bf16.mxu1 %v1568_v58 }
  0x37   :  { %1400 = vmatpush3.bf16.msra.mxu0 %v1567_v57 }
  0x38   :  { %1401 = vmatprep.subr.bf16.mxu0 %v1570_v60 }
  0x39   :  { %1422 = vmatpush3.bf16.msra.mxu1 %v1569_v59 }
  0x3a   :  { %1423 = vmatprep.subr.bf16.mxu1 %v1572_v62 }
  0x3b   :  { %1402 = vmatpush3.bf16.msra.mxu0 %v1571_v61 }
  0x3c   :  { %1403 = vmatprep.subr.bf16.mxu0 %v1574_v0 }
  0x3d   :  { %1424 = vmatpush3.bf16.msra.mxu1 %v1573_v63 }
  0x3e   :  { %1425 = vmatprep.subr.bf16.mxu1 %v1576_v2 }
  0x3f   :  { %1404 = vmatpush3.bf16.msra.mxu0 %v1575_v1 }
  0x40   :  { %1433 = vmatprep.subr.bf16.mxu0 %v1581_v6 }
  0x41   :  { %1426 = vmatpush3.bf16.msra.mxu1 %v1580_v5 }
  0x42   :  { %1049 = vmatmul.mubr.bf16.vlgmr.msra.gmra.mrb[4].mxu0 %v1577_v3  ;;  %1455 = vmatprep.subr.bf16.mxu1 %v1586_v10 }
  0x43   :  { %1434 = vmatpush3.bf16.msra.mxu0 %v1585_v9  ;;  %1130 = vmatprep.mubr.bf16.mxu0 %v1617_v40 }
  0x44   :  { %1090 = vmatmul.mubr.bf16.vlgmr.msra.gmra.mrb[4].mxu1 %v1582_v7  ;;  %1435 = vmatprep.subr.bf16.mxu0 %v1588_v12 }
  0x45   :  { %1456 = vmatpush3.bf16.msra.mxu1 %v1587_v11  ;;  %1171 = vmatprep.mubr.bf16.mxu1 %v1621_v44 }
  0x46   :  { %1457 = vmatprep.subr.bf16.mxu1 %v1590_v14 }
  0x47   :  { %1436 = vmatpush3.bf16.msra.mxu0 %v1589_v13 }
  0x48   :  { %1437 = vmatprep.subr.bf16.mxu0 %v1592_v16 }
  0x49   :  { %1458 = vmatpush3.bf16.msra.mxu1 %v1591_v15 }
  0x4a   :  { %1459 = vmatprep.subr.bf16.mxu1 %v1594_v18 }
  0x4b   :  { %1438 = vmatpush3.bf16.msra.mxu0 %v1593_v17 }
  0x4c   :  { %1439 = vmatprep.subr.bf16.mxu0 %v1596_v20 }
  0x4d   :  { %1460 = vmatpush3.bf16.msra.mxu1 %v1595_v19 }
  0x4e   :  { %1461 = vmatprep.subr.bf16.mxu1 %v1598_v22 }
  0x4f   :  { %1440 = vmatpush3.bf16.msra.mxu0 %v1597_v21 }
  0x50   :  { %1441 = vmatprep.subr.bf16.mxu0 %v1600_v24 }
  0x51   :  { %1462 = vmatpush3.bf16.msra.mxu1 %v1599_v23 }
  0x52   :  { %1463 = vmatprep.subr.bf16.mxu1 %v1602_v26 }
  0x53   :  { %1442 = vmatpush3.bf16.msra.mxu0 %v1601_v25 }
  0x54   :  { %1443 = vmatprep.subr.bf16.mxu0 %v1604_v28 }
  0x55   :  { %1464 = vmatpush3.bf16.msra.mxu1 %v1603_v27 }
  0x56   :  { %1465 = vmatprep.subr.bf16.mxu1 %v1606_v30 }
  0x57   :  { %1444 = vmatpush3.bf16.msra.mxu0 %v1605_v29 }
  0x58   :  { %1445 = vmatprep.subr.bf16.mxu0 %v1608_v32 }
  0x59   :  { %1466 = vmatpush3.bf16.msra.mxu1 %v1607_v31 }
  0x5a   :  { %1467 = vmatprep.subr.bf16.mxu1 %v1610_v34 }
  0x5b   :  { %1446 = vmatpush3.bf16.msra.mxu0 %v1609_v33 }
  0x5c   :  { %1447 = vmatprep.subr.bf16.mxu0 %v1612_v36 }
  0x5d   :  { %1468 = vmatpush3.bf16.msra.mxu1 %v1611_v35 }
  0x5e   :  { %1469 = vmatprep.subr.bf16.mxu1 %v1614_v38 }
  0x5f   :  { %1448 = vmatpush3.bf16.msra.mxu0 %v1613_v37 }
  0x60   :  { %1486 = vmatprep.subr.bf16.mxu0 %v1631_v42 }
  0x61   :  { %1470 = vmatpush3.bf16.msra.mxu1 %v1618_v41 }
  0x62   :  { %1131 = vmatmul.mubr.bf16.vlgmr.msra.gmra.mrb[8].mxu0 %v1615_v39 }
  0x63   :  { %1502 = vmatprep.mubr.msk.bf16.mxu0 %vm1632_vm0, %v1631_v42  ;;  %1487 = vmatpush3.bf16.msra.mxu0 %v1622_v45 }
  0x64   :  { %1172 = vmatmul.mubr.bf16.vlgmr.msra.gmra.mrb[8].mxu1 %v1619_v43  ;;  %1488 = vmatprep.subr.bf16.mxu0 %v1631_v42 }
  0x67   :  { %1489 = vmatpush3.bf16.msra.mxu0 %v1623_v46 }
  0x68   :  { %1490 = vmatprep.subr.bf16.mxu0 %v1631_v42 }
  0x6b   :  { %1491 = vmatpush3.bf16.msra.mxu0 %v1624_v47 }
  0x6c   :  { %1492 = vmatprep.subr.bf16.mxu0 %v1631_v42 }
  0x6f   :  { %1493 = vmatpush3.bf16.msra.mxu0 %v1625_v48 }
  0x70   :  { %1494 = vmatprep.subr.bf16.mxu0 %v1631_v42 }
  0x73   :  { %1495 = vmatpush3.bf16.msra.mxu0 %v1626_v49 }
  0x74   :  { %1496 = vmatprep.subr.bf16.mxu0 %v1631_v42 }
  0x77   :  { %1497 = vmatpush3.bf16.msra.mxu0 %v1627_v50 }
  0x78   :  { %1498 = vmatprep.subr.bf16.mxu0 %v1631_v42 }
  0x7b   :  { %1499 = vmatpush3.bf16.msra.mxu0 %v1628_v51 }
  0x7c   :  { %1500 = vmatprep.subr.bf16.mxu0 %v1631_v42 }
  0x7f   :  { %1501 = vmatpush3.bf16.msra.mxu0 %v1629_v52 }
  0x82   :  { %1503 = vmatmul.mubr.bf16.vlgmr.msra.gmra.mrb[12].mxu0 %v1630_v53 }
  0xf5   :  { %v1361_v54 = vpop.f32.mrb[0].mxu0 }
  0xf6   :  { %v1362_v56 = vpop.f32.mrb[1].mxu0 }
  0xf7   :  { %v1363_v57 = vadd.f32 %v1362_v56, %v1361_v54  ;;  %v1364_v58 = vpop.f32.mrb[2].mxu0  ;;  %v1383_v59 = vpop.f32.mrb[0].mxu1 }
  0xf8   :  { %v1365_v60 = vpop.f32.mrb[3].mxu0  ;;  %v1384_v63 = vpop.f32.mrb[1].mxu1 }
  0xf9   :  { %v969_v61 = vadd.f32 %v1363_v57, %v1227_v55  ;;  %v1366_v62 = vadd.f32 %v1365_v60, %v1364_v58  ;;  %v1385_v0 = vadd.f32 %v1384_v63, %v1383_v59  ;;  %v1386_v1 = vpop.f32.mrb[2].mxu1 }
  0xfa   :  { %v1387_v3 = vpop.f32.mrb[3].mxu1 }
  0xfb   :  { %v972_v2 = vadd.f32 %v1366_v62, %v1227_v55  ;;  %v1010_v4 = vadd.f32 %v1385_v0, %v969_v61  ;;  %v1388_v5 = vadd.f32 %v1387_v3, %v1386_v1 }
  0xfd   :  { %v1013_v6 = vadd.f32 %v1388_v5, %v972_v2 }
 0x115   :  { %v1405_v7 = vpop.f32.mrb[4].mxu0 }
 0x116   :  { %v1406_v8 = vpop.f32.mrb[5].mxu0 }
 0x117   :  { %v1407_v9 = vadd.f32 %v1406_v8, %v1405_v7  ;;  %v1408_v10 = vpop.f32.mrb[6].mxu0  ;;  %v1427_v13 = vpop.f32.mrb[4].mxu1 }
 0x118   :  { %v1409_v11 = vpop.f32.mrb[7].mxu0  ;;  %v1428_v15 = vpop.f32.mrb[5].mxu1 }
 0x119   :  { %v1051_v12 = vadd.f32 %v1407_v9, %v1010_v4  ;;  %v1410_v14 = vadd.f32 %v1409_v11, %v1408_v10  ;;  %v1429_v17 = vadd.f32 %v1428_v15, %v1427_v13  ;;  %v1430_v18 = vpop.f32.mrb[6].mxu1 }
 0x11a   :  { %v1431_v19 = vpop.f32.mrb[7].mxu1 }
 0x11b   :  { %v1054_v16 = vadd.f32 %v1410_v14, %v1013_v6  ;;  %v1092_v20 = vadd.f32 %v1429_v17, %v1051_v12  ;;  %v1432_v21 = vadd.f32 %v1431_v19, %v1430_v18 }
 0x11d   :  { %v1095_v22 = vadd.f32 %v1432_v21, %v1054_v16 }
 0x135   :  { %v1449_v23 = vpop.f32.mrb[8].mxu0 }
 0x136   :  { %v1450_v24 = vpop.f32.mrb[9].mxu0 }
 0x137   :  { %v1451_v25 = vadd.f32 %v1450_v24, %v1449_v23  ;;  %v1452_v26 = vpop.f32.mrb[10].mxu0  ;;  %v1471_v27 = vpop.f32.mrb[8].mxu1 }
 0x138   :  { %v1453_v28 = vpop.f32.mrb[11].mxu0  ;;  %v1472_v31 = vpop.f32.mrb[9].mxu1 }
 0x139   :  { %v1133_v29 = vadd.f32 %v1451_v25, %v1092_v20  ;;  %v1454_v30 = vadd.f32 %v1453_v28, %v1452_v26  ;;  %v1473_v32 = vadd.f32 %v1472_v31, %v1471_v27  ;;  %v1474_v33 = vpop.f32.mrb[10].mxu1 }
 0x13a   :  { %v1475_v35 = vpop.f32.mrb[11].mxu1 }
 0x13b   :  { %v1136_v34 = vadd.f32 %v1454_v30, %v1095_v22  ;;  %v1476_v36 = vadd.f32 %v1475_v35, %v1474_v33  ;;  %v1174_v37 = vadd.f32 %v1473_v32, %v1133_v29 }
 0x13d   :  { %v1177_v38 = vadd.f32 %v1476_v36, %v1136_v34 }
 0x155   :  { %v1214_v39 = vpop.f32.mrb[12].mxu0 }
 0x156   :  { %v1215_v40 = vadd.f32 %v1214_v39, %v1174_v37  ;;  %v1504_v41 = vpop.f32.mrb[13].mxu0 }
 0x157   :  { %v1217_v42 = vpop.f32.mrb[14].mxu0 }
 0x158   :  { %1221 = vst [vmem:[%s2016_s3] sm:$0xff] %v1215_v40  ;;  %v1218_v43 = vadd.f32 %v1217_v42, %v1177_v38  ;;  %v1505_v44 = vpop.f32.mrb[15].mxu0 }
 0x15a   :  { %1222 = vst [vmem:[%s2016_s3 + $0x8] sm:$0xff] %v1218_v43 }

// kernel: autoencoder_forward.9
= control target key start
LH: loop header
LB: loop body
LE: loop exit
PB: predicated region body
PF: predicated region fallthrough
CT: control target
= control target key end

     0   :  { %vm5484_vm0 = vmmov 0   ;;  %s6965_s1 = inlined_call_operand.vmem [shape: bf16[3200,128], index: 1, kind: input, shape index: {}]   ;;  %s6966_s0 = inlined_call_operand.vmem [shape: bf16[112,3200], index: 0, kind: input, shape index: {}]   ;;  %s6967_s2 = inlined_call_operand.vmem [shape: f32[1,128], index: 2, kind: input, shape index: {}]   ;;  %s6968_s3 = inlined_call_operand.vmem [shape: f32[112,128], index: 3, kind: output, shape index: {}]  }
   0x1   :  { %v5024_v0 = vld [vmem:[%s6965_s1 + $0x40] sm:$0xff]   ;;  %v5026_v2 = vld [vmem:[%s6965_s1 + $0x48] sm:$0xff]   ;;  %v5028_v4 = vld [vmem:[%s6965_s1 + $0x50] sm:$0xff]  }
   0x2   :  { %v5025_v1 = vld [vmem:[%s6965_s1] sm:$0xff]   ;;  %5006 = vmatprep.subr.bf16.mxu1 %v5024_v0  ;;  %4251 = vmatprep.subr.bf16.mxu0 %v5024_v0  ;;  %v5027_v3 = vld [vmem:[%s6965_s1 + $0x8] sm:$0xff]   ;;  %v5029_v5 = vld [vmem:[%s6965_s1 + $0x10] sm:$0xff]  }
   0x3   :  { %5014 = vmatpush3.bf16.msra.mxu1 %v5025_v1  ;;  %4252 = vmatpush3.bf16.msra.mxu0 %v5025_v1  ;;  %v5030_v6 = vld [vmem:[%s6965_s1 + $0x58] sm:$0xff]   ;;  %v5032_v8 = vld [vmem:[%s6965_s1 + $0x60] sm:$0xff]   ;;  %v5034_v10 = vld [vmem:[%s6965_s1 + $0x68] sm:$0xff]  }
   0x4   :  { %5007 = vmatprep.subr.bf16.mxu1 %v5026_v2  ;;  %4253 = vmatprep.subr.bf16.mxu0 %v5026_v2  ;;  %v5031_v7 = vld [vmem:[%s6965_s1 + $0x18] sm:$0xff]   ;;  %v5033_v9 = vld [vmem:[%s6965_s1 + $0x20] sm:$0xff]   ;;  %v5035_v12 = vld [vmem:[%s6965_s1 + $0x28] sm:$0xff]  }
   0x5   :  { %v5042_v11 = vld [vmem:[%s6966_s0 + $0x324] ss:$100 sps:$4 sm:$0xff]   ;;  %v5036_v14 = vld [vmem:[%s6965_s1 + $0x70] sm:$0xff]   ;;  %v5038_v16 = vld [vmem:[%s6965_s1 + $0x78] sm:$0xff]  }
   0x6   :  { %v5046_v13 = vld [vmem:[%s6966_s0 + $0x4] ss:$100 sps:$4 sm:$0xff]   ;;  %2750 = vmatprep.mubr.bf16.mxu1 %v5042_v11  ;;  %v5037_v15 = vld [vmem:[%s6965_s1 + $0x30] sm:$0xff]   ;;  %v5039_v17 = vld [vmem:[%s6965_s1 + $0x38] sm:$0xff]  }
   0x7   :  { %5015 = vmatpush3.bf16.msra.mxu1 %v5027_v3  ;;  %4254 = vmatpush3.bf16.msra.mxu0 %v5027_v3  ;;  %v5043_v18 = vld [vmem:[%s6965_s1 + $0xc0] sm:$0xff]   ;;  %v5050_v24 = vld [vmem:[%s6965_s1 + $0xc8] sm:$0xff]   ;;  %v5054_v30 = vld [vmem:[%s6965_s1 + $0xd0] sm:$0xff]  }
   0x8   :  { %5008 = vmatprep.subr.bf16.mxu1 %v5028_v4  ;;  %4255 = vmatprep.subr.bf16.mxu0 %v5028_v4  ;;  %v5040_v19 = vld [vmem:[%s6966_s0 + $0x320] ss:$100 sps:$4 sm:$0xff]   ;;  %v5052_v25 = vld [vmem:[%s6965_s1 + $0x148] sm:$0xff]   ;;  %v5059_v31 = vld [vmem:[%s6965_s1 + $0x150] sm:$0xff]  }
   0x9   :  { %2718 = vmatprep.mubr.bf16.mxu0 %v5046_v13  ;;  %v5044_v20 = vld [vmem:[%s6966_s0] ss:$100 sps:$4 sm:$0xff]   ;;  %v5055_v26 = vld [vmem:[%s6966_s0 + $0xcc] ss:$100 sps:$4 sm:$0xff]   ;;  %v5061_v36 = vld [vmem:[%s6965_s1 + $0xd8] sm:$0xff]  }
   0xa   :  { %v5048_v21 = vld [vmem:[%s6965_s1 + $0x140] sm:$0xff]   ;;  %v5051_v27 = vld [vmem:[%s6965_s1 + $0x88] sm:$0xff]   ;;  %v5057_v32 = vld [vmem:[%s6965_s1 + $0x90] sm:$0xff]  }
   0xb   :  { %5016 = vmatpush3.bf16.msra.mxu1 %v5029_v5  ;;  %4256 = vmatpush3.bf16.msra.mxu0 %v5029_v5  ;;  %v5047_v22 = vld [vmem:[%s6965_s1 + $0x80] sm:$0xff]   ;;  %v5062_v28 = vld [vmem:[%s6966_s0 + $0x3ec] ss:$100 sps:$4 sm:$0xff]   ;;  %v5066_v37 = vld [vmem:[%s6965_s1 + $0x158] sm:$0xff]  }
   0xc   :  { %5009 = vmatprep.subr.bf16.mxu1 %v5030_v6  ;;  %4257 = vmatprep.subr.bf16.mxu0 %v5030_v6  ;;  %v5049_v23 = vld [vmem:[%s6965_s1 + $0x100] sm:$0xff]   ;;  %v5053_v29 = vld [vmem:[%s6965_s1 + $0x108] sm:$0xff]   ;;  %v5060_v35 = vld [vmem:[%s6965_s1 + $0x110] sm:$0xff]  }
   0xd   :  { %v5058_v33 = vld [vmem:[%s6966_s0 + $0xc8] ss:$100 sps:$4 sm:$0xff]   ;;  %v5064_v38 = vld [vmem:[%s6965_s1 + $0x98] sm:$0xff]   ;;  %v5068_v41 = vld [vmem:[%s6965_s1 + $0xe0] sm:$0xff]  }
   0xe   :  { %v5065_v34 = vld [vmem:[%s6966_s0 + $0x3e8] ss:$100 sps:$4 sm:$0xff]   ;;  %v5067_v39 = vld [vmem:[%s6965_s1 + $0x118] sm:$0xff]   ;;  %v5073_v42 = vld [vmem:[%s6965_s1 + $0x160] sm:$0xff]  }
   0xf   :  { %5017 = vmatpush3.bf16.msra.mxu1 %v5031_v7  ;;  %4258 = vmatpush3.bf16.msra.mxu0 %v5031_v7  ;;  %v5069_v40 = vld [vmem:[%s6966_s0 + $0x194] ss:$100 sps:$4 sm:$0xff]   ;;  %v5071_v44 = vld [vmem:[%s6965_s1 + $0xa0] sm:$0xff]   ;;  %v5075_v48 = vld [vmem:[%s6965_s1 + $0xe8] sm:$0xff]  }
  0x10   :  { %5010 = vmatprep.subr.bf16.mxu1 %v5032_v8  ;;  %4259 = vmatprep.subr.bf16.mxu0 %v5032_v8  ;;  %v5076_v43 = vld [vmem:[%s6966_s0 + $0x4b4] ss:$100 sps:$4 sm:$0xff]   ;;  %v5074_v46 = vld [vmem:[%s6965_s1 + $0x120] sm:$0xff]   ;;  %v5080_v49 = vld [vmem:[%s6965_s1 + $0x168] sm:$0xff]  }
  0x11   :  { %v5072_v45 = vld [vmem:[%s6966_s0 + $0x190] ss:$100 sps:$4 sm:$0xff]   ;;  %v5078_v50 = vld [vmem:[%s6965_s1 + $0xa8] sm:$0xff]   ;;  %v5083_v51 = vld [vmem:[%s6966_s0 + $0x25c] ss:$100 sps:$4 sm:$0xff]  }
  0x12   :  { %v5079_v47 = vld [vmem:[%s6966_s0 + $0x4b0] ss:$100 sps:$4 sm:$0xff]   ;;  %v5081_v52 = vld [vmem:[%s6965_s1 + $0x128] sm:$0xff]   ;;  %v5086_v56 = vld [vmem:[%s6966_s0 + $0x258] ss:$100 sps:$4 sm:$0xff]  }
  0x13   :  { %5018 = vmatpush3.bf16.msra.mxu1 %v5033_v9  ;;  %4260 = vmatpush3.bf16.msra.mxu0 %v5033_v9  ;;  %v5082_v53 = vld [vmem:[%s6965_s1 + $0xf0] sm:$0xff]   ;;  %v5089_v58 = vld [vmem:[%s6965_s1 + $0xf8] sm:$0xff]   ;;  %v5096_v63 = vld [vmem:[%s6965_s1 + $0x1c0] sm:$0xff]  }
  0x14   :  { %5011 = vmatprep.subr.bf16.mxu1 %v5034_v10  ;;  %4261 = vmatprep.subr.bf16.mxu0 %v5034_v10  ;;  %v5087_v54 = vld [vmem:[%s6965_s1 + $0x170] sm:$0xff]   ;;  %v5091_v59 = vld [vmem:[%s6965_s1 + $0x178] sm:$0xff]   ;;  %v5092_v0 = vld [vmem:[%s6966_s0 + $0x8] ss:$100 sps:$4 sm:$0xff]  }
  0x15   :  { %v5085_v55 = vld [vmem:[%s6965_s1 + $0xb0] sm:$0xff]   ;;  %v5090_v60 = vld [vmem:[%s6965_s1 + $0xb8] sm:$0xff]   ;;  %v5100_v3 = vld [vmem:[%s6965_s1 + $0x180] sm:$0xff]  }
  0x16   :  { %v5088_v57 = vld [vmem:[%s6965_s1 + $0x130] sm:$0xff]   ;;  %v5095_v62 = vld [vmem:[%s6965_s1 + $0x138] sm:$0xff]   ;;  %v5101_v4 = vld [vmem:[%s6965_s1 + $0x240] sm:$0xff]  }
  0x17   :  { %5019 = vmatpush3.bf16.msra.mxu1 %v5035_v12  ;;  %4262 = vmatpush3.bf16.msra.mxu0 %v5035_v12  ;;  %v5094_v61 = vld [vmem:[%s6966_s0 + $0xc] ss:$100 sps:$4 sm:$0xff]   ;;  %v5099_v2 = vld [vmem:[%s6966_s0 + $0x14] ss:$100 sps:$4 sm:$0xff]   ;;  %v5102_v5 = vld [vmem:[%s6965_s1 + $0x200] sm:$0xff]  }
  0x18   :  { %5012 = vmatprep.subr.bf16.mxu1 %v5036_v14  ;;  %4263 = vmatprep.subr.bf16.mxu0 %v5036_v14  ;;  %v5097_v1 = vld [vmem:[%s6966_s0 + $0x10] ss:$100 sps:$4 sm:$0xff]   ;;  %v5105_v7 = vld [vmem:[%s6965_s1 + $0x1c8] sm:$0xff]   ;;  %v5108_v10 = vld [vmem:[%s6966_s0 + $0xdc] ss:$100 sps:$4 sm:$0xff]  }
  0x19   :  { %v5103_v6 = vld [vmem:[%s6966_s0 + $0xd4] ss:$100 sps:$4 sm:$0xff]   ;;  %v5107_v8 = vld [vmem:[%s6965_s1 + $0x188] sm:$0xff]  }
  0x1a   :  { %v5106_v9 = vld [vmem:[%s6966_s0 + $0xd0] ss:$100 sps:$4 sm:$0xff]   ;;  %v5110_v11 = vld [vmem:[%s6966_s0 + $0xd8] ss:$100 sps:$4 sm:$0xff]   ;;  %v5111_v12 = vld [vmem:[%s6965_s1 + $0x248] sm:$0xff]  }
  0x1b   :  { %5020 = vmatpush3.bf16.msra.mxu1 %v5037_v15  ;;  %4264 = vmatpush3.bf16.msra.mxu0 %v5037_v15  ;;  %v5112_v13 = vld [vmem:[%s6965_s1 + $0x208] sm:$0xff]   ;;  %v5113_v14 = vld [vmem:[%s6965_s1 + $0x1d0] sm:$0xff]   ;;  %v5114_v15 = vld [vmem:[%s6966_s0 + $0x19c] ss:$100 sps:$4 sm:$0xff]  }
  0x1c   :  { %5013 = vmatprep.subr.bf16.mxu1 %v5038_v16  ;;  %4265 = vmatprep.subr.bf16.mxu0 %v5038_v16  ;;  %v5116_v16 = vld [vmem:[%s6965_s1 + $0x190] sm:$0xff]  }
  0x1f   :  { %5021 = vmatpush3.bf16.msra.mxu1 %v5039_v17  ;;  %4266 = vmatpush3.bf16.msra.mxu0 %v5039_v17  ;;  %v5118_v17 = vld [vmem:[%s6966_s0 + $0x1a4] ss:$100 sps:$4 sm:$0xff]  }
  0x20   :  { %4309 = vmatprep.subr.bf16.mxu1 %v5043_v18  ;;  %4367 = vmatprep.subr.bf16.mxu0 %v5048_v21  ;;  %v5117_v18 = vld [vmem:[%s6966_s0 + $0x198] ss:$100 sps:$4 sm:$0xff]   ;;  %v5122_v21 = vld [vmem:[%s6965_s1 + $0x210] sm:$0xff]  }
  0x22   :  { %2751 = vmatmul.mubr.bf16.vlgmr.msra.gmra.mrb[0].mxu1 %v5040_v19  ;;  %2719 = vmatmul.mubr.bf16.vlgmr.msra.gmra.mrb[0].mxu0 %v5044_v20  ;;  %v5120_v19 = vld [vmem:[%s6966_s0 + $0x1a0] ss:$100 sps:$4 sm:$0xff]   ;;  %v5121_v20 = vld [vmem:[%s6965_s1 + $0x250] sm:$0xff]  }
  0x23   :  { %4310 = vmatpush3.bf16.msra.mxu1 %v5047_v22  ;;  %4368 = vmatpush3.bf16.msra.mxu0 %v5049_v23  ;;  %v5123_v22 = vld [vmem:[%s6965_s1 + $0x1d8] sm:$0xff]  }
  0x24   :  { %4311 = vmatprep.subr.bf16.mxu1 %v5050_v24  ;;  %4369 = vmatprep.subr.bf16.mxu0 %v5052_v25  ;;  %v5124_v23 = vld [vmem:[%s6965_s1 + $0x198] sm:$0xff]   ;;  %v5125_v24 = vld [vmem:[%s6966_s0 + $0x264] ss:$100 sps:$4 sm:$0xff]   ;;  %v5128_v25 = vld [vmem:[%s6966_s0 + $0x26c] ss:$100 sps:$4 sm:$0xff]  }
  0x25   :  { %2726 = vmatprep.mubr.bf16.mxu0 %v5055_v26  ;;  %2758 = vmatprep.mubr.bf16.mxu1 %v5062_v28  ;;  %v5131_v26 = vld [vmem:[%s6965_s1 + $0x258] sm:$0xff]   ;;  %v5127_v28 = vld [vmem:[%s6966_s0 + $0x260] ss:$100 sps:$4 sm:$0xff]  }
  0x27   :  { %4312 = vmatpush3.bf16.msra.mxu1 %v5051_v27  ;;  %4370 = vmatpush3.bf16.msra.mxu0 %v5053_v29  ;;  %v5132_v27 = vld [vmem:[%s6965_s1 + $0x218] sm:$0xff]   ;;  %v5133_v29 = vld [vmem:[%s6965_s1 + $0x1e0] sm:$0xff]  }
  0x28   :  { %4313 = vmatprep.subr.bf16.mxu1 %v5054_v30  ;;  %4371 = vmatprep.subr.bf16.mxu0 %v5059_v31  ;;  %v5134_v30 = vld [vmem:[%s6965_s1 + $0x1a0] sm:$0xff]   ;;  %v5130_v31 = vld [vmem:[%s6966_s0 + $0x268] ss:$100 sps:$4 sm:$0xff]  }
  0x2a   :  { %2727 = vmatmul.mubr.bf16.gmra.mrb[4].mxu0 %v5058_v33  ;;  %2759 = vmatmul.mubr.bf16.gmra.mrb[4].mxu1 %v5065_v34  ;;  %v5138_v33 = vld [vmem:[%s6966_s0 + $0x334] ss:$100 sps:$4 sm:$0xff]   ;;  %v5140_v34 = vld [vmem:[%s6965_s1 + $0x260] sm:$0xff]  }
  0x2b   :  { %4314 = vmatpush3.bf16.msra.mxu1 %v5057_v32  ;;  %4372 = vmatpush3.bf16.msra.mxu0 %v5060_v35  ;;  %v5135_v32 = vld [vmem:[%s6966_s0 + $0x32c] ss:$100 sps:$4 sm:$0xff]   ;;  %v5142_v35 = vld [vmem:[%s6965_s1 + $0x220] sm:$0xff]  }
  0x2c   :  { %4315 = vmatprep.subr.bf16.mxu1 %v5061_v36  ;;  %4373 = vmatprep.subr.bf16.mxu0 %v5066_v37  ;;  %v5143_v36 = vld [vmem:[%s6965_s1 + $0x1e8] sm:$0xff]  }
  0x2d   :  { %2734 = vmatprep.mubr.bf16.mxu0 %v5069_v40  ;;  %2766 = vmatprep.mubr.bf16.mxu1 %v5076_v43  ;;  %v5137_v37 = vld [vmem:[%s6966_s0 + $0x328] ss:$100 sps:$4 sm:$0xff]   ;;  %v5145_v40 = vld [vmem:[%s6966_s0 + $0x3f4] ss:$100 sps:$4 sm:$0xff]  }
  0x2e   :  { %v5151_v43 = vld [vmem:[%s6965_s1 + $0x228] sm:$0xff]  }
  0x2f   :  { %4316 = vmatpush3.bf16.msra.mxu1 %v5064_v38  ;;  %4374 = vmatpush3.bf16.msra.mxu0 %v5067_v39  ;;  %v5144_v38 = vld [vmem:[%s6965_s1 + $0x1a8] sm:$0xff]   ;;  %v5141_v39 = vld [vmem:[%s6966_s0 + $0x330] ss:$100 sps:$4 sm:$0xff]  }
  0x30   :  { %4317 = vmatprep.subr.bf16.mxu1 %v5068_v41  ;;  %4375 = vmatprep.subr.bf16.mxu0 %v5073_v42  ;;  %v5148_v41 = vld [vmem:[%s6965_s1 + $0x268] sm:$0xff]   ;;  %v5149_v42 = vld [vmem:[%s6966_s0 + $0x3fc] ss:$100 sps:$4 sm:$0xff]  }
  0x32   :  { %2735 = vmatmul.mubr.bf16.gmra.mrb[8].mxu0 %v5072_v45  ;;  %2767 = vmatmul.mubr.bf16.gmra.mrb[8].mxu1 %v5079_v47  ;;  %v5154_v45 = vld [vmem:[%s6965_s1 + $0x1b0] sm:$0xff]   ;;  %v5152_v47 = vld [vmem:[%s6966_s0 + $0x3f8] ss:$100 sps:$4 sm:$0xff]  }
  0x33   :  { %4318 = vmatpush3.bf16.msra.mxu1 %v5071_v44  ;;  %4376 = vmatpush3.bf16.msra.mxu0 %v5074_v46  ;;  %v5153_v44 = vld [vmem:[%s6965_s1 + $0x1f0] sm:$0xff]  }
  0x34   :  { %4319 = vmatprep.subr.bf16.mxu1 %v5075_v48  ;;  %4377 = vmatprep.subr.bf16.mxu0 %v5080_v49  ;;  %v5147_v46 = vld [vmem:[%s6966_s0 + $0x3f0] ss:$100 sps:$4 sm:$0xff]   ;;  %v5155_v48 = vld [vmem:[%s6966_s0 + $0x4bc] ss:$100 sps:$4 sm:$0xff]  }
  0x35   :  { %2742 = vmatprep.mubr.bf16.mxu0 %v5083_v51  ;;  %2807 = vmatprep.mubr.bf16.mxu1 %v5094_v61  ;;  %v5157_v49 = vld [vmem:[%s6965_s1 + $0x270] sm:$0xff]   ;;  %v5160_v51 = vld [vmem:[%s6966_s0 + $0x4c4] ss:$100 sps:$4 sm:$0xff]  }
  0x36   :  { %v5175_v61 = vld [vmem:[%s6965_s1 + $0x340] sm:$0xff]  }
  0x37   :  { %4320 = vmatpush3.bf16.msra.mxu1 %v5078_v50  ;;  %4378 = vmatpush3.bf16.msra.mxu0 %v5081_v52  ;;  %v5159_v50 = vld [vmem:[%s6965_s1 + $0x230] sm:$0xff]   ;;  %v5162_v52 = vld [vmem:[%s6965_s1 + $0x1f8] sm:$0xff]  }
  0x38   :  { %4321 = vmatprep.subr.bf16.mxu1 %v5082_v53  ;;  %4379 = vmatprep.subr.bf16.mxu0 %v5087_v54  ;;  %v5164_v53 = vld [vmem:[%s6965_s1 + $0x1b8] sm:$0xff]  }
  0x39   :  { %v5165_v54 = vld [vmem:[%s6965_s1 + $0x278] sm:$0xff]  }
  0x3a   :  { %2743 = vmatmul.mubr.bf16.gmra.mrb[12].mxu0 %v5086_v56  ;;  %v5163_v56 = vld [vmem:[%s6966_s0 + $0x4c0] ss:$100 sps:$4 sm:$0xff]  }
  0x3b   :  { %4322 = vmatpush3.bf16.msra.mxu1 %v5085_v55  ;;  %4380 = vmatpush3.bf16.msra.mxu0 %v5088_v57  ;;  %v5158_v55 = vld [vmem:[%s6966_s0 + $0x4b8] ss:$100 sps:$4 sm:$0xff]  }
  0x3c   :  { %4323 = vmatprep.subr.bf16.mxu1 %v5089_v58  ;;  %4381 = vmatprep.subr.bf16.mxu0 %v5091_v59  ;;  %v5169_v57 = vld [vmem:[%s6965_s1 + $0x238] sm:$0xff]   ;;  %v5170_v58 = vld [vmem:[%s6965_s1 + $0x2c0] sm:$0xff]  }
  0x3d   :  { %2896 = vmatprep.mubr.bf16.mxu0 %v5099_v2  ;;  %v5168_v59 = vld [vmem:[%s6966_s0 + $0x1c] ss:$100 sps:$4 sm:$0xff]   ;;  %v5177_v2 = vld [vmem:[%s6966_s0 + $0xe4] ss:$100 sps:$4 sm:$0xff]  }
  0x3f   :  { %4324 = vmatpush3.bf16.msra.mxu1 %v5090_v60  ;;  %4382 = vmatpush3.bf16.msra.mxu0 %v5095_v62  ;;  %v5173_v60 = vld [vmem:[%s6966_s0 + $0x24] ss:$100 sps:$4 sm:$0xff]   ;;  %v5166_v62 = vld [vmem:[%s6966_s0 + $0x18] ss:$100 sps:$4 sm:$0xff]  }
  0x40   :  { %4425 = vmatprep.subr.bf16.mxu1 %v5096_v63  ;;  %4483 = vmatprep.subr.bf16.mxu0 %v5101_v4  ;;  %v5171_v63 = vld [vmem:[%s6966_s0 + $0x20] ss:$100 sps:$4 sm:$0xff]   ;;  %v5182_v4 = vld [vmem:[%s6966_s0 + $0xec] ss:$100 sps:$4 sm:$0xff]  }
  0x42   :  { %2808 = vmatmul.mubr.bf16.vlgmr.msra.gmra.mrb[12].mxu1 %v5092_v0  ;;  %2897 = vmatmul.mubr.bf16.vlgmr.msra.gmra.mrb[16].mxu0 %v5097_v1  ;;  %v5174_v0 = vld [vmem:[%s6965_s1 + $0x280] sm:$0xff]  }
  0x43   :  { %4426 = vmatpush3.bf16.msra.mxu1 %v5100_v3  ;;  %4484 = vmatpush3.bf16.msra.mxu0 %v5102_v5  ;;  %v5176_v1 = vld [vmem:[%s6965_s1 + $0x300] sm:$0xff]   ;;  %v5179_v3 = vld [vmem:[%s6965_s1 + $0x2c8] sm:$0xff]  }
  0x44   :  { %2815 = vmatprep.mubr.bf16.mxu1 %v5103_v6  ;;  %4427 = vmatprep.subr.bf16.mxu1 %v5105_v7  ;;  %v5185_v5 = vld [vmem:[%s6965_s1 + $0x348] sm:$0xff]  }
  0x45   :  { %2904 = vmatprep.mubr.bf16.mxu0 %v5108_v10  ;;  %4485 = vmatprep.subr.bf16.mxu0 %v5111_v12  ;;  %v5181_v6 = vld [vmem:[%s6965_s1 + $0x288] sm:$0xff]   ;;  %v5187_v10 = vld [vmem:[%s6965_s1 + $0x2d0] sm:$0xff]  }
  0x46   :  { %v5186_v7 = vld [vmem:[%s6965_s1 + $0x308] sm:$0xff]   ;;  %v5190_v12 = vld [vmem:[%s6965_s1 + $0x290] sm:$0xff]  }
  0x47   :  { %4428 = vmatpush3.bf16.msra.mxu1 %v5107_v8  ;;  %4486 = vmatpush3.bf16.msra.mxu0 %v5112_v13  ;;  %v5180_v8 = vld [vmem:[%s6966_s0 + $0xe0] ss:$100 sps:$4 sm:$0xff]   ;;  %v5195_v13 = vld [vmem:[%s6965_s1 + $0x350] sm:$0xff]  }
  0x48   :  { %4429 = vmatprep.subr.bf16.mxu1 %v5113_v14  ;;  %4487 = vmatprep.subr.bf16.mxu0 %v5121_v20  ;;  %v5192_v14 = vld [vmem:[%s6966_s0 + $0x1b4] ss:$100 sps:$4 sm:$0xff]  }
  0x49   :  { %v5199_v20 = vld [vmem:[%s6966_s0 + $0x274] ss:$100 sps:$4 sm:$0xff]  }
  0x4a   :  { %2816 = vmatmul.mubr.bf16.gmra.mrb[16].mxu1 %v5106_v9  ;;  %2905 = vmatmul.mubr.bf16.gmra.mrb[20].mxu0 %v5110_v11  ;;  %v5184_v9 = vld [vmem:[%s6966_s0 + $0xe8] ss:$100 sps:$4 sm:$0xff]  }
  0x4b   :  { %2823 = vmatprep.mubr.bf16.mxu1 %v5114_v15  ;;  %4430 = vmatpush3.bf16.msra.mxu1 %v5116_v16  ;;  %v5188_v11 = vld [vmem:[%s6966_s0 + $0x1ac] ss:$100 sps:$4 sm:$0xff]   ;;  %v5197_v16 = vld [vmem:[%s6965_s1 + $0x2d8] sm:$0xff]  }
  0x4c   :  { %2912 = vmatprep.mubr.bf16.mxu0 %v5118_v17  ;;  %4488 = vmatpush3.bf16.msra.mxu0 %v5122_v21  ;;  %v5196_v15 = vld [vmem:[%s6965_s1 + $0x310] sm:$0xff]   ;;  %v5198_v17 = vld [vmem:[%s6965_s1 + $0x298] sm:$0xff]  }
  0x4d   :  { %4431 = vmatprep.subr.bf16.mxu1 %v5123_v22  ;;  %4489 = vmatprep.subr.bf16.mxu0 %v5131_v26  ;;  %v5202_v21 = vld [vmem:[%s6966_s0 + $0x27c] ss:$100 sps:$4 sm:$0xff]  }
  0x4e   :  { %v5205_v22 = vld [vmem:[%s6965_s1 + $0x358] sm:$0xff]   ;;  %v5214_v26 = vld [vmem:[%s6965_s1 + $0x360] sm:$0xff]  }
  0x4f   :  { %4432 = vmatpush3.bf16.msra.mxu1 %v5124_v23  ;;  %v5206_v23 = vld [vmem:[%s6965_s1 + $0x318] sm:$0xff]  }
  0x50   :  { %4490 = vmatpush3.bf16.msra.mxu0 %v5132_v27  ;;  %4433 = vmatprep.subr.bf16.mxu1 %v5133_v29  ;;  %v5201_v27 = vld [vmem:[%s6966_s0 + $0x270] ss:$100 sps:$4 sm:$0xff]   ;;  %v5209_v29 = vld [vmem:[%s6966_s0 + $0x33c] ss:$100 sps:$4 sm:$0xff]  }
  0x51   :  { %4491 = vmatprep.subr.bf16.mxu0 %v5140_v34  ;;  %v5222_v34 = vld [vmem:[%s6965_s1 + $0x368] sm:$0xff]  }
  0x52   :  { %2824 = vmatmul.mubr.bf16.gmra.mrb[20].mxu1 %v5117_v18  ;;  %2913 = vmatmul.mubr.bf16.gmra.mrb[24].mxu0 %v5120_v19  ;;  %v5191_v18 = vld [vmem:[%s6966_s0 + $0x1a8] ss:$100 sps:$4 sm:$0xff]   ;;  %v5194_v19 = vld [vmem:[%s6966_s0 + $0x1b0] ss:$100 sps:$4 sm:$0xff]  }
  0x53   :  { %2831 = vmatprep.mubr.bf16.mxu1 %v5125_v24  ;;  %2920 = vmatprep.mubr.bf16.mxu0 %v5128_v25  ;;  %v5207_v24 = vld [vmem:[%s6965_s1 + $0x2e0] sm:$0xff]  }
  0x54   :  { %4434 = vmatpush3.bf16.msra.mxu1 %v5134_v30  ;;  %4492 = vmatpush3.bf16.msra.mxu0 %v5142_v35  ;;  %v5208_v25 = vld [vmem:[%s6965_s1 + $0x2a0] sm:$0xff]   ;;  %v5225_v35 = vld [vmem:[%s6965_s1 + $0x328] sm:$0xff]  }
  0x55   :  { %4435 = vmatprep.subr.bf16.mxu1 %v5143_v36  ;;  %4493 = vmatprep.subr.bf16.mxu0 %v5148_v41  ;;  %v5212_v30 = vld [vmem:[%s6966_s0 + $0x344] ss:$100 sps:$4 sm:$0xff]   ;;  %v5211_v36 = vld [vmem:[%s6966_s0 + $0x338] ss:$100 sps:$4 sm:$0xff]   ;;  %v5223_v41 = vld [vmem:[%s6966_s0 + $0x40c] ss:$100 sps:$4 sm:$0xff]  }
  0x58   :  { %4436 = vmatpush3.bf16.msra.mxu1 %v5144_v38  ;;  %4494 = vmatpush3.bf16.msra.mxu0 %v5151_v43  ;;  %v5227_v38 = vld [vmem:[%s6965_s1 + $0x2f0] sm:$0xff]  }
  0x59   :  { %4437 = vmatprep.subr.bf16.mxu1 %v5153_v44  ;;  %4495 = vmatprep.subr.bf16.mxu0 %v5157_v49  ;;  %v5233_v43 = vld [vmem:[%s6965_s1 + $0x330] sm:$0xff]   ;;  %v5236_v44 = vld [vmem:[%s6965_s1 + $0x2f8] sm:$0xff]  }
  0x5a   :  { %2832 = vmatmul.mubr.bf16.gmra.mrb[24].mxu1 %v5127_v28  ;;  %2921 = vmatmul.mubr.bf16.gmra.mrb[28].mxu0 %v5130_v31  ;;  %v5204_v28 = vld [vmem:[%s6966_s0 + $0x278] ss:$100 sps:$4 sm:$0xff]   ;;  %v5216_v31 = vld [vmem:[%s6965_s1 + $0x320] sm:$0xff]   ;;  %v5229_v49 = vld [vmem:[%s6966_s0 + $0x4cc] ss:$100 sps:$4 sm:$0xff]  }
  0x5b   :  { %2839 = vmatprep.mubr.bf16.mxu1 %v5135_v32  ;;  %2928 = vmatprep.mubr.bf16.mxu0 %v5138_v33  ;;  %v5217_v32 = vld [vmem:[%s6965_s1 + $0x2e8] sm:$0xff]  }
  0x5c   :  { %4438 = vmatpush3.bf16.msra.mxu1 %v5154_v45  ;;  %4496 = vmatpush3.bf16.msra.mxu0 %v5159_v50  ;;  %v5218_v33 = vld [vmem:[%s6965_s1 + $0x2a8] sm:$0xff]   ;;  %v5221_v45 = vld [vmem:[%s6966_s0 + $0x400] ss:$100 sps:$4 sm:$0xff]   ;;  %v5234_v50 = vld [vmem:[%s6966_s0 + $0x4d4] ss:$100 sps:$4 sm:$0xff]  }
  0x5d   :  { %4439 = vmatprep.subr.bf16.mxu1 %v5162_v52  ;;  %4497 = vmatprep.subr.bf16.mxu0 %v5165_v54  ;;  %v5244_v52 = vld [vmem:[%s6965_s1 + $0x3c0] sm:$0xff]   ;;  %v5232_v54 = vld [vmem:[%s6966_s0 + $0x4c8] ss:$100 sps:$4 sm:$0xff]  }
  0x60   :  { %4440 = vmatpush3.bf16.msra.mxu1 %v5164_v53  ;;  %4498 = vmatpush3.bf16.msra.mxu0 %v5169_v57  ;;  %v5249_v53 = vld [vmem:[%s6965_s1 + $0x440] sm:$0xff]   ;;  %v5247_v57 = vld [vmem:[%s6966_s0 + $0x34] ss:$100 sps:$4 sm:$0xff]  }
  0x61   :  { %4541 = vmatprep.subr.bf16.mxu1 %v5170_v58  ;;  %4599 = vmatprep.subr.bf16.mxu0 %v5175_v61  ;;  %v5240_v58 = vld [vmem:[%s6966_s0 + $0x28] ss:$100 sps:$4 sm:$0xff]   ;;  %v5250_v61 = vld [vmem:[%s6965_s1 + $0x400] sm:$0xff]  }
  0x62   :  { %2840 = vmatmul.mubr.bf16.gmra.mrb[28].mxu1 %v5137_v37  ;;  %2929 = vmatmul.mubr.bf16.gmra.mrb[32].mxu0 %v5141_v39  ;;  %v5215_v37 = vld [vmem:[%s6966_s0 + $0x340] ss:$100 sps:$4 sm:$0xff]  }
  0x63   :  { %2847 = vmatprep.mubr.bf16.mxu1 %v5145_v40  ;;  %2936 = vmatprep.mubr.bf16.mxu0 %v5149_v42  ;;  %v5219_v39 = vld [vmem:[%s6966_s0 + $0x404] ss:$100 sps:$4 sm:$0xff]   ;;  %v5228_v40 = vld [vmem:[%s6965_s1 + $0x2b0] sm:$0xff]  }
  0x64   :  { %v5231_v42 = vld [vmem:[%s6965_s1 + $0x370] sm:$0xff]  }
  0x6a   :  { %2848 = vmatmul.mubr.bf16.gmra.mrb[32].mxu1 %v5147_v46  ;;  %2937 = vmatmul.mubr.bf16.gmra.mrb[36].mxu0 %v5152_v47  ;;  %v5226_v46 = vld [vmem:[%s6966_s0 + $0x408] ss:$100 sps:$4 sm:$0xff]   ;;  %v5238_v47 = vld [vmem:[%s6965_s1 + $0x2b8] sm:$0xff]  }
  0x6b   :  { %2855 = vmatprep.mubr.bf16.mxu1 %v5155_v48  ;;  %2944 = vmatprep.mubr.bf16.mxu0 %v5160_v51  ;;  %v5239_v48 = vld [vmem:[%s6965_s1 + $0x378] sm:$0xff]  }
  0x6c   :  { %v5243_v51 = vld [vmem:[%s6965_s1 + $0x338] sm:$0xff]  }
  0x72   :  { %2856 = vmatmul.mubr.bf16.gmra.mrb[36].mxu1 %v5158_v55  ;;  %2945 = vmatmul.mubr.bf16.gmra.mrb[40].mxu0 %v5163_v56  ;;  %v5237_v55 = vld [vmem:[%s6966_s0 + $0x4d0] ss:$100 sps:$4 sm:$0xff]  }
  0x73   :  { %2985 = vmatprep.mubr.bf16.mxu1 %v5168_v59  ;;  %3074 = vmatprep.mubr.bf16.mxu0 %v5173_v60  ;;  %v5242_v56 = vld [vmem:[%s6966_s0 + $0x2c] ss:$100 sps:$4 sm:$0xff]   ;;  %v5248_v60 = vld [vmem:[%s6965_s1 + $0x380] sm:$0xff]  }
  0x74   :  { %v5245_v59 = vld [vmem:[%s6966_s0 + $0x30] ss:$100 sps:$4 sm:$0xff]  }
  0x7a   :  { %2986 = vmatmul.mubr.bf16.vlgmr.msra.gmra.mrb[40].mxu1 %v5166_v62  ;;  %3075 = vmatmul.mubr.bf16.vlgmr.msra.gmra.mrb[44].mxu0 %v5171_v63  ;;  %v5251_v62 = vld [vmem:[%s6966_s0 + $0xf4] ss:$100 sps:$4 sm:$0xff]   ;;  %v5253_v63 = vld [vmem:[%s6965_s1 + $0x3c8] sm:$0xff]  }
  0x7b   :  { %4542 = vmatpush3.bf16.msra.mxu1 %v5174_v0  ;;  %4600 = vmatpush3.bf16.msra.mxu0 %v5176_v1  ;;  %v5256_v0 = vld [vmem:[%s6966_s0 + $0xfc] ss:$100 sps:$4 sm:$0xff]   ;;  %v5255_v1 = vld [vmem:[%s6965_s1 + $0x388] sm:$0xff]  }
  0x7c   :  { %2993 = vmatprep.mubr.bf16.mxu1 %v5177_v2  ;;  %4543 = vmatprep.subr.bf16.mxu1 %v5179_v3  ;;  %v5259_v2 = vld [vmem:[%s6965_s1 + $0x448] sm:$0xff]  }
  0x7d   :  { %3082 = vmatprep.mubr.bf16.mxu0 %v5182_v4  ;;  %4601 = vmatprep.subr.bf16.mxu0 %v5185_v5  ;;  %v5260_v3 = vld [vmem:[%s6965_s1 + $0x408] sm:$0xff]   ;;  %v5261_v4 = vld [vmem:[%s6965_s1 + $0x3d0] sm:$0xff]  }
  0x7e   :  { %v5254_v5 = vld [vmem:[%s6966_s0 + $0xf0] ss:$100 sps:$4 sm:$0xff]  }
  0x7f   :  { %4544 = vmatpush3.bf16.msra.mxu1 %v5181_v6  ;;  %4602 = vmatpush3.bf16.msra.mxu0 %v5186_v7  ;;  %v5258_v6 = vld [vmem:[%s6966_s0 + $0xf8] ss:$100 sps:$4 sm:$0xff]   ;;  %v5269_v7 = vld [vmem:[%s6965_s1 + $0x450] sm:$0xff]  }
  0x80   :  { %4545 = vmatprep.subr.bf16.mxu1 %v5187_v10  ;;  %4603 = vmatprep.subr.bf16.mxu0 %v5195_v13  ;;  %v5266_v10 = vld [vmem:[%s6966_s0 + $0x1c4] ss:$100 sps:$4 sm:$0xff]   ;;  %v5279_v13 = vld [vmem:[%s6965_s1 + $0x458] sm:$0xff]  }
  0x82   :  { %2994 = vmatmul.mubr.bf16.gmra.mrb[44].mxu1 %v5180_v8  ;;  %3083 = vmatmul.mubr.bf16.gmra.mrb[48].mxu0 %v5184_v9  ;;  %v5262_v8 = vld [vmem:[%s6966_s0 + $0x1bc] ss:$100 sps:$4 sm:$0xff]   ;;  %v5264_v9 = vld [vmem:[%s6965_s1 + $0x390] sm:$0xff]  }
  0x83   :  { %3001 = vmatprep.mubr.bf16.mxu1 %v5188_v11  ;;  %4546 = vmatpush3.bf16.msra.mxu1 %v5190_v12  ;;  %v5270_v11 = vld [vmem:[%s6965_s1 + $0x410] sm:$0xff]   ;;  %v5271_v12 = vld [vmem:[%s6965_s1 + $0x3d8] sm:$0xff]  }
  0x84   :  { %3090 = vmatprep.mubr.bf16.mxu0 %v5192_v14  ;;  %4604 = vmatpush3.bf16.msra.mxu0 %v5196_v15  ;;  %v5272_v14 = vld [vmem:[%s6965_s1 + $0x398] sm:$0xff]  }
  0x85   :  { %4547 = vmatprep.subr.bf16.mxu1 %v5197_v16  ;;  %4605 = vmatprep.subr.bf16.mxu0 %v5205_v22  ;;  %v5265_v15 = vld [vmem:[%s6966_s0 + $0x1b8] ss:$100 sps:$4 sm:$0xff]   ;;  %v5268_v16 = vld [vmem:[%s6966_s0 + $0x1c0] ss:$100 sps:$4 sm:$0xff]  }
  0x86   :  { %v5282_v22 = vld [vmem:[%s6965_s1 + $0x3a0] sm:$0xff]  }
  0x87   :  { %4548 = vmatpush3.bf16.msra.mxu1 %v5198_v17  ;;  %v5280_v17 = vld [vmem:[%s6965_s1 + $0x418] sm:$0xff]  }
  0x88   :  { %4606 = vmatpush3.bf16.msra.mxu0 %v5206_v23  ;;  %4549 = vmatprep.subr.bf16.mxu1 %v5207_v24  ;;  %v5290_v23 = vld [vmem:[%s6965_s1 + $0x420] sm:$0xff]   ;;  %v5291_v24 = vld [vmem:[%s6965_s1 + $0x3e8] sm:$0xff]  }
  0x89   :  { %4607 = vmatprep.subr.bf16.mxu0 %v5214_v26  ;;  %v5275_v26 = vld [vmem:[%s6966_s0 + $0x280] ss:$100 sps:$4 sm:$0xff]  }
  0x8a   :  { %3002 = vmatmul.mubr.bf16.gmra.mrb[48].mxu1 %v5191_v18  ;;  %3091 = vmatmul.mubr.bf16.gmra.mrb[52].mxu0 %v5194_v19  ;;  %v5281_v18 = vld [vmem:[%s6965_s1 + $0x3e0] sm:$0xff]  }
  0x8b   :  { %3009 = vmatprep.mubr.bf16.mxu1 %v5199_v20  ;;  %3098 = vmatprep.mubr.bf16.mxu0 %v5202_v21  ;;  %v5273_v19 = vld [vmem:[%s6966_s0 + $0x284] ss:$100 sps:$4 sm:$0xff]   ;;  %v5276_v20 = vld [vmem:[%s6966_s0 + $0x28c] ss:$100 sps:$4 sm:$0xff]  }
  0x8c   :  { %4550 = vmatpush3.bf16.msra.mxu1 %v5208_v25  ;;  %4608 = vmatpush3.bf16.msra.mxu0 %v5216_v31  ;;  %v5288_v21 = vld [vmem:[%s6965_s1 + $0x460] sm:$0xff]   ;;  %v5292_v25 = vld [vmem:[%s6965_s1 + $0x3a8] sm:$0xff]  }
  0x8d   :  { %4551 = vmatprep.subr.bf16.mxu1 %v5217_v32  ;;  %4609 = vmatprep.subr.bf16.mxu0 %v5222_v34  ;;  %v5299_v31 = vld [vmem:[%s6965_s1 + $0x428] sm:$0xff]   ;;  %v5301_v32 = vld [vmem:[%s6965_s1 + $0x3f0] sm:$0xff]  }
  0x8e   :  { %v5305_v34 = vld [vmem:[%s6965_s1 + $0x470] sm:$0xff]  }
  0x90   :  { %4552 = vmatpush3.bf16.msra.mxu1 %v5218_v33  ;;  %4610 = vmatpush3.bf16.msra.mxu0 %v5225_v35  ;;  %v5302_v33 = vld [vmem:[%s6965_s1 + $0x3b0] sm:$0xff]  }
  0x91   :  { %4553 = vmatprep.subr.bf16.mxu1 %v5227_v38  ;;  %4611 = vmatprep.subr.bf16.mxu0 %v5231_v42  ;;  %v5307_v35 = vld [vmem:[%s6965_s1 + $0x430] sm:$0xff]   ;;  %v5313_v42 = vld [vmem:[%s6965_s1 + $0x478] sm:$0xff]  }
  0x92   :  { %3010 = vmatmul.mubr.bf16.gmra.mrb[52].mxu1 %v5201_v27  ;;  %3099 = vmatmul.mubr.bf16.gmra.mrb[56].mxu0 %v5204_v28  ;;  %v5278_v27 = vld [vmem:[%s6966_s0 + $0x288] ss:$100 sps:$4 sm:$0xff]   ;;  %v5293_v38 = vld [vmem:[%s6966_s0 + $0x414] ss:$100 sps:$4 sm:$0xff]  }
  0x93   :  { %3017 = vmatprep.mubr.bf16.mxu1 %v5209_v29  ;;  %3106 = vmatprep.mubr.bf16.mxu0 %v5212_v30  ;;  %v5296_v28 = vld [vmem:[%s6965_s1 + $0x468] sm:$0xff]   ;;  %v5286_v30 = vld [vmem:[%s6966_s0 + $0x354] ss:$100 sps:$4 sm:$0xff]  }
  0x94   :  { %4554 = vmatpush3.bf16.msra.mxu1 %v5228_v40  ;;  %4612 = vmatpush3.bf16.msra.mxu0 %v5233_v43  ;;  %v5283_v29 = vld [vmem:[%s6966_s0 + $0x34c] ss:$100 sps:$4 sm:$0xff]   ;;  %v5297_v40 = vld [vmem:[%s6966_s0 + $0x41c] ss:$100 sps:$4 sm:$0xff]  }
  0x95   :  { %4555 = vmatprep.subr.bf16.mxu1 %v5236_v44  ;;  %4613 = vmatprep.subr.bf16.mxu0 %v5239_v48  ;;  %v5317_v43 = vld [vmem:[%s6965_s1 + $0x438] sm:$0xff]   ;;  %v5318_v44 = vld [vmem:[%s6965_s1 + $0x4c0] sm:$0xff]  }
  0x96   :  { %v5323_v48 = vld [vmem:[%s6965_s1 + $0x540] sm:$0xff]  }
  0x98   :  { %4556 = vmatpush3.bf16.msra.mxu1 %v5238_v47  ;;  %4614 = vmatpush3.bf16.msra.mxu0 %v5243_v51  ;;  %v5303_v47 = vld [vmem:[%s6966_s0 + $0x4dc] ss:$100 sps:$4 sm:$0xff]  }
  0x99   :  { %4657 = vmatprep.subr.bf16.mxu1 %v5244_v52  ;;  %4715 = vmatprep.subr.bf16.mxu0 %v5249_v53  ;;  %v5311_v51 = vld [vmem:[%s6966_s0 + $0x4e0] ss:$100 sps:$4 sm:$0xff]  }
  0x9a   :  { %3018 = vmatmul.mubr.bf16.gmra.mrb[56].mxu1 %v5211_v36  ;;  %3107 = vmatmul.mubr.bf16.gmra.mrb[60].mxu0 %v5215_v37  ;;  %v5285_v36 = vld [vmem:[%s6966_s0 + $0x348] ss:$100 sps:$4 sm:$0xff]   ;;  %v5289_v37 = vld [vmem:[%s6966_s0 + $0x350] ss:$100 sps:$4 sm:$0xff]   ;;  %v5316_v52 = vld [vmem:[%s6966_s0 + $0x3c] ss:$100 sps:$4 sm:$0xff]  }
  0x9b   :  { %3025 = vmatprep.mubr.bf16.mxu1 %v5219_v39  ;;  %3114 = vmatprep.mubr.bf16.mxu0 %v5223_v41  ;;  %v5310_v39 = vld [vmem:[%s6965_s1 + $0x3f8] sm:$0xff]   ;;  %v5321_v53 = vld [vmem:[%s6966_s0 + $0x44] ss:$100 sps:$4 sm:$0xff]  }
  0x9c   :  { %v5312_v41 = vld [vmem:[%s6965_s1 + $0x3b8] sm:$0xff]  }
  0xa2   :  { %3026 = vmatmul.mubr.bf16.gmra.mrb[60].mxu1 %v5221_v45  ;;  %3115 = vmatmul.mubr.bf16.gmra.mrb[64].mxu0 %v5226_v46  ;;  %v5295_v45 = vld [vmem:[%s6966_s0 + $0x410] ss:$100 sps:$4 sm:$0xff]   ;;  %v5300_v46 = vld [vmem:[%s6966_s0 + $0x418] ss:$100 sps:$4 sm:$0xff]  }
  0xa3   :  { %3033 = vmatprep.mubr.bf16.mxu1 %v5229_v49  ;;  %3122 = vmatprep.mubr.bf16.mxu0 %v5234_v50  ;;  %v5308_v49 = vld [vmem:[%s6966_s0 + $0x4e4] ss:$100 sps:$4 sm:$0xff]   ;;  %v5306_v50 = vld [vmem:[%s6966_s0 + $0x4d8] ss:$100 sps:$4 sm:$0xff]  }
  0xaa   :  { %3034 = vmatmul.mubr.bf16.gmra.mrb[64].mxu1 %v5232_v54  ;;  %3123 = vmatmul.mubr.bf16.gmra.mrb[68].mxu0 %v5237_v55  ;;  %v5314_v54 = vld [vmem:[%s6966_s0 + $0x38] ss:$100 sps:$4 sm:$0xff]   ;;  %v5319_v55 = vld [vmem:[%s6966_s0 + $0x40] ss:$100 sps:$4 sm:$0xff]  }
  0xab   :  { %3163 = vmatprep.mubr.bf16.mxu1 %v5242_v56  ;;  %3252 = vmatprep.mubr.bf16.mxu0 %v5247_v57  ;;  %v5322_v56 = vld [vmem:[%s6965_s1 + $0x480] sm:$0xff]  }
  0xac   :  { %v5324_v57 = vld [vmem:[%s6965_s1 + $0x500] sm:$0xff]  }
  0xb2   :  { %3164 = vmatmul.mubr.bf16.vlgmr.msra.gmra.mrb[68].mxu1 %v5240_v58  ;;  %3253 = vmatmul.mubr.bf16.vlgmr.msra.gmra.mrb[72].mxu0 %v5245_v59  ;;  %v5325_v58 = vld [vmem:[%s6966_s0 + $0x104] ss:$100 sps:$4 sm:$0xff]  }
  0xb3   :  { %4658 = vmatpush3.bf16.msra.mxu1 %v5248_v60  ;;  %4716 = vmatpush3.bf16.msra.mxu0 %v5250_v61  ;;  %v5327_v59 = vld [vmem:[%s6965_s1 + $0x4c8] sm:$0xff]  }
  0xb4   :  { %3171 = vmatprep.mubr.bf16.mxu1 %v5251_v62  ;;  %4659 = vmatprep.subr.bf16.mxu1 %v5253_v63  ;;  %v5330_v60 = vld [vmem:[%s6966_s0 + $0x10c] ss:$100 sps:$4 sm:$0xff]  }
  0xb5   :  { %3260 = vmatprep.mubr.bf16.mxu0 %v5256_v0  ;;  %4717 = vmatprep.subr.bf16.mxu0 %v5259_v2  ;;  %v5329_v61 = vld [vmem:[%s6965_s1 + $0x488] sm:$0xff]   ;;  %v5335_v0 = vld [vmem:[%s6965_s1 + $0x4d0] sm:$0xff]  }
  0xb6   :  { %v5333_v62 = vld [vmem:[%s6965_s1 + $0x548] sm:$0xff]   ;;  %v5343_v2 = vld [vmem:[%s6965_s1 + $0x550] sm:$0xff]  }
  0xb7   :  { %4660 = vmatpush3.bf16.msra.mxu1 %v5255_v1  ;;  %4718 = vmatpush3.bf16.msra.mxu0 %v5260_v3  ;;  %v5334_v63 = vld [vmem:[%s6965_s1 + $0x508] sm:$0xff]   ;;  %v5328_v1 = vld [vmem:[%s6966_s0 + $0x100] ss:$100 sps:$4 sm:$0xff]  }
  0xb8   :  { %4661 = vmatprep.subr.bf16.mxu1 %v5261_v4  ;;  %4719 = vmatprep.subr.bf16.mxu0 %v5269_v7  ;;  %v5332_v3 = vld [vmem:[%s6966_s0 + $0x108] ss:$100 sps:$4 sm:$0xff]   ;;  %v5344_v7 = vld [vmem:[%s6965_s1 + $0x510] sm:$0xff]  }
  0xb9   :  { %v5336_v4 = vld [vmem:[%s6966_s0 + $0x1cc] ss:$100 sps:$4 sm:$0xff]  }
  0xba   :  { %3172 = vmatmul.mubr.bf16.gmra.mrb[72].mxu1 %v5254_v5  ;;  %3261 = vmatmul.mubr.bf16.gmra.mrb[76].mxu0 %v5258_v6  ;;  %v5338_v5 = vld [vmem:[%s6965_s1 + $0x490] sm:$0xff]  }
  0xbb   :  { %3179 = vmatprep.mubr.bf16.mxu1 %v5262_v8  ;;  %4662 = vmatpush3.bf16.msra.mxu1 %v5264_v9  ;;  %v5340_v6 = vld [vmem:[%s6966_s0 + $0x1d4] ss:$100 sps:$4 sm:$0xff]  }
  0xbc   :  { %3268 = vmatprep.mubr.bf16.mxu0 %v5266_v10  ;;  %4720 = vmatpush3.bf16.msra.mxu0 %v5270_v11  ;;  %v5345_v8 = vld [vmem:[%s6965_s1 + $0x4d8] sm:$0xff]  }
  0xbd   :  { %4663 = vmatprep.subr.bf16.mxu1 %v5271_v12  ;;  %4721 = vmatprep.subr.bf16.mxu0 %v5279_v13  ;;  %v5353_v9 = vld [vmem:[%s6965_s1 + $0x558] sm:$0xff]   ;;  %v5339_v12 = vld [vmem:[%s6966_s0 + $0x1c8] ss:$100 sps:$4 sm:$0xff]   ;;  %v5342_v13 = vld [vmem:[%s6966_s0 + $0x1d0] ss:$100 sps:$4 sm:$0xff]  }
  0xbe   :  { %v5346_v10 = vld [vmem:[%s6965_s1 + $0x498] sm:$0xff]  }
  0xbf   :  { %4664 = vmatpush3.bf16.msra.mxu1 %v5272_v14  ;;  %v5354_v11 = vld [vmem:[%s6965_s1 + $0x518] sm:$0xff]   ;;  %v5355_v14 = vld [vmem:[%s6965_s1 + $0x4e0] sm:$0xff]  }
  0xc0   :  { %4722 = vmatpush3.bf16.msra.mxu0 %v5280_v17  ;;  %4665 = vmatprep.subr.bf16.mxu1 %v5281_v18  ;;  %v5347_v17 = vld [vmem:[%s6966_s0 + $0x294] ss:$100 sps:$4 sm:$0xff]   ;;  %v5362_v18 = vld [vmem:[%s6965_s1 + $0x560] sm:$0xff]  }
  0xc1   :  { %4723 = vmatprep.subr.bf16.mxu0 %v5288_v21  ;;  %v5350_v21 = vld [vmem:[%s6966_s0 + $0x29c] ss:$100 sps:$4 sm:$0xff]  }
  0xc2   :  { %3180 = vmatmul.mubr.bf16.gmra.mrb[76].mxu1 %v5265_v15  ;;  %3269 = vmatmul.mubr.bf16.gmra.mrb[80].mxu0 %v5268_v16 }
  0xc3   :  { %3187 = vmatprep.mubr.bf16.mxu1 %v5273_v19  ;;  %3276 = vmatprep.mubr.bf16.mxu0 %v5276_v20 }
  0xc4   :  { %4666 = vmatpush3.bf16.msra.mxu1 %v5282_v22  ;;  %4724 = vmatpush3.bf16.msra.mxu0 %v5290_v23 }
  0xc5   :  { %4667 = vmatprep.subr.bf16.mxu1 %v5291_v24  ;;  %4725 = vmatprep.subr.bf16.mxu0 %v5296_v28 }
  0xc8   :  { %4668 = vmatpush3.bf16.msra.mxu1 %v5292_v25  ;;  %4726 = vmatpush3.bf16.msra.mxu0 %v5299_v31 }
  0xc9   :  { %4669 = vmatprep.subr.bf16.mxu1 %v5301_v32  ;;  %4727 = vmatprep.subr.bf16.mxu0 %v5305_v34  ;;  %v5366_v34 = vld [vmem:[%s6965_s1 + $0x4a8] sm:$0xff]  }
  0xca   :  { %3188 = vmatmul.mubr.bf16.gmra.mrb[80].mxu1 %v5275_v26  ;;  %3277 = vmatmul.mubr.bf16.gmra.mrb[84].mxu0 %v5278_v27  ;;  %v5356_v26 = vld [vmem:[%s6965_s1 + $0x4a0] sm:$0xff]  }
  0xcb   :  { %3195 = vmatprep.mubr.bf16.mxu1 %v5283_v29  ;;  %3284 = vmatprep.mubr.bf16.mxu0 %v5286_v30  ;;  %v5364_v29 = vld [vmem:[%s6965_s1 + $0x520] sm:$0xff]   ;;  %v5365_v30 = vld [vmem:[%s6965_s1 + $0x4e8] sm:$0xff]  }
  0xcc   :  { %4670 = vmatpush3.bf16.msra.mxu1 %v5302_v33  ;;  %4728 = vmatpush3.bf16.msra.mxu0 %v5307_v35  ;;  %v5370_v33 = vld [vmem:[%s6965_s1 + $0x568] sm:$0xff]  }
  0xcd   :  { %4671 = vmatprep.subr.bf16.mxu1 %v5310_v39  ;;  %4729 = vmatprep.subr.bf16.mxu0 %v5313_v42  ;;  %v5373_v35 = vld [vmem:[%s6965_s1 + $0x528] sm:$0xff]  }
  0xd0   :  { %4672 = vmatpush3.bf16.msra.mxu1 %v5312_v41  ;;  %4730 = vmatpush3.bf16.msra.mxu0 %v5317_v43  ;;  %v5357_v41 = vld [vmem:[%s6966_s0 + $0x35c] ss:$100 sps:$4 sm:$0xff]  }
  0xd1   :  { %4773 = vmatprep.subr.bf16.mxu1 %v5318_v44  ;;  %4831 = vmatprep.subr.bf16.mxu0 %v5323_v48  ;;  %v5360_v44 = vld [vmem:[%s6966_s0 + $0x364] ss:$100 sps:$4 sm:$0xff]  }
  0xd2   :  { %3196 = vmatmul.mubr.bf16.gmra.mrb[84].mxu1 %v5285_v36  ;;  %3285 = vmatmul.mubr.bf16.gmra.mrb[88].mxu0 %v5289_v37  ;;  %v5349_v36 = vld [vmem:[%s6966_s0 + $0x290] ss:$100 sps:$4 sm:$0xff]   ;;  %v5352_v37 = vld [vmem:[%s6966_s0 + $0x298] ss:$100 sps:$4 sm:$0xff]  }
  0xd3   :  { %3203 = vmatprep.mubr.bf16.mxu1 %v5293_v38  ;;  %3292 = vmatprep.mubr.bf16.mxu0 %v5297_v40  ;;  %v5375_v38 = vld [vmem:[%s6965_s1 + $0x4f0] sm:$0xff]  }
  0xda   :  { %3204 = vmatmul.mubr.bf16.gmra.mrb[88].mxu1 %v5295_v45  ;;  %3293 = vmatmul.mubr.bf16.gmra.mrb[92].mxu0 %v5300_v46  ;;  %v5376_v45 = vld [vmem:[%s6965_s1 + $0x4b0] sm:$0xff]  }
  0xdb   :  { %3211 = vmatprep.mubr.bf16.mxu1 %v5303_v47  ;;  %3300 = vmatprep.mubr.bf16.mxu0 %v5308_v49  ;;  %v5379_v46 = vld [vmem:[%s6965_s1 + $0x570] sm:$0xff]  }
  0xe2   :  { %3212 = vmatmul.mubr.bf16.gmra.mrb[92].mxu1 %v5306_v50  ;;  %3301 = vmatmul.mubr.bf16.gmra.mrb[96].mxu0 %v5311_v51 }
  0xe3   :  { %3341 = vmatprep.mubr.bf16.mxu1 %v5316_v52  ;;  %3430 = vmatprep.mubr.bf16.mxu0 %v5321_v53  ;;  %v5381_v53 = vld [vmem:[%s6965_s1 + $0x530] sm:$0xff]  }
  0xea   :  { %3342 = vmatmul.mubr.bf16.vlgmr.msra.gmra.mrb[96].mxu1 %v5314_v54  ;;  %3431 = vmatmul.mubr.bf16.vlgmr.msra.gmra.mrb[100].mxu0 %v5319_v55 }
  0xeb   :  { %4774 = vmatpush3.bf16.msra.mxu1 %v5322_v56  ;;  %4832 = vmatpush3.bf16.msra.mxu0 %v5324_v57  ;;  %v5384_v56 = vld [vmem:[%s6965_s1 + $0x4f8] sm:$0xff]  }
  0xec   :  { %3349 = vmatprep.mubr.bf16.mxu1 %v5325_v58  ;;  %4775 = vmatprep.subr.bf16.mxu1 %v5327_v59  ;;  %v5386_v57 = vld [vmem:[%s6965_s1 + $0x4b8] sm:$0xff]   ;;  %v5363_v59 = vld [vmem:[%s6966_s0 + $0x360] ss:$100 sps:$4 sm:$0xff]  }
  0xed   :  { %3438 = vmatprep.mubr.bf16.mxu0 %v5330_v60  ;;  %4833 = vmatprep.subr.bf16.mxu0 %v5333_v62  ;;  %v5359_v58 = vld [vmem:[%s6966_s0 + $0x358] ss:$100 sps:$4 sm:$0xff]  }
  0xee   :  { %v5387_v60 = vld [vmem:[%s6965_s1 + $0x578] sm:$0xff]  }
  0xef   :  { %4776 = vmatpush3.bf16.msra.mxu1 %v5329_v61  ;;  %4834 = vmatpush3.bf16.msra.mxu0 %v5334_v63  ;;  %v5367_v63 = vld [vmem:[%s6966_s0 + $0x424] ss:$100 sps:$4 sm:$0xff]  }
  0xf0   :  { %4777 = vmatprep.subr.bf16.mxu1 %v5335_v0  ;;  %4835 = vmatprep.subr.bf16.mxu0 %v5343_v2  ;;  %v5371_v0 = vld [vmem:[%s6966_s0 + $0x42c] ss:$100 sps:$4 sm:$0xff]  }
  0xf2   :  { %3350 = vmatmul.mubr.bf16.gmra.mrb[100].mxu1 %v5328_v1  ;;  %3439 = vmatmul.mubr.bf16.gmra.mrb[104].mxu0 %v5332_v3 }
  0xf3   :  { %3357 = vmatprep.mubr.bf16.mxu1 %v5336_v4  ;;  %4778 = vmatpush3.bf16.msra.mxu1 %v5338_v5 }
  0xf4   :  { %3446 = vmatprep.mubr.bf16.mxu0 %v5340_v6  ;;  %4836 = vmatpush3.bf16.msra.mxu0 %v5344_v7  ;;  %v5391_v7 = vld [vmem:[%s6965_s1 + $0x538] sm:$0xff]  }
  0xf5   :  { %v4291_v15 = vpop.f32.mrb[0].mxu1  ;;  %v4267_v16 = vpop.f32.mrb[0].mxu0  ;;  %4779 = vmatprep.subr.bf16.mxu1 %v5345_v8  ;;  %4837 = vmatprep.subr.bf16.mxu0 %v5353_v9  ;;  %v5392_v8 = vld [vmem:[%s6965_s1 + $0x5c0] sm:$0xff]  }
  0xf6   :  { %v4292_v19 = vpop.f32.mrb[1].mxu1  ;;  %v4268_v20 = vpop.f32.mrb[1].mxu0 }
  0xf7   :  { %v6327_v22 = vadd.f32 %v4292_v19, %v4291_v15  ;;  %v4294_v23 = vpop.f32.mrb[2].mxu1  ;;  %v6329_v24 = vadd.f32 %v4268_v20, %v4267_v16  ;;  %v4270_v25 = vpop.f32.mrb[2].mxu0  ;;  %4780 = vmatpush3.bf16.msra.mxu1 %v5346_v10  ;;  %v5483_v15 = vmov 0.0  }
  0xf8   :  { %v4295_v27 = vpop.f32.mrb[3].mxu1  ;;  %v4271_v28 = vpop.f32.mrb[3].mxu0  ;;  %4838 = vmatpush3.bf16.msra.mxu0 %v5354_v11  ;;  %4781 = vmatprep.subr.bf16.mxu1 %v5355_v14  ;;  %v5374_v14 = vld [vmem:[%s6966_s0 + $0x428] ss:$100 sps:$4 sm:$0xff]  }
  0xf9   :  { %v6340_v31 = vadd.f32 %v4295_v27, %v4294_v23  ;;  %v6342_v32 = vadd.f32 %v4271_v28, %v4270_v25  ;;  %4839 = vmatprep.subr.bf16.mxu0 %v5362_v18  ;;  %v5380_v27 = vld [vmem:[%s6966_s0 + $0x4e8] ss:$100 sps:$4 sm:$0xff]   ;;  %v5385_v28 = vld [vmem:[%s6966_s0 + $0x4f0] ss:$100 sps:$4 sm:$0xff]  }
  0xfa   :  { %3358 = vmatmul.mubr.bf16.gmra.mrb[104].mxu1 %v5339_v12  ;;  %3447 = vmatmul.mubr.bf16.gmra.mrb[108].mxu0 %v5342_v13  ;;  %v5369_v13 = vld [vmem:[%s6966_s0 + $0x420] ss:$100 sps:$4 sm:$0xff]  }
  0xfb   :  { %3365 = vmatprep.mubr.bf16.mxu1 %v5347_v17  ;;  %3454 = vmatprep.mubr.bf16.mxu0 %v5350_v21  ;;  %v5377_v17 = vld [vmem:[%s6966_s0 + $0x4ec] ss:$100 sps:$4 sm:$0xff]   ;;  %v5382_v21 = vld [vmem:[%s6966_s0 + $0x4f4] ss:$100 sps:$4 sm:$0xff]  }
  0xfc   :  { %4782 = vmatpush3.bf16.msra.mxu1 %v5356_v26  ;;  %4840 = vmatpush3.bf16.msra.mxu0 %v5364_v29  ;;  %v6440_v26 = vld [vmem:[%s6967_s2] ss:$0 sm:$0xff] }
  0xfd   :  { %v4273_v39 = vpop.f32.mrb[4].mxu0  ;;  %v4297_v40 = vpop.f32.mrb[4].mxu1  ;;  %4783 = vmatprep.subr.bf16.mxu1 %v5365_v30  ;;  %4841 = vmatprep.subr.bf16.mxu0 %v5370_v33  ;;  %v5390_v33 = vld [vmem:[%s6966_s0 + $0x4c] ss:$100 sps:$4 sm:$0xff]  }
  0xfe   :  { %v4274_v42 = vpop.f32.mrb[5].mxu0  ;;  %v4298_v43 = vpop.f32.mrb[5].mxu1 }
  0xff   :  { %v6374_v47 = vadd.f32 %v4274_v42, %v4273_v39  ;;  %v4276_v48 = vpop.f32.mrb[6].mxu0  ;;  %v6376_v49 = vadd.f32 %v4298_v43, %v4297_v40  ;;  %v4300_v50 = vpop.f32.mrb[6].mxu1 }
 0x100   :  { %v4277_v51 = vpop.f32.mrb[7].mxu0  ;;  %v4301_v52 = vpop.f32.mrb[7].mxu1  ;;  %4784 = vmatpush3.bf16.msra.mxu1 %v5366_v34  ;;  %4842 = vmatpush3.bf16.msra.mxu0 %v5373_v35 }
 0x101   :  { %v6381_v54 = vadd.f32 %v4277_v51, %v4276_v48  ;;  %v6383_v55 = vadd.f32 %v4301_v52, %v4300_v50  ;;  %4785 = vmatprep.subr.bf16.mxu1 %v5375_v38  ;;  %4843 = vmatprep.subr.bf16.mxu0 %v5379_v46  ;;  %v5393_v52 = vld [vmem:[%s6966_s0 + $0x50] ss:$100 sps:$4 sm:$0xff]  }
 0x102   :  { %3366 = vmatmul.mubr.bf16.gmra.mrb[108].mxu1 %v5349_v36  ;;  %3455 = vmatmul.mubr.bf16.gmra.mrb[112].mxu0 %v5352_v37  ;;  %v5395_v36 = vld [vmem:[%s6966_s0 + $0x54] ss:$100 sps:$4 sm:$0xff]   ;;  %v2721_v37 = vadd.f32 %v6329_v24, %v6440_v26  ;;  %v5388_v24 = vld [vmem:[%s6966_s0 + $0x48] ss:$100 sps:$4 sm:$0xff]  }
 0x103   :  { %3373 = vmatprep.mubr.bf16.mxu1 %v5357_v41  ;;  %3462 = vmatprep.mubr.bf16.mxu0 %v5360_v44  ;;  %v2724_v44 = vadd.f32 %v6342_v32, %v6440_v26 }
 0x104   :  { %4786 = vmatpush3.bf16.msra.mxu1 %v5376_v45  ;;  %4844 = vmatpush3.bf16.msra.mxu0 %v5381_v53 }
 0x105   :  { %v4279_v61 = vpop.f32.mrb[8].mxu0  ;;  %v4303_v62 = vpop.f32.mrb[8].mxu1  ;;  %4787 = vmatprep.subr.bf16.mxu1 %v5384_v56  ;;  %4845 = vmatprep.subr.bf16.mxu0 %v5387_v60  ;;  %v5398_v60 = vld [vmem:[%s6966_s0 + $0x114] ss:$100 sps:$4 sm:$0xff]  }
 0x106   :  { %v4280_v1 = vpop.f32.mrb[9].mxu0  ;;  %v4304_v2 = vpop.f32.mrb[9].mxu1 }
 0x107   :  { %v6406_v3 = vadd.f32 %v4280_v1, %v4279_v61  ;;  %v4282_v4 = vpop.f32.mrb[10].mxu0  ;;  %v6408_v5 = vadd.f32 %v4304_v2, %v4303_v62  ;;  %v4306_v6 = vpop.f32.mrb[10].mxu1  ;;  %v2729_v61 = vadd.f32 %v6374_v47, %v6440_v26  ;;  %v5397_v2 = vld [vmem:[%s6965_s1 + $0x600] sm:$0xff]  }
 0x108   :  { %v4283_v9 = vpop.f32.mrb[11].mxu0  ;;  %v4307_v10 = vpop.f32.mrb[11].mxu1  ;;  %4788 = vmatpush3.bf16.msra.mxu1 %v5386_v57  ;;  %4846 = vmatpush3.bf16.msra.mxu0 %v5391_v7  ;;  %v5396_v57 = vld [vmem:[%s6965_s1 + $0x580] sm:$0xff]   ;;  %v5400_v7 = vld [vmem:[%s6965_s1 + $0x5c8] sm:$0xff]  }
 0x109   :  { %v6416_v11 = vadd.f32 %v4283_v9, %v4282_v4  ;;  %v6418_v12 = vadd.f32 %v4307_v10, %v4306_v6  ;;  %4889 = vmatprep.subr.bf16.mxu1 %v5392_v8  ;;  %4962 = vmatprep.subr.bf16.mxu0 %v5483_v15  ;;  %v2732_v8 = vadd.f32 %v6381_v54, %v6440_v26  ;;  %v5406_v54 = vld [vmem:[%s6965_s1 + $0x608] sm:$0xff]  }
 0x10a   :  { %3374 = vmatmul.mubr.bf16.gmra.mrb[112].mxu1 %v5359_v58  ;;  %3463 = vmatmul.mubr.bf16.gmra.mrb[116].mxu0 %v5363_v59 }
 0x10b   :  { %3381 = vmatprep.mubr.bf16.mxu1 %v5367_v63  ;;  %3470 = vmatprep.mubr.bf16.mxu0 %v5371_v0 }
 0x10d   :  { %v4285_v16 = vpop.f32.mrb[12].mxu0 }
 0x10e   :  { %v4286_v18 = vpop.f32.mrb[13].mxu0 }
 0x10f   :  { %v6430_v19 = vadd.f32 %v4286_v18, %v4285_v16  ;;  %v4288_v20 = vpop.f32.mrb[14].mxu0  ;;  %v5401_v18 = vld [vmem:[%s6966_s0 + $0x110] ss:$100 sps:$4 sm:$0xff]  }
 0x110   :  { %v4289_v23 = vpop.f32.mrb[15].mxu0 }
 0x111   :  { %v6435_v25 = vadd.f32 %v4289_v23, %v4288_v20  ;;  %v5405_v20 = vld [vmem:[%s6966_s0 + $0x118] ss:$100 sps:$4 sm:$0xff]  }
 0x112   :  { %3382 = vmatmul.mubr.bf16.gmra.mrb[116].mxu1 %v5369_v13  ;;  %3471 = vmatmul.mubr.bf16.gmra.mrb[120].mxu0 %v5374_v14  ;;  %v5403_v13 = vld [vmem:[%s6966_s0 + $0x11c] ss:$100 sps:$4 sm:$0xff]   ;;  %v5402_v14 = vld [vmem:[%s6965_s1 + $0x588] sm:$0xff]  }
 0x113   :  { %3389 = vmatprep.mubr.bf16.mxu1 %v5377_v17  ;;  %3478 = vmatprep.mubr.bf16.mxu0 %v5382_v21  ;;  %v5407_v21 = vld [vmem:[%s6965_s1 + $0x5d0] sm:$0xff]  }
 0x115   :  { %v4325_v29 = vpop.f32.mrb[12].mxu1  ;;  %v4383_v30 = vpop.f32.mrb[16].mxu0 }
 0x116   :  { %v4326_v34 = vpop.f32.mrb[13].mxu1  ;;  %v4384_v35 = vpop.f32.mrb[17].mxu0 }
 0x117   :  { %v4327_v38 = vadd.f32 %v4326_v34, %v4325_v29  ;;  %v4328_v39 = vpop.f32.mrb[14].mxu1  ;;  %v4385_v40 = vadd.f32 %v4384_v35, %v4383_v30  ;;  %v4386_v41 = vpop.f32.mrb[18].mxu0  ;;  %v5408_v29 = vld [vmem:[%s6966_s0 + $0x1dc] ss:$100 sps:$4 sm:$0xff]   ;;  %v5410_v34 = vld [vmem:[%s6965_s1 + $0x590] sm:$0xff]  }
 0x118   :  { %v4329_v42 = vpop.f32.mrb[15].mxu1  ;;  %v4387_v43 = vpop.f32.mrb[19].mxu0  ;;  %v5412_v35 = vld [vmem:[%s6966_s0 + $0x1e4] ss:$100 sps:$4 sm:$0xff]  }
 0x119   :  { %v2810_v45 = vadd.f32 %v4327_v38, %v2721_v37  ;;  %v4330_v46 = vadd.f32 %v4329_v42, %v4328_v39  ;;  %v4388_v48 = vadd.f32 %v4387_v43, %v4386_v41  ;;  %v5415_v41 = vld [vmem:[%s6965_s1 + $0x610] sm:$0xff]  }
 0x11a   :  { %3390 = vmatmul.mubr.bf16.gmra.mrb[120].mxu1 %v5380_v27  ;;  %3479 = vmatmul.mubr.bf16.gmra.mrb[124].mxu0 %v5385_v28 }
 0x11b   :  { %v2813_v50 = vadd.f32 %v4330_v46, %v2724_v44  ;;  %v6458_v51 = vadd.f32 %v4385_v40, %v2810_v45  ;;  %3519 = vmatprep.mubr.bf16.mxu1 %v5390_v33  ;;  %3608 = vmatprep.mubr.bf16.mxu0 %v5395_v36  ;;  %v2737_v36 = vadd.f32 %v6406_v3, %v6440_v26 }
 0x11c   :  { %v2740_v44 = vadd.f32 %v6416_v11, %v6440_v26  ;;  %v5411_v11 = vld [vmem:[%s6966_s0 + $0x1d8] ss:$100 sps:$4 sm:$0xff]  }
 0x11d   :  { %v6466_v53 = vadd.f32 %v4388_v48, %v2813_v50  ;;  %v4331_v32 = vpop.f32.mrb[16].mxu1  ;;  %v4389_v56 = vpop.f32.mrb[20].mxu0  ;;  %v5416_v48 = vld [vmem:[%s6965_s1 + $0x5d8] sm:$0xff]  }
 0x11e   :  { %v4332_v58 = vpop.f32.mrb[17].mxu1  ;;  %v4390_v59 = vpop.f32.mrb[21].mxu0 }
 0x11f   :  { %v4333_v62 = vadd.f32 %v4332_v58, %v4331_v32  ;;  %v4334_v63 = vpop.f32.mrb[18].mxu1  ;;  %v4391_v0 = vadd.f32 %v4390_v59, %v4389_v56  ;;  %v4392_v1 = vpop.f32.mrb[22].mxu0  ;;  %v5414_v32 = vld [vmem:[%s6966_s0 + $0x1e0] ss:$100 sps:$4 sm:$0xff]   ;;  %v5424_v56 = vld [vmem:[%s6965_s1 + $0x618] sm:$0xff]  }
 0x120   :  { %v4335_v4 = vpop.f32.mrb[19].mxu1  ;;  %v4393_v6 = vpop.f32.mrb[23].mxu0 }
 0x121   :  { %v2818_v9 = vadd.f32 %v4333_v62, %v2729_v61  ;;  %v4336_v10 = vadd.f32 %v4335_v4, %v4334_v63  ;;  %v4394_v47 = vadd.f32 %v4393_v6, %v4392_v1  ;;  %v5418_v63 = vld [vmem:[%s6966_s0 + $0x2a4] ss:$100 sps:$4 sm:$0xff]  }
 0x122   :  { %3520 = vmatmul.mubr.bf16.vlgmr.msra.gmra.mrb[124].mxu1 %v5388_v24  ;;  %3609 = vmatmul.mubr.bf16.vlgmr.msra.gmra.mrb[128].mxu0 %v5393_v52  ;;  %v5417_v52 = vld [vmem:[%s6965_s1 + $0x598] sm:$0xff]  }
 0x123   :  { %v2821_v16 = vadd.f32 %v4336_v10, %v2732_v8  ;;  %v6490_v17 = vadd.f32 %v4391_v0, %v2818_v9  ;;  %4890 = vmatpush3.bf16.msra.mxu1 %v5396_v57  ;;  %4963 = vmatpush3.bf16.msra.mxu0 %v5397_v2  ;;  %v5425_v57 = vld [vmem:[%s6965_s1 + $0x5e0] sm:$0xff]   ;;  %v2745_v0 = vadd.f32 %v6430_v19, %v6440_v26 }
 0x124   :  { %3527 = vmatprep.mubr.bf16.mxu1 %v5398_v60  ;;  %4891 = vmatprep.subr.bf16.mxu1 %v5400_v7  ;;  %v5421_v7 = vld [vmem:[%s6966_s0 + $0x2ac] ss:$100 sps:$4 sm:$0xff]   ;;  %v5426_v10 = vld [vmem:[%s6965_s1 + $0x5a0] sm:$0xff]  }
 0x125   :  { %v6504_v23 = vadd.f32 %v4394_v47, %v2821_v16  ;;  %v4337_v27 = vpop.f32.mrb[20].mxu1  ;;  %v4395_v28 = vpop.f32.mrb[24].mxu0  ;;  %3616 = vmatprep.mubr.bf16.mxu0 %v5403_v13  ;;  %4964 = vmatprep.subr.bf16.mxu0 %v5483_v15  ;;  %v5433_v19 = vld [vmem:[%s6965_s1 + $0x620] sm:$0xff]   ;;  %v2748_v47 = vadd.f32 %v6435_v25, %v6440_v26  ;;  %v5435_v25 = vld [vmem:[%s6965_s1 + $0x5a8] sm:$0xff]  }
 0x126   :  { %v4338_v30 = vpop.f32.mrb[21].mxu1  ;;  %v4396_v33 = vpop.f32.mrb[25].mxu0 }
 0x127   :  { %v4339_v37 = vadd.f32 %v4338_v30, %v4337_v27  ;;  %v4340_v38 = vpop.f32.mrb[22].mxu1  ;;  %v4397_v39 = vadd.f32 %v4396_v33, %v4395_v28  ;;  %v4398_v40 = vpop.f32.mrb[26].mxu0  ;;  %4892 = vmatpush3.bf16.msra.mxu1 %v5402_v14  ;;  %4965 = vmatpush3.bf16.msra.mxu0 %v5406_v54  ;;  %v5434_v54 = vld [vmem:[%s6965_s1 + $0x5e8] sm:$0xff]  }
 0x128   :  { %v4341_v42 = vpop.f32.mrb[23].mxu1  ;;  %v4399_v43 = vpop.f32.mrb[27].mxu0  ;;  %4893 = vmatprep.subr.bf16.mxu1 %v5407_v21  ;;  %4966 = vmatprep.subr.bf16.mxu0 %v5483_v15  ;;  %v5420_v21 = vld [vmem:[%s6966_s0 + $0x2a0] ss:$100 sps:$4 sm:$0xff]   ;;  %v5423_v27 = vld [vmem:[%s6966_s0 + $0x2a8] ss:$100 sps:$4 sm:$0xff]  }
 0x129   :  { %v2826_v45 = vadd.f32 %v4339_v37, %v2737_v36  ;;  %v4342_v3 = vadd.f32 %v4341_v42, %v4340_v38  ;;  %v4400_v46 = vadd.f32 %v4399_v43, %v4398_v40  ;;  %v5441_v28 = vld [vmem:[%s6965_s1 + $0x628] sm:$0xff]   ;;  %v5430_v38 = vld [vmem:[%s6966_s0 + $0x374] ss:$100 sps:$4 sm:$0xff]   ;;  %v2753_v40 = vadd.f32 %v6327_v22, %v6440_v26 }
 0x12a   :  { %3528 = vmatmul.mubr.bf16.gmra.mrb[128].mxu1 %v5401_v18  ;;  %3617 = vmatmul.mubr.bf16.gmra.mrb[132].mxu0 %v5405_v20  ;;  %v5451_v22 = vld [vmem:[%s6965_s1 + $0x5f8] sm:$0xff]  }
 0x12b   :  { %v2829_v50 = vadd.f32 %v4342_v3, %v2740_v44  ;;  %v6527_v24 = vadd.f32 %v4397_v39, %v2826_v45  ;;  %3535 = vmatprep.mubr.bf16.mxu1 %v5408_v29  ;;  %4894 = vmatpush3.bf16.msra.mxu1 %v5410_v34  ;;  %v5427_v34 = vld [vmem:[%s6966_s0 + $0x36c] ss:$100 sps:$4 sm:$0xff]   ;;  %v2756_v45 = vadd.f32 %v6340_v31, %v6440_v26 }
 0x12c   :  { %3624 = vmatprep.mubr.bf16.mxu0 %v5412_v35  ;;  %4967 = vmatpush3.bf16.msra.mxu0 %v5415_v41  ;;  %v5443_v35 = vld [vmem:[%s6965_s1 + $0x5f0] sm:$0xff]  }
 0x12d   :  { %v6544_v58 = vadd.f32 %v4400_v46, %v2829_v50  ;;  %v4343_v59 = vpop.f32.mrb[24].mxu1  ;;  %v4401_v60 = vpop.f32.mrb[28].mxu0  ;;  %4895 = vmatprep.subr.bf16.mxu1 %v5416_v48  ;;  %4968 = vmatprep.subr.bf16.mxu0 %v5483_v15  ;;  %v5444_v39 = vld [vmem:[%s6965_s1 + $0x5b0] sm:$0xff]  }
 0x12e   :  { %v4344_v61 = vpop.f32.mrb[25].mxu1  ;;  %v4402_v62 = vpop.f32.mrb[29].mxu0  ;;  %v5448_v48 = vld [vmem:[%s6965_s1 + $0x630] sm:$0xff]  }
 0x12f   :  { %v4345_v1 = vadd.f32 %v4344_v61, %v4343_v59  ;;  %v4346_v2 = vpop.f32.mrb[26].mxu1  ;;  %v4403_v4 = vadd.f32 %v4402_v62, %v4401_v60  ;;  %v4404_v6 = vpop.f32.mrb[30].mxu0  ;;  %4896 = vmatpush3.bf16.msra.mxu1 %v5417_v52  ;;  %v5457_v59 = vld [vmem:[%s6965_s1 + $0x638] sm:$0xff]  }
 0x130   :  { %v4347_v8 = vpop.f32.mrb[27].mxu1  ;;  %v4405_v9 = vpop.f32.mrb[31].mxu0  ;;  %4969 = vmatpush3.bf16.msra.mxu0 %v5424_v56  ;;  %4897 = vmatprep.subr.bf16.mxu1 %v5425_v57  ;;  %v5453_v56 = vld [vmem:[%s6965_s1 + $0x5b8] sm:$0xff]   ;;  %v5429_v57 = vld [vmem:[%s6966_s0 + $0x368] ss:$100 sps:$4 sm:$0xff]  }
 0x131   :  { %v2834_v13 = vadd.f32 %v4345_v1, %v2745_v0  ;;  %v4348_v14 = vadd.f32 %v4347_v8, %v4346_v2  ;;  %v4406_v16 = vadd.f32 %v4405_v9, %v4404_v6  ;;  %4970 = vmatprep.subr.bf16.mxu0 %v5483_v15  ;;  %v5436_v2 = vld [vmem:[%s6966_s0 + $0x434] ss:$100 sps:$4 sm:$0xff]  }
 0x132   :  { %3536 = vmatmul.mubr.bf16.gmra.mrb[132].mxu1 %v5411_v11  ;;  %3625 = vmatmul.mubr.bf16.gmra.mrb[136].mxu0 %v5414_v32 }
 0x133   :  { %v2837_v18 = vadd.f32 %v4348_v14, %v2748_v47  ;;  %v6567_v20 = vadd.f32 %v4403_v4, %v2834_v13  ;;  %3543 = vmatprep.mubr.bf16.mxu1 %v5418_v63  ;;  %3632 = vmatprep.mubr.bf16.mxu0 %v5421_v7  ;;  %v5432_v63 = vld [vmem:[%s6966_s0 + $0x370] ss:$100 sps:$4 sm:$0xff]   ;;  %v2761_v4 = vadd.f32 %v6376_v49, %v6440_v26 }
 0x134   :  { %4898 = vmatpush3.bf16.msra.mxu1 %v5426_v10  ;;  %4971 = vmatpush3.bf16.msra.mxu0 %v5433_v19  ;;  %v5439_v10 = vld [vmem:[%s6966_s0 + $0x43c] ss:$100 sps:$4 sm:$0xff]   ;;  %v2764_v13 = vadd.f32 %v6383_v55, %v6440_v26  ;;  %v5438_v55 = vld [vmem:[%s6966_s0 + $0x430] ss:$100 sps:$4 sm:$0xff]  }
 0x135   :  { %v6581_v29 = vadd.f32 %v4406_v16, %v2837_v18  ;;  %v4349_v30 = vpop.f32.mrb[28].mxu1  ;;  %v4407_v33 = vpop.f32.mrb[32].mxu0  ;;  %4899 = vmatprep.subr.bf16.mxu1 %v5434_v54  ;;  %4972 = vmatprep.subr.bf16.mxu0 %v5483_v15 }
 0x136   :  { %v4350_v36 = vpop.f32.mrb[29].mxu1  ;;  %v4408_v37 = vpop.f32.mrb[33].mxu0 }
 0x137   :  { %v4351_v41 = vadd.f32 %v4350_v36, %v4349_v30  ;;  %v4352_v42 = vpop.f32.mrb[30].mxu1  ;;  %v4409_v43 = vadd.f32 %v4408_v37, %v4407_v33  ;;  %v4410_v44 = vpop.f32.mrb[34].mxu0  ;;  %v5442_v33 = vld [vmem:[%s6966_s0 + $0x438] ss:$100 sps:$4 sm:$0xff]  }
 0x138   :  { %v4353_v3 = vpop.f32.mrb[31].mxu1  ;;  %v4411_v46 = vpop.f32.mrb[35].mxu0  ;;  %4900 = vmatpush3.bf16.msra.mxu1 %v5435_v25  ;;  %4973 = vmatpush3.bf16.msra.mxu0 %v5441_v28 }
 0x139   :  { %v2842_v50 = vadd.f32 %v4351_v41, %v2753_v40  ;;  %v4354_v52 = vadd.f32 %v4353_v3, %v4352_v42  ;;  %v4412_v11 = vadd.f32 %v4411_v46, %v4410_v44  ;;  %4901 = vmatprep.subr.bf16.mxu1 %v5443_v35  ;;  %4974 = vmatprep.subr.bf16.mxu0 %v5483_v15  ;;  %v5449_v40 = vld [vmem:[%s6966_s0 + $0x504] ss:$100 sps:$4 sm:$0xff]  }
 0x13a   :  { %3544 = vmatmul.mubr.bf16.gmra.mrb[136].mxu1 %v5420_v21  ;;  %3633 = vmatmul.mubr.bf16.gmra.mrb[140].mxu0 %v5423_v27 }
 0x13b   :  { %v2845_v31 = vadd.f32 %v4354_v52, %v2756_v45  ;;  %v6607_v32 = vadd.f32 %v4409_v43, %v2842_v50  ;;  %3551 = vmatprep.mubr.bf16.mxu1 %v5427_v34  ;;  %3640 = vmatprep.mubr.bf16.mxu0 %v5430_v38  ;;  %v2769_v34 = vadd.f32 %v6408_v5, %v6440_v26 }
 0x13c   :  { %4902 = vmatpush3.bf16.msra.mxu1 %v5444_v39  ;;  %4975 = vmatpush3.bf16.msra.mxu0 %v5448_v48  ;;  %v5445_v39 = vld [vmem:[%s6966_s0 + $0x4fc] ss:$100 sps:$4 sm:$0xff]   ;;  %v2772_v43 = vadd.f32 %v6418_v12, %v6440_v26 }
 0x13d   :  { %v6618_v60 = vadd.f32 %v4412_v11, %v2845_v31  ;;  %v4355_v61 = vpop.f32.mrb[32].mxu1  ;;  %v4413_v62 = vpop.f32.mrb[36].mxu0  ;;  %4903 = vmatprep.subr.bf16.mxu1 %v5451_v22  ;;  %4976 = vmatprep.subr.bf16.mxu0 %v5483_v15  ;;  %v5447_v12 = vld [vmem:[%s6966_s0 + $0x4f8] ss:$100 sps:$4 sm:$0xff]   ;;  %v5452_v26 = vld [vmem:[%s6966_s0 + $0x500] ss:$100 sps:$4 sm:$0xff]  }
 0x13e   :  { %v4356_v0 = vpop.f32.mrb[33].mxu1  ;;  %v4414_v1 = vpop.f32.mrb[37].mxu0 }
 0x13f   :  { %v4357_v6 = vadd.f32 %v4356_v0, %v4355_v61  ;;  %v4358_v7 = vpop.f32.mrb[34].mxu1  ;;  %v4415_v8 = vadd.f32 %v4414_v1, %v4413_v62  ;;  %v4416_v9 = vpop.f32.mrb[38].mxu0  ;;  %v5456_v61 = vld [vmem:[%s6966_s0 + $0x5c] ss:$100 sps:$4 sm:$0xff]  }
 0x140   :  { %v4359_v19 = vpop.f32.mrb[35].mxu1  ;;  %v4417_v47 = vpop.f32.mrb[39].mxu0  ;;  %4904 = vmatpush3.bf16.msra.mxu1 %v5453_v56  ;;  %4977 = vmatpush3.bf16.msra.mxu0 %v5457_v59 }
 0x141   :  { %v2850_v14 = vadd.f32 %v4357_v6, %v2761_v4  ;;  %v4360_v16 = vadd.f32 %v4359_v19, %v4358_v7  ;;  %v4418_v54 = vadd.f32 %v4417_v47, %v4416_v9 }
 0x142   :  { %3552 = vmatmul.mubr.bf16.gmra.mrb[140].mxu1 %v5429_v57  ;;  %3641 = vmatmul.mubr.bf16.gmra.mrb[144].mxu0 %v5432_v63 }
 0x143   :  { %v2853_v49 = vadd.f32 %v4360_v16, %v2764_v13  ;;  %v6634_v18 = vadd.f32 %v4415_v8, %v2850_v14  ;;  %3559 = vmatprep.mubr.bf16.mxu1 %v5436_v2  ;;  %3648 = vmatprep.mubr.bf16.mxu0 %v5439_v10 }
 0x145   :  { %v6636_v25 = vadd.f32 %v4418_v54, %v2853_v49  ;;  %v4361_v21 = vpop.f32.mrb[36].mxu1  ;;  %v4419_v27 = vpop.f32.mrb[40].mxu0  ;;  %v5459_v54 = vld [vmem:[%s6966_s0 + $0x124] ss:$100 sps:$4 sm:$0xff]  }
 0x146   :  { %v4362_v28 = vpop.f32.mrb[37].mxu1  ;;  %v4420_v30 = vpop.f32.mrb[41].mxu0 }
 0x147   :  { %v4363_v35 = vadd.f32 %v4362_v28, %v4361_v21  ;;  %v4364_v36 = vpop.f32.mrb[38].mxu1  ;;  %v4421_v37 = vadd.f32 %v4420_v30, %v4419_v27  ;;  %v4422_v38 = vpop.f32.mrb[42].mxu0 }
 0x148   :  { %v4365_v41 = vpop.f32.mrb[39].mxu1  ;;  %v4423_v42 = vpop.f32.mrb[43].mxu0 }
 0x149   :  { %v2858_v44 = vadd.f32 %v4363_v35, %v2769_v34  ;;  %v4366_v45 = vadd.f32 %v4365_v41, %v4364_v36  ;;  %v4424_v5 = vadd.f32 %v4423_v42, %v4422_v38 }
 0x14a   :  { %3560 = vmatmul.mubr.bf16.gmra.mrb[144].mxu1 %v5438_v55  ;;  %3649 = vmatmul.mubr.bf16.gmra.mrb[148].mxu0 %v5442_v33 }
 0x14b   :  { %v2861_v3 = vadd.f32 %v4366_v45, %v2772_v43  ;;  %v6654_v46 = vadd.f32 %v4421_v37, %v2858_v44  ;;  %3567 = vmatprep.mubr.bf16.mxu1 %v5445_v39  ;;  %3656 = vmatprep.mubr.bf16.mxu0 %v5449_v40  ;;  %v5463_v43 = vld [vmem:[%s6966_s0 + $0x1ec] ss:$100 sps:$4 sm:$0xff]  }
 0x14d   :  { %v6656_v48 = vadd.f32 %v4424_v5, %v2861_v3  ;;  %v4441_v50 = vpop.f32.mrb[40].mxu1  ;;  %v4499_v52 = vpop.f32.mrb[44].mxu0 }
 0x14e   :  { %v4442_v11 = vpop.f32.mrb[41].mxu1  ;;  %v4500_v22 = vpop.f32.mrb[45].mxu0 }
 0x14f   :  { %v4443_v31 = vadd.f32 %v4442_v11, %v4441_v50  ;;  %v4444_v56 = vpop.f32.mrb[42].mxu1  ;;  %v4501_v57 = vadd.f32 %v4500_v22, %v4499_v52  ;;  %v4502_v59 = vpop.f32.mrb[46].mxu0 }
 0x150   :  { %v4445_v62 = vpop.f32.mrb[43].mxu1  ;;  %v4503_v63 = vpop.f32.mrb[47].mxu0 }
 0x151   :  { %v2988_v0 = vadd.f32 %v4443_v31, %v6458_v51  ;;  %v4446_v1 = vadd.f32 %v4445_v62, %v4444_v56  ;;  %v4504_v2 = vadd.f32 %v4503_v63, %v4502_v59  ;;  %v5454_v51 = vld [vmem:[%s6966_s0 + $0x58] ss:$100 sps:$4 sm:$0xff]  }
 0x152   :  { %3568 = vmatmul.mubr.bf16.gmra.mrb[148].mxu1 %v5447_v12  ;;  %3657 = vmatmul.mubr.bf16.gmra.mrb[152].mxu0 %v5452_v26  ;;  %v5467_v63 = vld [vmem:[%s6966_s0 + $0x2b4] ss:$100 sps:$4 sm:$0xff]  }
 0x153   :  { %v2991_v4 = vadd.f32 %v4446_v1, %v6466_v53  ;;  %v6669_v6 = vadd.f32 %v4501_v57, %v2988_v0  ;;  %3697 = vmatprep.mubr.bf16.mxu1 %v5456_v61  ;;  %4978 = vmatprep.mubr.msk.bf16.mxu0 %vm5484_vm0, %v5483_v15  ;;  %v5458_v53 = vld [vmem:[%s6966_s0 + $0x60] ss:$100 sps:$4 sm:$0xff]  }
 0x155   :  { %v6673_v7 = vadd.f32 %v4504_v2, %v2991_v4  ;;  %v4447_v8 = vpop.f32.mrb[44].mxu1  ;;  %v4505_v9 = vpop.f32.mrb[48].mxu0 }
 0x156   :  { %v4448_v10 = vpop.f32.mrb[45].mxu1  ;;  %v4506_v19 = vpop.f32.mrb[49].mxu0 }
 0x157   :  { %v4449_v47 = vadd.f32 %v4448_v10, %v4447_v8  ;;  %v4450_v13 = vpop.f32.mrb[46].mxu1  ;;  %v4507_v14 = vadd.f32 %v4506_v19, %v4505_v9  ;;  %v4508_v16 = vpop.f32.mrb[50].mxu0 }
 0x158   :  { %v4451_v49 = vpop.f32.mrb[47].mxu1  ;;  %v4509_v21 = vpop.f32.mrb[51].mxu0 }
 0x159   :  { %v2996_v27 = vadd.f32 %v4449_v47, %v6490_v17  ;;  %v4452_v28 = vadd.f32 %v4451_v49, %v4450_v13  ;;  %v4510_v30 = vadd.f32 %v4509_v21, %v4508_v16  ;;  %v5461_v17 = vld [vmem:[%s6966_s0 + $0x120] ss:$100 sps:$4 sm:$0xff]  }
 0x15a   :  { %3698 = vmatmul.mubr.bf16.vlgmr.msra.gmra.mrb[152].mxu1 %v5454_v51  ;;  %4979 = vmatmul.mubr.bf16.vlgmr.msra.gmra.mrb[156].mxu0 %v5458_v53  ;;  %v5471_v21 = vld [vmem:[%s6966_s0 + $0x37c] ss:$100 sps:$4 sm:$0xff]  }
 0x15b   :  { %v2999_v55 = vadd.f32 %v4452_v28, %v6504_v23  ;;  %v6686_v33 = vadd.f32 %v4507_v14, %v2996_v27  ;;  %3705 = vmatprep.mubr.bf16.mxu1 %v5459_v54  ;;  %4982 = vmatprep.mubr.msk.bf16.mxu0 %vm5484_vm0, %v5483_v15  ;;  %v5462_v23 = vld [vmem:[%s6966_s0 + $0x128] ss:$100 sps:$4 sm:$0xff]  }
 0x15d   :  { %v6690_v34 = vadd.f32 %v4510_v30, %v2999_v55  ;;  %v4453_v35 = vpop.f32.mrb[48].mxu1  ;;  %v4511_v36 = vpop.f32.mrb[52].mxu0 }
 0x15e   :  { %v4454_v37 = vpop.f32.mrb[49].mxu1  ;;  %v4512_v38 = vpop.f32.mrb[53].mxu0 }
 0x15f   :  { %v4455_v39 = vadd.f32 %v4454_v37, %v4453_v35  ;;  %v4456_v40 = vpop.f32.mrb[50].mxu1  ;;  %v4513_v41 = vadd.f32 %v4512_v38, %v4511_v36  ;;  %v4514_v42 = vpop.f32.mrb[54].mxu0 }
 0x160   :  { %v4457_v44 = vpop.f32.mrb[51].mxu1  ;;  %v4515_v45 = vpop.f32.mrb[55].mxu0 }
 0x161   :  { %v3004_v5 = vadd.f32 %v4455_v39, %v6527_v24  ;;  %v4458_v3 = vadd.f32 %v4457_v44, %v4456_v40  ;;  %v4516_v50 = vadd.f32 %v4515_v45, %v4514_v42  ;;  %v5465_v24 = vld [vmem:[%s6966_s0 + $0x1e8] ss:$100 sps:$4 sm:$0xff]  }
 0x162   :  { %3706 = vmatmul.mubr.bf16.gmra.mrb[156].mxu1 %v5461_v17  ;;  %4983 = vmatmul.mubr.bf16.gmra.mrb[160].mxu0 %v5462_v23  ;;  %v5475_v45 = vld [vmem:[%s6966_s0 + $0x444] ss:$100 sps:$4 sm:$0xff]  }
 0x163   :  { %v3007_v52 = vadd.f32 %v4458_v3, %v6544_v58  ;;  %v6703_v11 = vadd.f32 %v4513_v41, %v3004_v5  ;;  %3713 = vmatprep.mubr.bf16.mxu1 %v5463_v43  ;;  %4986 = vmatprep.mubr.msk.bf16.mxu0 %vm5484_vm0, %v5483_v15  ;;  %v5466_v58 = vld [vmem:[%s6966_s0 + $0x1f0] ss:$100 sps:$4 sm:$0xff]  }
 0x165   :  { %v6707_v22 = vadd.f32 %v4516_v50, %v3007_v52  ;;  %v4459_v12 = vpop.f32.mrb[52].mxu1  ;;  %v4517_v26 = vpop.f32.mrb[56].mxu0 }
 0x166   :  { %v4460_v31 = vpop.f32.mrb[53].mxu1  ;;  %v4518_v56 = vpop.f32.mrb[57].mxu0 }
 0x167   :  { %v4461_v57 = vadd.f32 %v4460_v31, %v4459_v12  ;;  %v4462_v59 = vpop.f32.mrb[54].mxu1  ;;  %v4519_v61 = vadd.f32 %v4518_v56, %v4517_v26  ;;  %v4520_v62 = vpop.f32.mrb[58].mxu0 }
 0x168   :  { %v4463_v0 = vpop.f32.mrb[55].mxu1  ;;  %v4521_v1 = vpop.f32.mrb[59].mxu0 }
 0x169   :  { %v3012_v2 = vadd.f32 %v4461_v57, %v6567_v20  ;;  %v4464_v4 = vadd.f32 %v4463_v0, %v4462_v59  ;;  %v4522_v8 = vadd.f32 %v4521_v1, %v4520_v62  ;;  %v5469_v20 = vld [vmem:[%s6966_s0 + $0x2b0] ss:$100 sps:$4 sm:$0xff]  }
 0x16a   :  { %3714 = vmatmul.mubr.bf16.gmra.mrb[160].mxu1 %v5465_v24  ;;  %4987 = vmatmul.mubr.bf16.gmra.mrb[164].mxu0 %v5466_v58  ;;  %v5479_v1 = vld [vmem:[%s6966_s0 + $0x50c] ss:$100 sps:$4 sm:$0xff]  }
 0x16b   :  { %v3015_v9 = vadd.f32 %v4464_v4, %v6581_v29  ;;  %v6720_v10 = vadd.f32 %v4519_v61, %v3012_v2  ;;  %3721 = vmatprep.mubr.bf16.mxu1 %v5467_v63  ;;  %4990 = vmatprep.mubr.msk.bf16.mxu0 %vm5484_vm0, %v5483_v15  ;;  %v5470_v29 = vld [vmem:[%s6966_s0 + $0x2b8] ss:$100 sps:$4 sm:$0xff]  }
 0x16d   :  { %v6724_v19 = vadd.f32 %v4522_v8, %v3015_v9  ;;  %v4465_v51 = vpop.f32.mrb[56].mxu1  ;;  %v4523_v53 = vpop.f32.mrb[60].mxu0 }
 0x16e   :  { %v4466_v47 = vpop.f32.mrb[57].mxu1  ;;  %v4524_v13 = vpop.f32.mrb[61].mxu0 }
 0x16f   :  { %v4467_v14 = vadd.f32 %v4466_v47, %v4465_v51  ;;  %v4468_v16 = vpop.f32.mrb[58].mxu1  ;;  %v4525_v54 = vadd.f32 %v4524_v13, %v4523_v53  ;;  %v4526_v49 = vpop.f32.mrb[62].mxu0 }
 0x170   :  { %v4469_v27 = vpop.f32.mrb[59].mxu1  ;;  %v4527_v28 = vpop.f32.mrb[63].mxu0 }
 0x171   :  { %v3020_v30 = vadd.f32 %v4467_v14, %v6607_v32  ;;  %v4470_v55 = vadd.f32 %v4469_v27, %v4468_v16  ;;  %v4528_v35 = vadd.f32 %v4527_v28, %v4526_v49  ;;  %v5473_v32 = vld [vmem:[%s6966_s0 + $0x378] ss:$100 sps:$4 sm:$0xff]  }
 0x172   :  { %3722 = vmatmul.mubr.bf16.gmra.mrb[164].mxu1 %v5469_v20  ;;  %4991 = vmatmul.mubr.bf16.gmra.mrb[168].mxu0 %v5470_v29 }
 0x173   :  { %v3023_v36 = vadd.f32 %v4470_v55, %v6618_v60  ;;  %v6737_v37 = vadd.f32 %v4525_v54, %v3020_v30  ;;  %3729 = vmatprep.mubr.bf16.mxu1 %v5471_v21  ;;  %4994 = vmatprep.mubr.msk.bf16.mxu0 %vm5484_vm0, %v5483_v15  ;;  %v5474_v60 = vld [vmem:[%s6966_s0 + $0x380] ss:$100 sps:$4 sm:$0xff]  }
 0x175   :  { %v6741_v38 = vadd.f32 %v4528_v35, %v3023_v36  ;;  %v4471_v17 = vpop.f32.mrb[60].mxu1  ;;  %v4529_v23 = vpop.f32.mrb[64].mxu0 }
 0x176   :  { %v4472_v39 = vpop.f32.mrb[61].mxu1  ;;  %v4530_v40 = vpop.f32.mrb[65].mxu0 }
 0x177   :  { %v4473_v41 = vadd.f32 %v4472_v39, %v4471_v17  ;;  %v4474_v42 = vpop.f32.mrb[62].mxu1  ;;  %v4531_v43 = vadd.f32 %v4530_v40, %v4529_v23  ;;  %v4532_v44 = vpop.f32.mrb[66].mxu0 }
 0x178   :  { %v4475_v5 = vpop.f32.mrb[63].mxu1  ;;  %v4533_v3 = vpop.f32.mrb[67].mxu0 }
 0x179   :  { %v3028_v50 = vadd.f32 %v4473_v41, %v6634_v18  ;;  %v4476_v52 = vadd.f32 %v4475_v5, %v4474_v42  ;;  %v4534_v12 = vadd.f32 %v4533_v3, %v4532_v44  ;;  %v5477_v18 = vld [vmem:[%s6966_s0 + $0x440] ss:$100 sps:$4 sm:$0xff]  }
 0x17a   :  { %3730 = vmatmul.mubr.bf16.gmra.mrb[168].mxu1 %v5473_v32  ;;  %4995 = vmatmul.mubr.bf16.gmra.mrb[172].mxu0 %v5474_v60 }
 0x17b   :  { %v3031_v26 = vadd.f32 %v4476_v52, %v6636_v25  ;;  %v6754_v31 = vadd.f32 %v4531_v43, %v3028_v50  ;;  %3737 = vmatprep.mubr.bf16.mxu1 %v5475_v45  ;;  %4998 = vmatprep.mubr.msk.bf16.mxu0 %vm5484_vm0, %v5483_v15  ;;  %v5478_v25 = vld [vmem:[%s6966_s0 + $0x448] ss:$100 sps:$4 sm:$0xff]  }
 0x17d   :  { %v6758_v56 = vadd.f32 %v4534_v12, %v3031_v26  ;;  %v4477_v24 = vpop.f32.mrb[64].mxu1  ;;  %v4535_v58 = vpop.f32.mrb[68].mxu0 }
 0x17e   :  { %v4478_v57 = vpop.f32.mrb[65].mxu1  ;;  %v4536_v59 = vpop.f32.mrb[69].mxu0 }
 0x17f   :  { %v4479_v61 = vadd.f32 %v4478_v57, %v4477_v24  ;;  %v4480_v62 = vpop.f32.mrb[66].mxu1  ;;  %v4537_v63 = vadd.f32 %v4536_v59, %v4535_v58  ;;  %v4538_v0 = vpop.f32.mrb[70].mxu0 }
 0x180   :  { %v4481_v2 = vpop.f32.mrb[67].mxu1  ;;  %v4539_v4 = vpop.f32.mrb[71].mxu0 }
 0x181   :  { %v3036_v8 = vadd.f32 %v4479_v61, %v6654_v46  ;;  %v4482_v9 = vadd.f32 %v4481_v2, %v4480_v62  ;;  %v4540_v51 = vadd.f32 %v4539_v4, %v4538_v0  ;;  %v5481_v46 = vld [vmem:[%s6966_s0 + $0x508] ss:$100 sps:$4 sm:$0xff]  }
 0x182   :  { %3738 = vmatmul.mubr.bf16.gmra.mrb[172].mxu1 %v5477_v18  ;;  %4999 = vmatmul.mubr.bf16.gmra.mrb[176].mxu0 %v5478_v25 }
 0x183   :  { %v3039_v53 = vadd.f32 %v4482_v9, %v6656_v48  ;;  %v6771_v47 = vadd.f32 %v4537_v63, %v3036_v8  ;;  %3745 = vmatprep.mubr.bf16.mxu1 %v5479_v1  ;;  %5002 = vmatprep.mubr.msk.bf16.mxu0 %vm5484_vm0, %v5483_v15  ;;  %v5482_v48 = vld [vmem:[%s6966_s0 + $0x510] ss:$100 sps:$4 sm:$0xff]  }
 0x185   :  { %v6775_v13 = vadd.f32 %v4540_v51, %v3039_v53  ;;  %v4557_v20 = vpop.f32.mrb[68].mxu1  ;;  %v4615_v29 = vpop.f32.mrb[72].mxu0 }
 0x186   :  { %v4558_v14 = vpop.f32.mrb[69].mxu1  ;;  %v4616_v16 = vpop.f32.mrb[73].mxu0 }
 0x187   :  { %v4559_v54 = vadd.f32 %v4558_v14, %v4557_v20  ;;  %v4560_v49 = vpop.f32.mrb[70].mxu1  ;;  %v4617_v21 = vadd.f32 %v4616_v16, %v4615_v29  ;;  %v4618_v27 = vpop.f32.mrb[74].mxu0 }
 0x188   :  { %v4561_v28 = vpop.f32.mrb[71].mxu1  ;;  %v4619_v15 = vpop.f32.mrb[75].mxu0 }
 0x189   :  { %v3166_v30 = vadd.f32 %v4559_v54, %v6669_v6  ;;  %v4562_v55 = vadd.f32 %v4561_v28, %v4560_v49  ;;  %v4620_v35 = vadd.f32 %v4619_v15, %v4618_v27 }
 0x18a   :  { %3746 = vmatmul.mubr.bf16.gmra.mrb[176].mxu1 %v5481_v46  ;;  %5003 = vmatmul.mubr.bf16.gmra.mrb[180].mxu0 %v5482_v48 }
 0x18b   :  { %v3169_v36 = vadd.f32 %v4562_v55, %v6673_v7  ;;  %v6785_v17 = vadd.f32 %v4617_v21, %v3166_v30 }
 0x18d   :  { %v6787_v23 = vadd.f32 %v4620_v35, %v3169_v36  ;;  %v4563_v39 = vpop.f32.mrb[72].mxu1  ;;  %v4621_v40 = vpop.f32.mrb[76].mxu0 }
 0x18e   :  { %v4564_v32 = vpop.f32.mrb[73].mxu1  ;;  %v4622_v60 = vpop.f32.mrb[77].mxu0 }
 0x18f   :  { %v4565_v41 = vadd.f32 %v4564_v32, %v4563_v39  ;;  %v4566_v42 = vpop.f32.mrb[74].mxu1  ;;  %v4623_v43 = vadd.f32 %v4622_v60, %v4621_v40  ;;  %v4624_v44 = vpop.f32.mrb[78].mxu0 }
 0x190   :  { %v4567_v45 = vpop.f32.mrb[75].mxu1  ;;  %v4625_v6 = vpop.f32.mrb[79].mxu0 }
 0x191   :  { %v3174_v5 = vadd.f32 %v4565_v41, %v6686_v33  ;;  %v4568_v3 = vadd.f32 %v4567_v45, %v4566_v42  ;;  %v4626_v50 = vadd.f32 %v4625_v6, %v4624_v44 }
 0x193   :  { %v3177_v7 = vadd.f32 %v4568_v3, %v6690_v34  ;;  %v6791_v52 = vadd.f32 %v4623_v43, %v3174_v5 }
 0x195   :  { %v6793_v12 = vadd.f32 %v4626_v50, %v3177_v7  ;;  %v4569_v26 = vpop.f32.mrb[76].mxu1  ;;  %v4627_v24 = vpop.f32.mrb[80].mxu0 }
 0x196   :  { %v4570_v58 = vpop.f32.mrb[77].mxu1  ;;  %v4628_v57 = vpop.f32.mrb[81].mxu0 }
 0x197   :  { %v4571_v59 = vadd.f32 %v4570_v58, %v4569_v26  ;;  %v4572_v18 = vpop.f32.mrb[78].mxu1  ;;  %v4629_v25 = vadd.f32 %v4628_v57, %v4627_v24  ;;  %v4630_v61 = vpop.f32.mrb[82].mxu0 }
 0x198   :  { %v4573_v62 = vpop.f32.mrb[79].mxu1  ;;  %v4631_v63 = vpop.f32.mrb[83].mxu0 }
 0x199   :  { %v3182_v33 = vadd.f32 %v4571_v59, %v6703_v11  ;;  %v4574_v0 = vadd.f32 %v4573_v62, %v4572_v18  ;;  %v4632_v1 = vadd.f32 %v4631_v63, %v4630_v61 }
 0x19b   :  { %v3185_v34 = vadd.f32 %v4574_v0, %v6707_v22  ;;  %v6797_v2 = vadd.f32 %v4629_v25, %v3182_v33 }
 0x19d   :  { %v6799_v4 = vadd.f32 %v4632_v1, %v3185_v34  ;;  %v4575_v8 = vpop.f32.mrb[80].mxu1  ;;  %v4633_v9 = vpop.f32.mrb[84].mxu0 }
 0x19e   :  { %v4576_v51 = vpop.f32.mrb[81].mxu1  ;;  %v4634_v53 = vpop.f32.mrb[85].mxu0 }
 0x19f   :  { %v4577_v20 = vadd.f32 %v4576_v51, %v4575_v8  ;;  %v4578_v29 = vpop.f32.mrb[82].mxu1  ;;  %v4635_v14 = vadd.f32 %v4634_v53, %v4633_v9  ;;  %v4636_v16 = vpop.f32.mrb[86].mxu0 }
 0x1a0   :  { %v4579_v46 = vpop.f32.mrb[83].mxu1  ;;  %v4637_v48 = vpop.f32.mrb[87].mxu0 }
 0x1a1   :  { %v3190_v11 = vadd.f32 %v4577_v20, %v6720_v10  ;;  %v4580_v54 = vadd.f32 %v4579_v46, %v4578_v29  ;;  %v4638_v49 = vadd.f32 %v4637_v48, %v4636_v16 }
 0x1a3   :  { %v3193_v22 = vadd.f32 %v4580_v54, %v6724_v19  ;;  %v6803_v21 = vadd.f32 %v4635_v14, %v3190_v11 }
 0x1a5   :  { %v6805_v27 = vadd.f32 %v4638_v49, %v3193_v22  ;;  %v4581_v28 = vpop.f32.mrb[84].mxu1  ;;  %v4639_v15 = vpop.f32.mrb[88].mxu0 }
 0x1a6   :  { %v4582_v30 = vpop.f32.mrb[85].mxu1  ;;  %v4640_v55 = vpop.f32.mrb[89].mxu0 }
 0x1a7   :  { %v4583_v35 = vadd.f32 %v4582_v30, %v4581_v28  ;;  %v4584_v36 = vpop.f32.mrb[86].mxu1  ;;  %v4641_v39 = vadd.f32 %v4640_v55, %v4639_v15  ;;  %v4642_v40 = vpop.f32.mrb[90].mxu0 }
 0x1a8   :  { %v4585_v32 = vpop.f32.mrb[87].mxu1  ;;  %v4643_v60 = vpop.f32.mrb[91].mxu0 }
 0x1a9   :  { %v3198_v10 = vadd.f32 %v4583_v35, %v6737_v37  ;;  %v4586_v41 = vadd.f32 %v4585_v32, %v4584_v36  ;;  %v4644_v42 = vadd.f32 %v4643_v60, %v4642_v40 }
 0x1ab   :  { %v3201_v19 = vadd.f32 %v4586_v41, %v6741_v38  ;;  %v6809_v43 = vadd.f32 %v4641_v39, %v3198_v10 }
 0x1ad   :  { %v6811_v44 = vadd.f32 %v4644_v42, %v3201_v19  ;;  %v4587_v45 = vpop.f32.mrb[88].mxu1  ;;  %v4645_v6 = vpop.f32.mrb[92].mxu0 }
 0x1ae   :  { %v4588_v5 = vpop.f32.mrb[89].mxu1  ;;  %v4646_v3 = vpop.f32.mrb[93].mxu0 }
 0x1af   :  { %v4589_v50 = vadd.f32 %v4588_v5, %v4587_v45  ;;  %v4590_v7 = vpop.f32.mrb[90].mxu1  ;;  %v4647_v26 = vadd.f32 %v4646_v3, %v4645_v6  ;;  %v4648_v24 = vpop.f32.mrb[94].mxu0 }
 0x1b0   :  { %v4591_v58 = vpop.f32.mrb[91].mxu1  ;;  %v4649_v57 = vpop.f32.mrb[95].mxu0 }
 0x1b1   :  { %v3206_v37 = vadd.f32 %v4589_v50, %v6754_v31  ;;  %v4592_v59 = vadd.f32 %v4591_v58, %v4590_v7  ;;  %v4650_v18 = vadd.f32 %v4649_v57, %v4648_v24 }
 0x1b3   :  { %v3209_v38 = vadd.f32 %v4592_v59, %v6758_v56  ;;  %v6815_v25 = vadd.f32 %v4647_v26, %v3206_v37 }
 0x1b5   :  { %v6817_v61 = vadd.f32 %v4650_v18, %v3209_v38  ;;  %v4593_v62 = vpop.f32.mrb[92].mxu1  ;;  %v4651_v63 = vpop.f32.mrb[96].mxu0 }
 0x1b6   :  { %v4594_v33 = vpop.f32.mrb[93].mxu1  ;;  %v4652_v0 = vpop.f32.mrb[97].mxu0 }
 0x1b7   :  { %v4595_v1 = vadd.f32 %v4594_v33, %v4593_v62  ;;  %v4596_v34 = vpop.f32.mrb[94].mxu1  ;;  %v4653_v8 = vadd.f32 %v4652_v0, %v4651_v63  ;;  %v4654_v9 = vpop.f32.mrb[98].mxu0 }
 0x1b8   :  { %v4597_v51 = vpop.f32.mrb[95].mxu1  ;;  %v4655_v53 = vpop.f32.mrb[99].mxu0 }
 0x1b9   :  { %v3214_v31 = vadd.f32 %v4595_v1, %v6771_v47  ;;  %v4598_v20 = vadd.f32 %v4597_v51, %v4596_v34  ;;  %v4656_v29 = vadd.f32 %v4655_v53, %v4654_v9 }
 0x1bb   :  { %v3217_v56 = vadd.f32 %v4598_v20, %v6775_v13  ;;  %v6821_v14 = vadd.f32 %v4653_v8, %v3214_v31 }
 0x1bd   :  { %v6823_v16 = vadd.f32 %v4656_v29, %v3217_v56  ;;  %v4673_v46 = vpop.f32.mrb[96].mxu1  ;;  %v4731_v48 = vpop.f32.mrb[100].mxu0 }
 0x1be   :  { %v4674_v11 = vpop.f32.mrb[97].mxu1  ;;  %v4732_v54 = vpop.f32.mrb[101].mxu0 }
 0x1bf   :  { %v4675_v49 = vadd.f32 %v4674_v11, %v4673_v46  ;;  %v4676_v22 = vpop.f32.mrb[98].mxu1  ;;  %v4733_v28 = vadd.f32 %v4732_v54, %v4731_v48  ;;  %v4734_v15 = vpop.f32.mrb[102].mxu0 }
 0x1c0   :  { %v4677_v30 = vpop.f32.mrb[99].mxu1  ;;  %v4735_v55 = vpop.f32.mrb[103].mxu0 }
 0x1c1   :  { %v3344_v47 = vadd.f32 %v4675_v49, %v6785_v17  ;;  %v4678_v35 = vadd.f32 %v4677_v30, %v4676_v22  ;;  %v4736_v36 = vadd.f32 %v4735_v55, %v4734_v15 }
 0x1c3   :  { %v3347_v13 = vadd.f32 %v4678_v35, %v6787_v23  ;;  %v6827_v39 = vadd.f32 %v4733_v28, %v3344_v47 }
 0x1c5   :  { %v6829_v40 = vadd.f32 %v4736_v36, %v3347_v13  ;;  %v4679_v32 = vpop.f32.mrb[100].mxu1  ;;  %v4737_v60 = vpop.f32.mrb[104].mxu0 }
 0x1c6   :  { %v4680_v10 = vpop.f32.mrb[101].mxu1  ;;  %v4738_v41 = vpop.f32.mrb[105].mxu0 }
 0x1c7   :  { %v4681_v42 = vadd.f32 %v4680_v10, %v4679_v32  ;;  %v4682_v19 = vpop.f32.mrb[102].mxu1  ;;  %v4739_v45 = vadd.f32 %v4738_v41, %v4737_v60  ;;  %v4740_v6 = vpop.f32.mrb[106].mxu0 }
 0x1c8   :  { %v4683_v5 = vpop.f32.mrb[103].mxu1  ;;  %v4741_v3 = vpop.f32.mrb[107].mxu0 }
 0x1c9   :  { %v3352_v17 = vadd.f32 %v4681_v42, %v6791_v52  ;;  %v4684_v50 = vadd.f32 %v4683_v5, %v4682_v19  ;;  %v4742_v7 = vadd.f32 %v4741_v3, %v4740_v6 }
 0x1cb   :  { %v3355_v23 = vadd.f32 %v4684_v50, %v6793_v12  ;;  %v6833_v26 = vadd.f32 %v4739_v45, %v3352_v17 }
 0x1cd   :  { %v6835_v24 = vadd.f32 %v4742_v7, %v3355_v23  ;;  %v4685_v58 = vpop.f32.mrb[104].mxu1  ;;  %v4743_v57 = vpop.f32.mrb[108].mxu0 }
 0x1ce   :  { %v4686_v37 = vpop.f32.mrb[105].mxu1  ;;  %v4744_v59 = vpop.f32.mrb[109].mxu0 }
 0x1cf   :  { %v4687_v18 = vadd.f32 %v4686_v37, %v4685_v58  ;;  %v4688_v38 = vpop.f32.mrb[106].mxu1  ;;  %v4745_v62 = vadd.f32 %v4744_v59, %v4743_v57  ;;  %v4746_v63 = vpop.f32.mrb[110].mxu0 }
 0x1d0   :  { %v4689_v33 = vpop.f32.mrb[107].mxu1  ;;  %v4747_v0 = vpop.f32.mrb[111].mxu0 }
 0x1d1   :  { %v3360_v52 = vadd.f32 %v4687_v18, %v6797_v2  ;;  %v4690_v1 = vadd.f32 %v4689_v33, %v4688_v38  ;;  %v4748_v34 = vadd.f32 %v4747_v0, %v4746_v63 }
 0x1d3   :  { %v3363_v12 = vadd.f32 %v4690_v1, %v6799_v4  ;;  %v6839_v8 = vadd.f32 %v4745_v62, %v3360_v52 }
 0x1d5   :  { %v6841_v9 = vadd.f32 %v4748_v34, %v3363_v12  ;;  %v4691_v51 = vpop.f32.mrb[108].mxu1  ;;  %v4749_v53 = vpop.f32.mrb[112].mxu0 }
 0x1d6   :  { %v4692_v31 = vpop.f32.mrb[109].mxu1  ;;  %v4750_v20 = vpop.f32.mrb[113].mxu0 }
 0x1d7   :  { %v4693_v29 = vadd.f32 %v4692_v31, %v4691_v51  ;;  %v4694_v56 = vpop.f32.mrb[110].mxu1  ;;  %v4751_v46 = vadd.f32 %v4750_v20, %v4749_v53  ;;  %v4752_v48 = vpop.f32.mrb[114].mxu0 }
 0x1d8   :  { %v4695_v11 = vpop.f32.mrb[111].mxu1  ;;  %v4753_v54 = vpop.f32.mrb[115].mxu0 }
 0x1d9   :  { %v3368_v2 = vadd.f32 %v4693_v29, %v6803_v21  ;;  %v4696_v49 = vadd.f32 %v4695_v11, %v4694_v56  ;;  %v4754_v22 = vadd.f32 %v4753_v54, %v4752_v48 }
 0x1db   :  { %v3371_v4 = vadd.f32 %v4696_v49, %v6805_v27  ;;  %v6845_v28 = vadd.f32 %v4751_v46, %v3368_v2 }
 0x1dd   :  { %v6847_v15 = vadd.f32 %v4754_v22, %v3371_v4  ;;  %v4697_v30 = vpop.f32.mrb[112].mxu1  ;;  %v4755_v55 = vpop.f32.mrb[116].mxu0 }
 0x1de   :  { %v4698_v47 = vpop.f32.mrb[113].mxu1  ;;  %v4756_v35 = vpop.f32.mrb[117].mxu0 }
 0x1df   :  { %v4699_v36 = vadd.f32 %v4698_v47, %v4697_v30  ;;  %v4700_v13 = vpop.f32.mrb[114].mxu1  ;;  %v4757_v32 = vadd.f32 %v4756_v35, %v4755_v55  ;;  %v4758_v60 = vpop.f32.mrb[118].mxu0 }
 0x1e0   :  { %v4701_v10 = vpop.f32.mrb[115].mxu1  ;;  %v4759_v41 = vpop.f32.mrb[119].mxu0 }
 0x1e1   :  { %v3376_v21 = vadd.f32 %v4699_v36, %v6809_v43  ;;  %v4702_v42 = vadd.f32 %v4701_v10, %v4700_v13  ;;  %v4760_v19 = vadd.f32 %v4759_v41, %v4758_v60 }
 0x1e3   :  { %v3379_v27 = vadd.f32 %v4702_v42, %v6811_v44  ;;  %v6851_v45 = vadd.f32 %v4757_v32, %v3376_v21 }
 0x1e5   :  { %v6853_v6 = vadd.f32 %v4760_v19, %v3379_v27  ;;  %v4703_v5 = vpop.f32.mrb[116].mxu1  ;;  %v4761_v3 = vpop.f32.mrb[120].mxu0 }
 0x1e6   :  { %v4704_v17 = vpop.f32.mrb[117].mxu1  ;;  %v4762_v50 = vpop.f32.mrb[121].mxu0 }
 0x1e7   :  { %v4705_v7 = vadd.f32 %v4704_v17, %v4703_v5  ;;  %v4706_v23 = vpop.f32.mrb[118].mxu1  ;;  %v4763_v58 = vadd.f32 %v4762_v50, %v4761_v3  ;;  %v4764_v57 = vpop.f32.mrb[122].mxu0 }
 0x1e8   :  { %v4707_v37 = vpop.f32.mrb[119].mxu1  ;;  %v4765_v59 = vpop.f32.mrb[123].mxu0 }
 0x1e9   :  { %v3384_v43 = vadd.f32 %v4705_v7, %v6815_v25  ;;  %v4708_v18 = vadd.f32 %v4707_v37, %v4706_v23  ;;  %v4766_v38 = vadd.f32 %v4765_v59, %v4764_v57 }
 0x1eb   :  { %v3387_v44 = vadd.f32 %v4708_v18, %v6817_v61  ;;  %v6857_v62 = vadd.f32 %v4763_v58, %v3384_v43 }
 0x1ed   :  { %v6859_v63 = vadd.f32 %v4766_v38, %v3387_v44  ;;  %v4709_v33 = vpop.f32.mrb[120].mxu1  ;;  %v4767_v0 = vpop.f32.mrb[124].mxu0 }
 0x1ee   :  { %v4710_v52 = vpop.f32.mrb[121].mxu1  ;;  %v4768_v1 = vpop.f32.mrb[125].mxu0 }
 0x1ef   :  { %v4711_v34 = vadd.f32 %v4710_v52, %v4709_v33  ;;  %v4712_v12 = vpop.f32.mrb[122].mxu1  ;;  %v4769_v51 = vadd.f32 %v4768_v1, %v4767_v0  ;;  %v4770_v53 = vpop.f32.mrb[126].mxu0 }
 0x1f0   :  { %v4713_v31 = vpop.f32.mrb[123].mxu1  ;;  %v4771_v20 = vpop.f32.mrb[127].mxu0 }
 0x1f1   :  { %v3392_v25 = vadd.f32 %v4711_v34, %v6821_v14  ;;  %v4714_v29 = vadd.f32 %v4713_v31, %v4712_v12  ;;  %v4772_v56 = vadd.f32 %v4771_v20, %v4770_v53 }
 0x1f3   :  { %v3395_v61 = vadd.f32 %v4714_v29, %v6823_v16  ;;  %v6863_v46 = vadd.f32 %v4769_v51, %v3392_v25 }
 0x1f5   :  { %v6865_v48 = vadd.f32 %v4772_v56, %v3395_v61  ;;  %v4789_v11 = vpop.f32.mrb[124].mxu1  ;;  %v4847_v54 = vpop.f32.mrb[128].mxu0 }
 0x1f6   :  { %v4790_v2 = vpop.f32.mrb[125].mxu1  ;;  %v4848_v49 = vpop.f32.mrb[129].mxu0 }
 0x1f7   :  { %v4791_v22 = vadd.f32 %v4790_v2, %v4789_v11  ;;  %v4792_v4 = vpop.f32.mrb[126].mxu1  ;;  %v4849_v30 = vadd.f32 %v4848_v49, %v4847_v54  ;;  %v4850_v55 = vpop.f32.mrb[130].mxu0 }
 0x1f8   :  { %v4793_v47 = vpop.f32.mrb[127].mxu1  ;;  %v4851_v35 = vpop.f32.mrb[131].mxu0 }
 0x1f9   :  { %v3522_v14 = vadd.f32 %v4791_v22, %v6827_v39  ;;  %v4794_v36 = vadd.f32 %v4793_v47, %v4792_v4  ;;  %v4852_v13 = vadd.f32 %v4851_v35, %v4850_v55 }
 0x1fb   :  { %v3525_v16 = vadd.f32 %v4794_v36, %v6829_v40  ;;  %v6869_v32 = vadd.f32 %v4849_v30, %v3522_v14 }
 0x1fd   :  { %v6871_v60 = vadd.f32 %v4852_v13, %v3525_v16  ;;  %v4795_v10 = vpop.f32.mrb[128].mxu1  ;;  %v4853_v41 = vpop.f32.mrb[132].mxu0 }
 0x1fe   :  { %v4796_v21 = vpop.f32.mrb[129].mxu1  ;;  %v4854_v42 = vpop.f32.mrb[133].mxu0 }
 0x1ff   :  { %v4797_v19 = vadd.f32 %v4796_v21, %v4795_v10  ;;  %v4798_v27 = vpop.f32.mrb[130].mxu1  ;;  %v4855_v5 = vadd.f32 %v4854_v42, %v4853_v41  ;;  %v4856_v3 = vpop.f32.mrb[134].mxu0 }
 0x200   :  { %v4799_v17 = vpop.f32.mrb[131].mxu1  ;;  %v4857_v50 = vpop.f32.mrb[135].mxu0 }
 0x201   :  { %v3530_v39 = vadd.f32 %v4797_v19, %v6833_v26  ;;  %v4800_v7 = vadd.f32 %v4799_v17, %v4798_v27  ;;  %v4858_v23 = vadd.f32 %v4857_v50, %v4856_v3 }
 0x203   :  { %v3533_v40 = vadd.f32 %v4800_v7, %v6835_v24  ;;  %v6875_v58 = vadd.f32 %v4855_v5, %v3530_v39 }
 0x205   :  { %v6877_v57 = vadd.f32 %v4858_v23, %v3533_v40  ;;  %v4801_v37 = vpop.f32.mrb[132].mxu1  ;;  %v4859_v59 = vpop.f32.mrb[136].mxu0 }
 0x206   :  { %v4802_v43 = vpop.f32.mrb[133].mxu1  ;;  %v4860_v18 = vpop.f32.mrb[137].mxu0 }
 0x207   :  { %v4803_v38 = vadd.f32 %v4802_v43, %v4801_v37  ;;  %v4804_v44 = vpop.f32.mrb[134].mxu1  ;;  %v4861_v33 = vadd.f32 %v4860_v18, %v4859_v59  ;;  %v4862_v0 = vpop.f32.mrb[138].mxu0 }
 0x208   :  { %v4805_v52 = vpop.f32.mrb[135].mxu1  ;;  %v4863_v1 = vpop.f32.mrb[139].mxu0 }
 0x209   :  { %v3538_v26 = vadd.f32 %v4803_v38, %v6839_v8  ;;  %v4806_v34 = vadd.f32 %v4805_v52, %v4804_v44  ;;  %v4864_v12 = vadd.f32 %v4863_v1, %v4862_v0 }
 0x20b   :  { %v3541_v24 = vadd.f32 %v4806_v34, %v6841_v9  ;;  %v6881_v51 = vadd.f32 %v4861_v33, %v3538_v26 }
 0x20d   :  { %v6883_v53 = vadd.f32 %v4864_v12, %v3541_v24  ;;  %v4807_v31 = vpop.f32.mrb[136].mxu1  ;;  %v4865_v20 = vpop.f32.mrb[140].mxu0 }
 0x20e   :  { %v4808_v25 = vpop.f32.mrb[137].mxu1  ;;  %v4866_v29 = vpop.f32.mrb[141].mxu0 }
 0x20f   :  { %v4809_v56 = vadd.f32 %v4808_v25, %v4807_v31  ;;  %v4810_v61 = vpop.f32.mrb[138].mxu1  ;;  %v4867_v11 = vadd.f32 %v4866_v29, %v4865_v20  ;;  %v4868_v54 = vpop.f32.mrb[142].mxu0 }
 0x210   :  { %v4811_v2 = vpop.f32.mrb[139].mxu1  ;;  %v4869_v49 = vpop.f32.mrb[143].mxu0 }
 0x211   :  { %v3546_v8 = vadd.f32 %v4809_v56, %v6845_v28  ;;  %v4812_v22 = vadd.f32 %v4811_v2, %v4810_v61  ;;  %v4870_v4 = vadd.f32 %v4869_v49, %v4868_v54 }
 0x213   :  { %v3549_v9 = vadd.f32 %v4812_v22, %v6847_v15  ;;  %v6887_v30 = vadd.f32 %v4867_v11, %v3546_v8 }
 0x215   :  { %v6889_v55 = vadd.f32 %v4870_v4, %v3549_v9  ;;  %v4813_v47 = vpop.f32.mrb[140].mxu1  ;;  %v4871_v35 = vpop.f32.mrb[144].mxu0 }
 0x216   :  { %v4814_v14 = vpop.f32.mrb[141].mxu1  ;;  %v4872_v36 = vpop.f32.mrb[145].mxu0 }
 0x217   :  { %v4815_v13 = vadd.f32 %v4814_v14, %v4813_v47  ;;  %v4816_v16 = vpop.f32.mrb[142].mxu1  ;;  %v4873_v10 = vadd.f32 %v4872_v36, %v4871_v35  ;;  %v4874_v41 = vpop.f32.mrb[146].mxu0 }
 0x218   :  { %v4817_v21 = vpop.f32.mrb[143].mxu1  ;;  %v4875_v42 = vpop.f32.mrb[147].mxu0 }
 0x219   :  { %v3554_v28 = vadd.f32 %v4815_v13, %v6851_v45  ;;  %v4818_v19 = vadd.f32 %v4817_v21, %v4816_v16  ;;  %v4876_v27 = vadd.f32 %v4875_v42, %v4874_v41 }
 0x21b   :  { %v3557_v15 = vadd.f32 %v4818_v19, %v6853_v6  ;;  %v6893_v5 = vadd.f32 %v4873_v10, %v3554_v28 }
 0x21d   :  { %v6895_v3 = vadd.f32 %v4876_v27, %v3557_v15  ;;  %v4819_v17 = vpop.f32.mrb[144].mxu1  ;;  %v4877_v50 = vpop.f32.mrb[148].mxu0 }
 0x21e   :  { %v4820_v39 = vpop.f32.mrb[145].mxu1  ;;  %v4878_v7 = vpop.f32.mrb[149].mxu0 }
 0x21f   :  { %v4821_v23 = vadd.f32 %v4820_v39, %v4819_v17  ;;  %v4822_v40 = vpop.f32.mrb[146].mxu1  ;;  %v4879_v37 = vadd.f32 %v4878_v7, %v4877_v50  ;;  %v4880_v59 = vpop.f32.mrb[150].mxu0 }
 0x220   :  { %v4823_v43 = vpop.f32.mrb[147].mxu1  ;;  %v4881_v18 = vpop.f32.mrb[151].mxu0 }
 0x221   :  { %v3562_v45 = vadd.f32 %v4821_v23, %v6857_v62  ;;  %v4824_v38 = vadd.f32 %v4823_v43, %v4822_v40  ;;  %v4882_v44 = vadd.f32 %v4881_v18, %v4880_v59 }
 0x223   :  { %v3565_v6 = vadd.f32 %v4824_v38, %v6859_v63  ;;  %v6899_v33 = vadd.f32 %v4879_v37, %v3562_v45 }
 0x225   :  { %v6901_v0 = vadd.f32 %v4882_v44, %v3565_v6  ;;  %v4825_v52 = vpop.f32.mrb[148].mxu1  ;;  %v4883_v1 = vpop.f32.mrb[152].mxu0 }
 0x226   :  { %v4826_v26 = vpop.f32.mrb[149].mxu1  ;;  %v4884_v34 = vpop.f32.mrb[153].mxu0 }
 0x227   :  { %v4827_v12 = vadd.f32 %v4826_v26, %v4825_v52  ;;  %v4828_v24 = vpop.f32.mrb[150].mxu1  ;;  %v4885_v31 = vadd.f32 %v4884_v34, %v4883_v1  ;;  %v4886_v20 = vpop.f32.mrb[154].mxu0 }
 0x228   :  { %v4829_v25 = vpop.f32.mrb[151].mxu1  ;;  %v4887_v29 = vpop.f32.mrb[155].mxu0 }
 0x229   :  { %v3570_v62 = vadd.f32 %v4827_v12, %v6863_v46  ;;  %v4830_v56 = vadd.f32 %v4829_v25, %v4828_v24  ;;  %v4888_v61 = vadd.f32 %v4887_v29, %v4886_v20 }
 0x22b   :  { %v3573_v63 = vadd.f32 %v4830_v56, %v6865_v48  ;;  %v6905_v11 = vadd.f32 %v4885_v31, %v3570_v62 }
 0x22d   :  { %v6907_v54 = vadd.f32 %v4888_v61, %v3573_v63  ;;  %v4905_v2 = vpop.f32.mrb[152].mxu1  ;;  %v3788_v49 = vpop.f32.mrb[156].mxu0 }
 0x22e   :  { %v4906_v8 = vpop.f32.mrb[153].mxu1  ;;  %v4980_v22 = vpop.f32.mrb[157].mxu0 }
 0x22f   :  { %v4907_v4 = vadd.f32 %v4906_v8, %v4905_v2  ;;  %v4908_v9 = vpop.f32.mrb[154].mxu1  ;;  %v3791_v47 = vpop.f32.mrb[158].mxu0 }
 0x230   :  { %v4909_v35 = vpop.f32.mrb[155].mxu1  ;;  %v4981_v14 = vpop.f32.mrb[159].mxu0 }
 0x231   :  { %v4910_v36 = vadd.f32 %v4909_v35, %v4908_v9  ;;  %v3700_v46 = vadd.f32 %v4907_v4, %v6869_v32 }
 0x233   :  { %v3789_v13 = vadd.f32 %v3788_v49, %v3700_v46  ;;  %v3703_v16 = vadd.f32 %v4910_v36, %v6871_v60 }
 0x235   :  { %v3843_v48 = vmax.f32 %v3789_v13, 0.0  ;;  %v3792_v10 = vadd.f32 %v3791_v47, %v3703_v16  ;;  %v4911_v41 = vpop.f32.mrb[156].mxu1  ;;  %v3796_v21 = vpop.f32.mrb[160].mxu0 }
 0x236   :  { %v4912_v42 = vpop.f32.mrb[157].mxu1  ;;  %v4984_v28 = vpop.f32.mrb[161].mxu0 }
 0x237   :  { %3857 = vst [vmem:[%s6968_s3] sm:$0xff] %v3843_v48  ;;  %v3844_v19 = vmax.f32 %v3792_v10, 0.0  ;;  %v4913_v27 = vadd.f32 %v4912_v42, %v4911_v41  ;;  %v4914_v15 = vpop.f32.mrb[158].mxu1  ;;  %v3799_v17 = vpop.f32.mrb[162].mxu0 }
 0x238   :  { %v4915_v50 = vpop.f32.mrb[159].mxu1  ;;  %v4985_v39 = vpop.f32.mrb[163].mxu0 }
 0x239   :  { %3858 = vst [vmem:[%s6968_s3 + $0x8] sm:$0xff] %v3844_v19  ;;  %v4916_v32 = vadd.f32 %v4915_v50, %v4914_v15  ;;  %v3708_v60 = vadd.f32 %v4913_v27, %v6875_v58 }
 0x23b   :  { %v3797_v7 = vadd.f32 %v3796_v21, %v3708_v60  ;;  %v3711_v23 = vadd.f32 %v4916_v32, %v6877_v57 }
 0x23d   :  { %v3845_v40 = vmax.f32 %v3797_v7, 0.0  ;;  %v3800_v37 = vadd.f32 %v3799_v17, %v3711_v23  ;;  %v4917_v59 = vpop.f32.mrb[160].mxu1  ;;  %v3804_v43 = vpop.f32.mrb[164].mxu0 }
 0x23e   :  { %v4918_v18 = vpop.f32.mrb[161].mxu1  ;;  %v4988_v45 = vpop.f32.mrb[165].mxu0 }
 0x23f   :  { %3859 = vst [vmem:[%s6968_s3 + $0x10] sm:$0xff] %v3845_v40  ;;  %v3846_v38 = vmax.f32 %v3800_v37, 0.0  ;;  %v4919_v44 = vadd.f32 %v4918_v18, %v4917_v59  ;;  %v4920_v6 = vpop.f32.mrb[162].mxu1  ;;  %v3807_v52 = vpop.f32.mrb[166].mxu0 }
 0x240   :  { %v4921_v1 = vpop.f32.mrb[163].mxu1  ;;  %v4989_v26 = vpop.f32.mrb[167].mxu0 }
 0x241   :  { %3860 = vst [vmem:[%s6968_s3 + $0x18] sm:$0xff] %v3846_v38  ;;  %v4922_v58 = vadd.f32 %v4921_v1, %v4920_v6  ;;  %v3716_v57 = vadd.f32 %v4919_v44, %v6881_v51 }
 0x243   :  { %v3805_v34 = vadd.f32 %v3804_v43, %v3716_v57  ;;  %v3719_v12 = vadd.f32 %v4922_v58, %v6883_v53 }
 0x245   :  { %v3847_v24 = vmax.f32 %v3805_v34, 0.0  ;;  %v3808_v31 = vadd.f32 %v3807_v52, %v3719_v12  ;;  %v4923_v20 = vpop.f32.mrb[164].mxu1  ;;  %v3812_v25 = vpop.f32.mrb[168].mxu0 }
 0x246   :  { %v4924_v29 = vpop.f32.mrb[165].mxu1  ;;  %v4992_v62 = vpop.f32.mrb[169].mxu0 }
 0x247   :  { %3861 = vst [vmem:[%s6968_s3 + $0x20] sm:$0xff] %v3847_v24  ;;  %v3848_v56 = vmax.f32 %v3808_v31, 0.0  ;;  %v4925_v61 = vadd.f32 %v4924_v29, %v4923_v20  ;;  %v4926_v63 = vpop.f32.mrb[166].mxu1  ;;  %v3815_v2 = vpop.f32.mrb[170].mxu0 }
 0x248   :  { %v4927_v49 = vpop.f32.mrb[167].mxu1  ;;  %v4993_v8 = vpop.f32.mrb[171].mxu0 }
 0x249   :  { %3862 = vst [vmem:[%s6968_s3 + $0x28] sm:$0xff] %v3848_v56  ;;  %v4928_v51 = vadd.f32 %v4927_v49, %v4926_v63  ;;  %v3724_v53 = vadd.f32 %v4925_v61, %v6887_v30 }
 0x24b   :  { %v3813_v22 = vadd.f32 %v3812_v25, %v3724_v53  ;;  %v3727_v4 = vadd.f32 %v4928_v51, %v6889_v55 }
 0x24d   :  { %v3849_v9 = vmax.f32 %v3813_v22, 0.0  ;;  %v3816_v47 = vadd.f32 %v3815_v2, %v3727_v4  ;;  %v4929_v35 = vpop.f32.mrb[168].mxu1  ;;  %v3820_v14 = vpop.f32.mrb[172].mxu0 }
 0x24e   :  { %v4930_v36 = vpop.f32.mrb[169].mxu1  ;;  %v4996_v46 = vpop.f32.mrb[173].mxu0 }
 0x24f   :  { %3863 = vst [vmem:[%s6968_s3 + $0x30] sm:$0xff] %v3849_v9  ;;  %v3850_v13 = vmax.f32 %v3816_v47, 0.0  ;;  %v4931_v16 = vadd.f32 %v4930_v36, %v4929_v35  ;;  %v4932_v48 = vpop.f32.mrb[170].mxu1  ;;  %v3823_v10 = vpop.f32.mrb[174].mxu0 }
 0x250   :  { %v4933_v41 = vpop.f32.mrb[171].mxu1  ;;  %v4997_v21 = vpop.f32.mrb[175].mxu0 }
 0x251   :  { %3864 = vst [vmem:[%s6968_s3 + $0x38] sm:$0xff] %v3850_v13  ;;  %v4934_v30 = vadd.f32 %v4933_v41, %v4932_v48  ;;  %v3732_v55 = vadd.f32 %v4931_v16, %v6893_v5 }
 0x253   :  { %v3821_v42 = vadd.f32 %v3820_v14, %v3732_v55  ;;  %v3735_v28 = vadd.f32 %v4934_v30, %v6895_v3 }
 0x255   :  { %v3851_v19 = vmax.f32 %v3821_v42, 0.0  ;;  %v3824_v27 = vadd.f32 %v3823_v10, %v3735_v28  ;;  %v4935_v15 = vpop.f32.mrb[172].mxu1  ;;  %v3828_v17 = vpop.f32.mrb[176].mxu0 }
 0x256   :  { %v4936_v50 = vpop.f32.mrb[173].mxu1  ;;  %v5000_v39 = vpop.f32.mrb[177].mxu0 }
 0x257   :  { %3865 = vst [vmem:[%s6968_s3 + $0x40] sm:$0xff] %v3851_v19  ;;  %v3852_v32 = vmax.f32 %v3824_v27, 0.0  ;;  %v4937_v60 = vadd.f32 %v4936_v50, %v4935_v15  ;;  %v4938_v7 = vpop.f32.mrb[174].mxu1  ;;  %v3831_v23 = vpop.f32.mrb[178].mxu0 }
 0x258   :  { %v4939_v40 = vpop.f32.mrb[175].mxu1  ;;  %v5001_v37 = vpop.f32.mrb[179].mxu0 }
 0x259   :  { %3866 = vst [vmem:[%s6968_s3 + $0x48] sm:$0xff] %v3852_v32  ;;  %v4940_v5 = vadd.f32 %v4939_v40, %v4938_v7  ;;  %v3740_v3 = vadd.f32 %v4937_v60, %v6899_v33 }
 0x25b   :  { %v3829_v59 = vadd.f32 %v3828_v17, %v3740_v3  ;;  %v3743_v43 = vadd.f32 %v4940_v5, %v6901_v0 }
 0x25d   :  { %v3853_v18 = vmax.f32 %v3829_v59, 0.0  ;;  %v3832_v45 = vadd.f32 %v3831_v23, %v3743_v43  ;;  %v4941_v38 = vpop.f32.mrb[176].mxu1  ;;  %v3836_v44 = vpop.f32.mrb[180].mxu0 }
 0x25e   :  { %v4942_v6 = vpop.f32.mrb[177].mxu1  ;;  %v5004_v52 = vpop.f32.mrb[181].mxu0 }
 0x25f   :  { %3867 = vst [vmem:[%s6968_s3 + $0x50] sm:$0xff] %v3853_v18  ;;  %v3854_v1 = vmax.f32 %v3832_v45, 0.0  ;;  %v4943_v26 = vadd.f32 %v4942_v6, %v4941_v38  ;;  %v4944_v58 = vpop.f32.mrb[178].mxu1  ;;  %v3839_v57 = vpop.f32.mrb[182].mxu0 }
 0x260   :  { %v4945_v34 = vpop.f32.mrb[179].mxu1  ;;  %v5005_v12 = vpop.f32.mrb[183].mxu0 }
 0x261   :  { %3868 = vst [vmem:[%s6968_s3 + $0x58] sm:$0xff] %v3854_v1  ;;  %v4946_v33 = vadd.f32 %v4945_v34, %v4944_v58  ;;  %v3748_v0 = vadd.f32 %v4943_v26, %v6905_v11 }
 0x263   :  { %v3837_v24 = vadd.f32 %v3836_v44, %v3748_v0  ;;  %v3751_v31 = vadd.f32 %v4946_v33, %v6907_v54 }
 0x265   :  { %v3855_v20 = vmax.f32 %v3837_v24, 0.0  ;;  %v3840_v25 = vadd.f32 %v3839_v57, %v3751_v31 }
 0x267   :  { %3869 = vst [vmem:[%s6968_s3 + $0x60] sm:$0xff] %v3855_v20  ;;  %v3856_v29 = vmax.f32 %v3840_v25, 0.0 }
 0x269   :  { %3870 = vst [vmem:[%s6968_s3 + $0x68] sm:$0xff] %v3856_v29 }

// kernel: autoencoder_forward.10
= control target key start
LH: loop header
LB: loop body
LE: loop exit
PB: predicated region body
PF: predicated region fallthrough
CT: control target
= control target key end

     0   :  { %s1548_s12 = smov 0   ;;  %s1792_s0 = inlined_call_operand.vmem [shape: bf16[512,384], index: 0, kind: input, shape index: {}]   ;;  %s1793_s1 = inlined_call_operand.vmem [shape: bf16[384,128], index: 1, kind: input, shape index: {}]   ;;  %s1794_s2 = inlined_call_operand.vmem [shape: f32[1,128], index: 2, kind: input, shape index: {}]   ;;  %s1795_s3 = inlined_call_operand.vmem [shape: f32[512,128], index: 3, kind: output, shape index: {}]  }
   0x1 LB: > { %s1139_s13 = sadd.s32 4294967295, %s1526_s12   ;;  %p1143_p0 = scmp.ge.s32.totalorder %s1526_s12, 1  ;;  %s1526_s12 = sphi %s1548_s12, %s13_s12  }
   0x2   : > { %p139_p1 = scmp.lt.s32.totalorder %s1526_s12, 3 }
   0x4   : > { %p140_p2 = pnand %p1143_p0, %p139_p1 }
   0x5   : > { %v1432_v0 = vld [vmem:[%s1793_s1 + $0x40] sm:$0xff] (!%p140_p2)   ;;  %s1144_s16 = sshll.u32 (!%p140_p2), %s1139_s13, 5  ;;  %v1434_v2 = vld [vmem:[%s1793_s1 + $0x48] sm:$0xff] (!%p140_p2)   ;;  %v1436_v4 = vld [vmem:[%s1793_s1 + $0x50] sm:$0xff] (!%p140_p2)  }
   0x6   : > { %143 = sbr.rel (%p140_p2) target bundleno = 350 (0x15e), region = 32  ;;  %v1433_v1 = vld [vmem:[%s1793_s1] sm:$0xff] (!%p140_p2)   ;;  %1223 = vmatprep.subr.bf16.mxu0 (!%p140_p2), %v1432_v0  ;;  %1407 = vmatprep.subr.bf16.mxu1 (!%p140_p2), %v1432_v0  ;;  %p165_p3 = scmp.lt.s32.totalorder (!%p140_p2), %s1144_s16, 63  ;;  %v1435_v3 = vld [vmem:[%s1793_s1 + $0x8] sm:$0xff] (!%p140_p2)   ;;  %v1437_v5 = vld [vmem:[%s1793_s1 + $0x10] sm:$0xff] (!%p140_p2)  }
   0x7   : > { %1224 = vmatpush3.bf16.msra.mxu0 (!%p140_p2), %v1433_v1  ;;  %1415 = vmatpush3.bf16.msra.mxu1 (!%p140_p2), %v1433_v1  ;;  %v1438_v6 = vld [vmem:[%s1793_s1 + $0x58] sm:$0xff] (!%p140_p2)   ;;  %v1440_v8 = vld [vmem:[%s1793_s1 + $0x60] sm:$0xff] (!%p140_p2)   ;;  %v1442_v10 = vld [vmem:[%s1793_s1 + $0x68] sm:$0xff] (!%p140_p2)  }
   0x8   : > { %1225 = vmatprep.subr.bf16.mxu0 (!%p140_p2), %v1434_v2  ;;  %1408 = vmatprep.subr.bf16.mxu1 (!%p140_p2), %v1434_v2  ;;  %v1439_v7 = vld [vmem:[%s1793_s1 + $0x18] sm:$0xff] (!%p140_p2)   ;;  %v1441_v9 = vld [vmem:[%s1793_s1 + $0x20] sm:$0xff] (!%p140_p2)   ;;  %v1443_v13 = vld [vmem:[%s1793_s1 + $0x28] sm:$0xff] (!%p140_p2)  }
   0x9   : > { %v1444_v14 = vld [vmem:[%s1793_s1 + $0x70] sm:$0xff] (!%p140_p2)   ;;  %v1446_v16 = vld [vmem:[%s1793_s1 + $0x78] sm:$0xff] (!%p140_p2)   ;;  %v1454_v18 = vld [vmem:[%s1793_s1 + $0x80] sm:$0xff] (!%p140_p2)  }
   0xa   : > { %v1445_v15 = vld [vmem:[%s1793_s1 + $0x30] sm:$0xff] (!%p140_p2)   ;;  %v1447_v17 = vld [vmem:[%s1793_s1 + $0x38] sm:$0xff] (!%p140_p2)   ;;  %v1455_v22 = vld [vmem:[%s1793_s1 + $0x88] sm:$0xff] (!%p140_p2)  }
   0xb   : > { %1226 = vmatpush3.bf16.msra.mxu0 (!%p140_p2), %v1435_v3  ;;  %1416 = vmatpush3.bf16.msra.mxu1 (!%p140_p2), %v1435_v3  ;;  %v1462_v25 = vld [vmem:[%s1793_s1 + $0x90] sm:$0xff] (!%p140_p2)   ;;  %v1463_v27 = vld [vmem:[%s1793_s1 + $0x98] sm:$0xff] (!%p140_p2)   ;;  %v1470_v30 = vld [vmem:[%s1793_s1 + $0xa0] sm:$0xff] (!%p140_p2)  }
   0xc   : > { %1227 = vmatprep.subr.bf16.mxu0 (!%p140_p2), %v1436_v4  ;;  %1409 = vmatprep.subr.bf16.mxu1 (!%p140_p2), %v1436_v4  ;;  %v1471_v33 = vld [vmem:[%s1793_s1 + $0xa8] sm:$0xff] (!%p140_p2)   ;;  %v1478_v36 = vld [vmem:[%s1793_s1 + $0xb0] sm:$0xff] (!%p140_p2)   ;;  %v1479_v40 = vld [vmem:[%s1793_s1 + $0xb8] sm:$0xff] (!%p140_p2)  }
   0xd   : > { %s1797_s16 = smov (!%p165_p3, %s1144_s16), 63 }
   0xe   : > { %s1423_s29 = smul.u32 12, %s1797_s16  ;;  %s1147_s19 = sshll.u32 %s1797_s16, 3 }
   0xf   : > { %1228 = vmatpush3.bf16.msra.mxu0 %v1437_v5  ;;  %1417 = vmatpush3.bf16.msra.mxu1 %v1437_v5  ;;  %s1712_s22 = scalar_lea.vmem %s1795_s3, %s1147_s19 }
  0x10   : > { %1229 = vmatprep.subr.bf16.mxu0 %v1438_v6  ;;  %1410 = vmatprep.subr.bf16.mxu1 %v1438_v6  ;;  %s1589_s9 = scalar_lea.vmem %s1792_s0, %s1423_s29 }
  0x11   : > { %v1450_v11 = vld [vmem:[%s1589_s9 + $0x4] ss:$12 sps:$4 sm:$0xff]   ;;  %v1448_v19 = vld [vmem:[%s1589_s9] ss:$12 sps:$4 sm:$0xff]   ;;  %v1456_v21 = vld [vmem:[%s1589_s9 + $0x1c] ss:$12 sps:$4 sm:$0xff]  }
  0x12   : > { %v1453_v12 = vld [vmem:[%s1589_s9 + $0x124] ss:$12 sps:$4 sm:$0xff]   ;;  %729 = vmatprep.mubr.bf16.mxu0 %v1450_v11  ;;  %v1451_v20 = vld [vmem:[%s1589_s9 + $0x120] ss:$12 sps:$4 sm:$0xff]   ;;  %v1458_v23 = vld [vmem:[%s1589_s9 + $0x13c] ss:$12 sps:$4 sm:$0xff]  }
  0x13   : > { %1230 = vmatpush3.bf16.msra.mxu0 %v1439_v7  ;;  %1418 = vmatpush3.bf16.msra.mxu1 %v1439_v7  ;;  %v1460_v24 = vld [vmem:[%s1589_s9 + $0x18] ss:$12 sps:$4 sm:$0xff]   ;;  %v1464_v28 = vld [vmem:[%s1589_s9 + $0x34] ss:$12 sps:$4 sm:$0xff]   ;;  %v1468_v31 = vld [vmem:[%s1589_s9 + $0x30] ss:$12 sps:$4 sm:$0xff]  }
  0x14   : > { %1231 = vmatprep.subr.bf16.mxu0 %v1440_v8  ;;  %1411 = vmatprep.subr.bf16.mxu1 %v1440_v8  ;;  %v1461_v26 = vld [vmem:[%s1589_s9 + $0x138] ss:$12 sps:$4 sm:$0xff]   ;;  %v1466_v29 = vld [vmem:[%s1589_s9 + $0x154] ss:$12 sps:$4 sm:$0xff]   ;;  %v1469_v32 = vld [vmem:[%s1589_s9 + $0x150] ss:$12 sps:$4 sm:$0xff]  }
  0x15   : > { %825 = vmatprep.mubr.bf16.mxu1 %v1453_v12  ;;  %v1472_v34 = vld [vmem:[%s1589_s9 + $0x4c] ss:$12 sps:$4 sm:$0xff]   ;;  %v1476_v37 = vld [vmem:[%s1589_s9 + $0x48] ss:$12 sps:$4 sm:$0xff]   ;;  %v1480_v39 = vld [vmem:[%s1589_s9 + $0x64] ss:$12 sps:$4 sm:$0xff]  }
  0x16   : > { %v1474_v35 = vld [vmem:[%s1589_s9 + $0x16c] ss:$12 sps:$4 sm:$0xff]   ;;  %v1477_v38 = vld [vmem:[%s1589_s9 + $0x168] ss:$12 sps:$4 sm:$0xff]   ;;  %v1489_v47 = vld [vmem:[%s1589_s9 + $0x50] ss:$12 sps:$4 sm:$0xff]  }
  0x17   : > { %1232 = vmatpush3.bf16.msra.mxu0 %v1441_v9  ;;  %1419 = vmatpush3.bf16.msra.mxu1 %v1441_v9  ;;  %v1482_v41 = vld [vmem:[%s1589_s9 + $0x8] ss:$12 sps:$4 sm:$0xff]   ;;  %v1483_v42 = vld [vmem:[%s1589_s9 + $0x60] ss:$12 sps:$4 sm:$0xff]   ;;  %v1487_v45 = vld [vmem:[%s1589_s9 + $0x38] ss:$12 sps:$4 sm:$0xff]  }
  0x18   : > { %1233 = vmatprep.subr.bf16.mxu0 %v1442_v10  ;;  %1412 = vmatprep.subr.bf16.mxu1 %v1442_v10  ;;  %v1484_v43 = vld [vmem:[%s1589_s9 + $0x20] ss:$12 sps:$4 sm:$0xff]   ;;  %v1485_v44 = vld [vmem:[%s1589_s9 + $0x7c] ss:$12 sps:$4 sm:$0xff]   ;;  %v1488_v46 = vld [vmem:[%s1589_s9 + $0x78] ss:$12 sps:$4 sm:$0xff]  }
  0x19   : > { %v1490_v48 = vld [vmem:[%s1589_s9 + $0x94] ss:$12 sps:$4 sm:$0xff]   ;;  %v1493_v50 = vld [vmem:[%s1589_s9 + $0x90] ss:$12 sps:$4 sm:$0xff]   ;;  %v1495_v52 = vld [vmem:[%s1589_s9 + $0xac] ss:$12 sps:$4 sm:$0xff]  }
  0x1a   : > { %v1492_v49 = vld [vmem:[%s1589_s9 + $0x68] ss:$12 sps:$4 sm:$0xff]   ;;  %v1494_v51 = vld [vmem:[%s1589_s9 + $0x80] ss:$12 sps:$4 sm:$0xff]   ;;  %v1497_v53 = vld [vmem:[%s1589_s9 + $0x98] ss:$12 sps:$4 sm:$0xff]  }
  0x1b   : > { %1234 = vmatpush3.bf16.msra.mxu0 %v1443_v13  ;;  %1420 = vmatpush3.bf16.msra.mxu1 %v1443_v13  ;;  %v1498_v54 = vld [vmem:[%s1589_s9 + $0xa8] ss:$12 sps:$4 sm:$0xff]   ;;  %v1499_v55 = vld [vmem:[%s1589_s9 + $0xb0] ss:$12 sps:$4 sm:$0xff]   ;;  %v1503_v58 = vld [vmem:[%s1589_s9 + $0xc0] ss:$12 sps:$4 sm:$0xff]  }
  0x1c   : > { %1235 = vmatprep.subr.bf16.mxu0 %v1444_v14  ;;  %1413 = vmatprep.subr.bf16.mxu1 %v1444_v14  ;;  %v1500_v56 = vld [vmem:[%s1589_s9 + $0xc4] ss:$12 sps:$4 sm:$0xff]   ;;  %v1502_v57 = vld [vmem:[%s1589_s9 + $0xc8] ss:$12 sps:$4 sm:$0xff]   ;;  %v1504_v59 = vld [vmem:[%s1589_s9 + $0xe0] ss:$12 sps:$4 sm:$0xff]  }
  0x1d   : > { %v1505_v60 = vld [vmem:[%s1589_s9 + $0xdc] ss:$12 sps:$4 sm:$0xff]   ;;  %v1507_v61 = vld [vmem:[%s1589_s9 + $0xf8] ss:$12 sps:$4 sm:$0xff]   ;;  %v1510_v0 = vld [vmem:[%s1589_s9 + $0xf4] ss:$12 sps:$4 sm:$0xff]  }
  0x1e   : > { %v1508_v62 = vld [vmem:[%s1589_s9 + $0xd8] ss:$12 sps:$4 sm:$0xff]   ;;  %v1509_v63 = vld [vmem:[%s1589_s9 + $0x110] ss:$12 sps:$4 sm:$0xff]   ;;  %v1512_v1 = vld [vmem:[%s1589_s9 + $0x128] ss:$12 sps:$4 sm:$0xff]  }
  0x1f   : > { %1236 = vmatpush3.bf16.msra.mxu0 %v1445_v15  ;;  %1421 = vmatpush3.bf16.msra.mxu1 %v1445_v15  ;;  %v1513_v2 = vld [vmem:[%s1589_s9 + $0xf0] ss:$12 sps:$4 sm:$0xff]   ;;  %v1514_v3 = vld [vmem:[%s1589_s9 + $0x140] ss:$12 sps:$4 sm:$0xff]   ;;  %v1517_v5 = vld [vmem:[%s1589_s9 + $0x158] ss:$12 sps:$4 sm:$0xff]  }
  0x20   : > { %1237 = vmatprep.subr.bf16.mxu0 %v1446_v16  ;;  %1414 = vmatprep.subr.bf16.mxu1 %v1446_v16  ;;  %v1515_v4 = vld [vmem:[%s1589_s9 + $0x10c] ss:$12 sps:$4 sm:$0xff]   ;;  %v1518_v6 = vld [vmem:[%s1589_s9 + $0x108] ss:$12 sps:$4 sm:$0xff]   ;;  %v1519_v7 = vld [vmem:[%s1589_s9 + $0x170] ss:$12 sps:$4 sm:$0xff]  }
  0x23   : > { %1238 = vmatpush3.bf16.msra.mxu0 %v1447_v17  ;;  %1422 = vmatpush3.bf16.msra.mxu1 %v1447_v17 }
  0x24   : > { %1359 = vmatprep.subr.bf16.mxu1 %v1454_v18 }
  0x26   : > { %730 = vmatmul.mubr.bf16.vlgmr.msra.gmra.mrb[0].mxu0 %v1448_v19  ;;  %826 = vmatmul.mubr.bf16.vlgmr.msra.gmra.mrb[0].mxu1 %v1451_v20 }
  0x27   : > { %1360 = vmatpush3.bf16.msra.mxu1 %v1454_v18  ;;  %737 = vmatprep.mubr.bf16.mxu0 %v1456_v21 }
  0x28   : > { %1361 = vmatprep.subr.bf16.mxu1 %v1455_v22  ;;  %833 = vmatprep.mubr.bf16.mxu1 %v1458_v23 }
  0x2b   : > { %1362 = vmatpush3.bf16.msra.mxu1 %v1455_v22 }
  0x2c   : > { %1363 = vmatprep.subr.bf16.mxu1 %v1462_v25 }
  0x2e   : > { %738 = vmatmul.mubr.bf16.gmra.mrb[4].mxu0 %v1460_v24  ;;  %834 = vmatmul.mubr.bf16.gmra.mrb[4].mxu1 %v1461_v26 }
  0x2f   : > { %1364 = vmatpush3.bf16.msra.mxu1 %v1462_v25  ;;  %745 = vmatprep.mubr.bf16.mxu0 %v1464_v28 }
  0x30   : > { %1365 = vmatprep.subr.bf16.mxu1 %v1463_v27  ;;  %841 = vmatprep.mubr.bf16.mxu1 %v1466_v29 }
  0x33   : > { %1366 = vmatpush3.bf16.msra.mxu1 %v1463_v27 }
  0x34   : > { %1367 = vmatprep.subr.bf16.mxu1 %v1470_v30 }
  0x36   : > { %746 = vmatmul.mubr.bf16.gmra.mrb[8].mxu0 %v1468_v31  ;;  %842 = vmatmul.mubr.bf16.gmra.mrb[8].mxu1 %v1469_v32 }
  0x37   : > { %1368 = vmatpush3.bf16.msra.mxu1 %v1470_v30  ;;  %753 = vmatprep.mubr.bf16.mxu0 %v1472_v34 }
  0x38   : > { %1369 = vmatprep.subr.bf16.mxu1 %v1471_v33  ;;  %849 = vmatprep.mubr.bf16.mxu1 %v1474_v35 }
  0x3b   : > { %1370 = vmatpush3.bf16.msra.mxu1 %v1471_v33 }
  0x3c   : > { %1371 = vmatprep.subr.bf16.mxu1 %v1478_v36 }
  0x3e   : > { %754 = vmatmul.mubr.bf16.gmra.mrb[12].mxu0 %v1476_v37  ;;  %850 = vmatmul.mubr.bf16.gmra.mrb[12].mxu1 %v1477_v38 }
  0x3f   : > { %1372 = vmatpush3.bf16.msra.mxu1 %v1478_v36  ;;  %761 = vmatprep.mubr.bf16.mxu0 %v1480_v39 }
  0x40   : > { %1373 = vmatprep.subr.bf16.mxu1 %v1479_v40  ;;  %1375 = vmatprep.mubr.bf16.mxu1 %v1482_v41 }
  0x43   : > { %1374 = vmatpush3.bf16.msra.mxu1 %v1479_v40 }
  0x46   : > { %762 = vmatmul.mubr.bf16.gmra.mrb[16].mxu0 %v1483_v42  ;;  %1376 = vmatmul.mubr.bf16.vlgmr.msra.gmra.mrb[16].mxu1 %v1484_v43 }
  0x47   : > { %769 = vmatprep.mubr.bf16.mxu0 %v1485_v44  ;;  %1379 = vmatprep.mubr.bf16.mxu1 %v1487_v45 }
  0x4e   : > { %770 = vmatmul.mubr.bf16.gmra.mrb[20].mxu0 %v1488_v46  ;;  %1380 = vmatmul.mubr.bf16.gmra.mrb[20].mxu1 %v1489_v47 }
  0x4f   : > { %777 = vmatprep.mubr.bf16.mxu0 %v1490_v48  ;;  %1383 = vmatprep.mubr.bf16.mxu1 %v1492_v49 }
  0x56   : > { %778 = vmatmul.mubr.bf16.gmra.mrb[24].mxu0 %v1493_v50  ;;  %1384 = vmatmul.mubr.bf16.gmra.mrb[24].mxu1 %v1494_v51 }
  0x57   : > { %785 = vmatprep.mubr.bf16.mxu0 %v1495_v52  ;;  %1387 = vmatprep.mubr.bf16.mxu1 %v1497_v53 }
  0x5e   : > { %786 = vmatmul.mubr.bf16.gmra.mrb[28].mxu0 %v1498_v54  ;;  %1388 = vmatmul.mubr.bf16.gmra.mrb[28].mxu1 %v1499_v55 }
  0x5f   : > { %793 = vmatprep.mubr.bf16.mxu0 %v1500_v56  ;;  %1391 = vmatprep.mubr.bf16.mxu1 %v1502_v57  ;;  %v1703_v56 = vld [vmem:[%s1794_s2] ss:$0 sm:$0xff] }
  0x66   : > { %794 = vmatmul.mubr.bf16.gmra.mrb[32].mxu0 %v1503_v58  ;;  %1392 = vmatmul.mubr.bf16.gmra.mrb[32].mxu1 %v1504_v59 }
  0x67   : > { %801 = vmatprep.mubr.bf16.mxu0 %v1505_v60  ;;  %1395 = vmatprep.mubr.bf16.mxu1 %v1507_v61 }
  0x6e   : > { %802 = vmatmul.mubr.bf16.gmra.mrb[36].mxu0 %v1508_v62  ;;  %1396 = vmatmul.mubr.bf16.gmra.mrb[36].mxu1 %v1509_v63 }
  0x6f   : > { %809 = vmatprep.mubr.bf16.mxu0 %v1510_v0  ;;  %1399 = vmatprep.mubr.bf16.mxu1 %v1512_v1 }
  0x76   : > { %810 = vmatmul.mubr.bf16.gmra.mrb[40].mxu0 %v1513_v2  ;;  %1400 = vmatmul.mubr.bf16.gmra.mrb[40].mxu1 %v1514_v3 }
  0x77   : > { %817 = vmatprep.mubr.bf16.mxu0 %v1515_v4  ;;  %1403 = vmatprep.mubr.bf16.mxu1 %v1517_v5 }
  0x7e   : > { %818 = vmatmul.mubr.bf16.gmra.mrb[44].mxu0 %v1518_v6  ;;  %1404 = vmatmul.mubr.bf16.gmra.mrb[44].mxu1 %v1519_v7 }
  0xf9   : > { %v1239_v8 = vpop.f32.mrb[0].mxu0  ;;  %v1311_v9 = vpop.f32.mrb[0].mxu1 }
  0xfa   : > { %v1240_v10 = vpop.f32.mrb[1].mxu0  ;;  %v1312_v11 = vpop.f32.mrb[1].mxu1 }
  0xfb   : > { %v1241_v12 = vadd.f32 %v1240_v10, %v1239_v8  ;;  %v1242_v13 = vpop.f32.mrb[2].mxu0  ;;  %v1684_v14 = vadd.f32 %v1312_v11, %v1311_v9  ;;  %v1314_v15 = vpop.f32.mrb[2].mxu1 }
  0xfc   : > { %v1243_v16 = vpop.f32.mrb[3].mxu0  ;;  %v1315_v17 = vpop.f32.mrb[3].mxu1 }
  0xfd   : > { %v1244_v18 = vadd.f32 %v1243_v16, %v1242_v13  ;;  %v1686_v19 = vadd.f32 %v1315_v17, %v1314_v15  ;;  %v732_v60 = vadd.f32 %v1241_v12, %v1703_v56 }
  0xff   : > { %v735_v5 = vadd.f32 %v1244_v18, %v1703_v56 }
 0x101   : > { %v1245_v20 = vpop.f32.mrb[4].mxu0  ;;  %v1317_v21 = vpop.f32.mrb[4].mxu1 }
 0x102   : > { %v1246_v22 = vpop.f32.mrb[5].mxu0  ;;  %v1318_v23 = vpop.f32.mrb[5].mxu1 }
 0x103   : > { %v1247_v24 = vadd.f32 %v1246_v22, %v1245_v20  ;;  %v1248_v25 = vpop.f32.mrb[6].mxu0  ;;  %v1688_v26 = vadd.f32 %v1318_v23, %v1317_v21  ;;  %v1320_v27 = vpop.f32.mrb[6].mxu1 }
 0x104   : > { %v1249_v28 = vpop.f32.mrb[7].mxu0  ;;  %v1321_v29 = vpop.f32.mrb[7].mxu1 }
 0x105   : > { %v1250_v30 = vadd.f32 %v1249_v28, %v1248_v25  ;;  %v1690_v31 = vadd.f32 %v1321_v29, %v1320_v27  ;;  %v740_v57 = vadd.f32 %v1247_v24, %v1703_v56 }
 0x107   : > { %v743_v0 = vadd.f32 %v1250_v30, %v1703_v56 }
 0x109   : > { %v1251_v32 = vpop.f32.mrb[8].mxu0  ;;  %v1323_v33 = vpop.f32.mrb[8].mxu1 }
 0x10a   : > { %v1252_v34 = vpop.f32.mrb[9].mxu0  ;;  %v1324_v35 = vpop.f32.mrb[9].mxu1 }
 0x10b   : > { %v1253_v36 = vadd.f32 %v1252_v34, %v1251_v32  ;;  %v1254_v37 = vpop.f32.mrb[10].mxu0  ;;  %v1692_v38 = vadd.f32 %v1324_v35, %v1323_v33  ;;  %v1326_v39 = vpop.f32.mrb[10].mxu1 }
 0x10c   : > { %v1255_v40 = vpop.f32.mrb[11].mxu0  ;;  %v1327_v41 = vpop.f32.mrb[11].mxu1 }
 0x10d   : > { %v1256_v42 = vadd.f32 %v1255_v40, %v1254_v37  ;;  %v1694_v43 = vadd.f32 %v1327_v41, %v1326_v39  ;;  %v748_v21 = vadd.f32 %v1253_v36, %v1703_v56 }
 0x10f   : > { %v751_v30 = vadd.f32 %v1256_v42, %v1703_v56 }
 0x111   : > { %v1257_v44 = vpop.f32.mrb[12].mxu0  ;;  %v1329_v45 = vpop.f32.mrb[12].mxu1 }
 0x112   : > { %v1258_v46 = vpop.f32.mrb[13].mxu0  ;;  %v1330_v47 = vpop.f32.mrb[13].mxu1 }
 0x113   : > { %v1259_v48 = vadd.f32 %v1258_v46, %v1257_v44  ;;  %v1260_v49 = vpop.f32.mrb[14].mxu0  ;;  %v1696_v50 = vadd.f32 %v1330_v47, %v1329_v45  ;;  %v1332_v51 = vpop.f32.mrb[14].mxu1 }
 0x114   : > { %v1261_v52 = vpop.f32.mrb[15].mxu0  ;;  %v1333_v53 = vpop.f32.mrb[15].mxu1 }
 0x115   : > { %v1262_v54 = vadd.f32 %v1261_v52, %v1260_v49  ;;  %v1698_v55 = vadd.f32 %v1333_v53, %v1332_v51  ;;  %v756_v16 = vadd.f32 %v1259_v48, %v1703_v56 }
 0x117   : > { %v759_v24 = vadd.f32 %v1262_v54, %v1703_v56 }
 0x119   : > { %v1263_v58 = vpop.f32.mrb[16].mxu0  ;;  %v1377_v59 = vpop.f32.mrb[16].mxu1 }
 0x11a   : > { %v901_v61 = vadd.f32 %v1377_v59, %v740_v57  ;;  %v1264_v62 = vpop.f32.mrb[17].mxu0  ;;  %v892_v63 = vpop.f32.mrb[17].mxu1 }
 0x11b   : > { %v1265_v1 = vadd.f32 %v1264_v62, %v1263_v58  ;;  %v893_v2 = vadd.f32 %v892_v63, %v732_v60  ;;  %v1266_v3 = vpop.f32.mrb[18].mxu0  ;;  %v1378_v4 = vpop.f32.mrb[18].mxu1 }
 0x11c   : > { %v1021_v6 = vmax.f32 %v901_v61, 0.0  ;;  %v904_v7 = vadd.f32 %v1378_v4, %v743_v0  ;;  %v1267_v8 = vpop.f32.mrb[19].mxu0  ;;  %v895_v9 = vpop.f32.mrb[19].mxu1 }
 0x11d   : > { %v1019_v10 = vmax.f32 %v893_v2, 0.0  ;;  %v1268_v11 = vadd.f32 %v1267_v8, %v1266_v3  ;;  %v896_v12 = vadd.f32 %v895_v9, %v735_v5  ;;  %v764_v47 = vadd.f32 %v1265_v1, %v1703_v56 }
 0x11e   : > { %1053 = vst [vmem:[%s1712_s22 + $0x10] sm:$0xff] %v1021_v6  ;;  %v1022_v13 = vmax.f32 %v904_v7, 0.0 }
 0x11f   : > { %1051 = vst [vmem:[%s1712_s22] sm:$0xff] %v1019_v10  ;;  %v1020_v15 = vmax.f32 %v896_v12, 0.0  ;;  %v767_v58 = vadd.f32 %v1268_v11, %v1703_v56 }
 0x120   : > { %1054 = vst [vmem:[%s1712_s22 + $0x18] sm:$0xff] %v1022_v13 }
 0x121   : > { %1052 = vst [vmem:[%s1712_s22 + $0x8] sm:$0xff] %v1020_v15  ;;  %v1269_v17 = vpop.f32.mrb[20].mxu0  ;;  %v1381_v20 = vpop.f32.mrb[20].mxu1 }
 0x122   : > { %v917_v18 = vadd.f32 %v1381_v20, %v756_v16  ;;  %v1270_v22 = vpop.f32.mrb[21].mxu0  ;;  %v908_v23 = vpop.f32.mrb[21].mxu1 }
 0x123   : > { %v1271_v25 = vadd.f32 %v1270_v22, %v1269_v17  ;;  %v909_v27 = vadd.f32 %v908_v23, %v748_v21  ;;  %v1272_v28 = vpop.f32.mrb[22].mxu0  ;;  %v1382_v29 = vpop.f32.mrb[22].mxu1 }
 0x124   : > { %v1025_v32 = vmax.f32 %v917_v18, 0.0  ;;  %v920_v33 = vadd.f32 %v1382_v29, %v759_v24  ;;  %v1273_v34 = vpop.f32.mrb[23].mxu0  ;;  %v911_v35 = vpop.f32.mrb[23].mxu1 }
 0x125   : > { %v1023_v36 = vmax.f32 %v909_v27, 0.0  ;;  %v1274_v37 = vadd.f32 %v1273_v34, %v1272_v28  ;;  %v912_v39 = vadd.f32 %v911_v35, %v751_v30  ;;  %v772_v44 = vadd.f32 %v1271_v25, %v1703_v56 }
 0x126   : > { %1057 = vst [vmem:[%s1712_s22 + $0x30] sm:$0xff] %v1025_v32  ;;  %v1026_v40 = vmax.f32 %v920_v33, 0.0 }
 0x127   : > { %1055 = vst [vmem:[%s1712_s22 + $0x20] sm:$0xff] %v1023_v36  ;;  %v1024_v41 = vmax.f32 %v912_v39, 0.0  ;;  %v775_v51 = vadd.f32 %v1274_v37, %v1703_v56 }
 0x128   : > { %1058 = vst [vmem:[%s1712_s22 + $0x38] sm:$0xff] %v1026_v40 }
 0x129   : > { %1056 = vst [vmem:[%s1712_s22 + $0x28] sm:$0xff] %v1024_v41  ;;  %v1275_v45 = vpop.f32.mrb[24].mxu0  ;;  %v1385_v46 = vpop.f32.mrb[24].mxu1 }
 0x12a   : > { %v933_v42 = vadd.f32 %v1385_v46, %v772_v44  ;;  %v1276_v48 = vpop.f32.mrb[25].mxu0  ;;  %v924_v49 = vpop.f32.mrb[25].mxu1 }
 0x12b   : > { %v1277_v52 = vadd.f32 %v1276_v48, %v1275_v45  ;;  %v925_v53 = vadd.f32 %v924_v49, %v764_v47  ;;  %v1278_v54 = vpop.f32.mrb[26].mxu0  ;;  %v1386_v57 = vpop.f32.mrb[26].mxu1 }
 0x12c   : > { %v1029_v59 = vmax.f32 %v933_v42, 0.0  ;;  %v936_v60 = vadd.f32 %v1386_v57, %v775_v51  ;;  %v1279_v61 = vpop.f32.mrb[27].mxu0  ;;  %v927_v62 = vpop.f32.mrb[27].mxu1 }
 0x12d   : > { %v1027_v63 = vmax.f32 %v925_v53, 0.0  ;;  %v1280_v0 = vadd.f32 %v1279_v61, %v1278_v54  ;;  %v928_v1 = vadd.f32 %v927_v62, %v767_v58  ;;  %v780_v6 = vadd.f32 %v1277_v52, %v1703_v56 }
 0x12e   : > { %1061 = vst [vmem:[%s1712_s22 + $0x50] sm:$0xff] %v1029_v59  ;;  %v1030_v2 = vmax.f32 %v936_v60, 0.0 }
 0x12f   : > { %1059 = vst [vmem:[%s1712_s22 + $0x40] sm:$0xff] %v1027_v63  ;;  %v1028_v3 = vmax.f32 %v928_v1, 0.0  ;;  %v783_v13 = vadd.f32 %v1280_v0, %v1703_v56  ;;  %v836_v0 = vadd.f32 %v1688_v26, %v1703_v56 }
 0x130   : > { %1062 = vst [vmem:[%s1712_s22 + $0x58] sm:$0xff] %v1030_v2 }
 0x131   : > { %1060 = vst [vmem:[%s1712_s22 + $0x48] sm:$0xff] %v1028_v3  ;;  %v1281_v4 = vpop.f32.mrb[28].mxu0  ;;  %v1389_v5 = vpop.f32.mrb[28].mxu1 }
 0x132   : > { %v1282_v7 = vpop.f32.mrb[29].mxu0  ;;  %v940_v8 = vpop.f32.mrb[29].mxu1 }
 0x133   : > { %v1283_v9 = vadd.f32 %v1282_v7, %v1281_v4  ;;  %v941_v10 = vadd.f32 %v940_v8, %v780_v6  ;;  %v1284_v11 = vpop.f32.mrb[30].mxu0  ;;  %v1390_v12 = vpop.f32.mrb[30].mxu1 }
 0x134   : > { %v1285_v15 = vpop.f32.mrb[31].mxu0  ;;  %v943_v16 = vpop.f32.mrb[31].mxu1 }
 0x135   : > { %v788_v17 = vadd.f32 %v1283_v9, %v1703_v56  ;;  %v1031_v20 = vmax.f32 %v941_v10, 0.0  ;;  %v1286_v21 = vadd.f32 %v1285_v15, %v1284_v11  ;;  %v944_v18 = vadd.f32 %v943_v16, %v783_v13 }
 0x136   : > { %v839_v9 = vadd.f32 %v1690_v31, %v1703_v56  ;;  %v831_v15 = vadd.f32 %v1686_v19, %v1703_v56 }
 0x137   : > { %v949_v22 = vadd.f32 %v1389_v5, %v788_v17  ;;  %1063 = vst [vmem:[%s1712_s22 + $0x60] sm:$0xff] %v1031_v20  ;;  %v791_v23 = vadd.f32 %v1286_v21, %v1703_v56  ;;  %v1032_v24 = vmax.f32 %v944_v18, 0.0  ;;  %v828_v5 = vadd.f32 %v1684_v14, %v1703_v56 }
 0x139   : > { %v1033_v25 = vmax.f32 %v949_v22, 0.0  ;;  %v952_v27 = vadd.f32 %v1390_v12, %v791_v23  ;;  %1064 = vst [vmem:[%s1712_s22 + $0x68] sm:$0xff] %v1032_v24  ;;  %v1287_v28 = vpop.f32.mrb[32].mxu0  ;;  %v1393_v29 = vpop.f32.mrb[32].mxu1 }
 0x13a   : > { %v1288_v30 = vpop.f32.mrb[33].mxu0  ;;  %v956_v32 = vpop.f32.mrb[33].mxu1 }
 0x13b   : > { %1065 = vst [vmem:[%s1712_s22 + $0x70] sm:$0xff] %v1033_v25  ;;  %v1034_v33 = vmax.f32 %v952_v27, 0.0  ;;  %v1289_v34 = vadd.f32 %v1288_v30, %v1287_v28  ;;  %v1290_v35 = vpop.f32.mrb[34].mxu0  ;;  %v1394_v36 = vpop.f32.mrb[34].mxu1  ;;  %v852_v27 = vadd.f32 %v1696_v50, %v1703_v56 }
 0x13c   : > { %v1291_v37 = vpop.f32.mrb[35].mxu0  ;;  %v959_v39 = vpop.f32.mrb[35].mxu1 }
 0x13d   : > { %1066 = vst [vmem:[%s1712_s22 + $0x78] sm:$0xff] %v1034_v33  ;;  %v796_v40 = vadd.f32 %v1289_v34, %v1703_v56  ;;  %v1292_v41 = vadd.f32 %v1291_v37, %v1290_v35  ;;  %v844_v33 = vadd.f32 %v1692_v38, %v1703_v56  ;;  %v855_v37 = vadd.f32 %v1698_v55, %v1703_v56 }
 0x13f   : > { %v957_v44 = vadd.f32 %v956_v32, %v796_v40  ;;  %v799_v45 = vadd.f32 %v1292_v41, %v1703_v56 }
 0x141   : > { %v1035_v46 = vmax.f32 %v957_v44, 0.0  ;;  %v960_v47 = vadd.f32 %v959_v39, %v799_v45  ;;  %v1293_v42 = vpop.f32.mrb[36].mxu0  ;;  %v1745_v48 = vpop.f32.mrb[36].mxu1  ;;  %v847_v45 = vadd.f32 %v1694_v43, %v1703_v56 }
 0x142   : > { %v1294_v49 = vpop.f32.mrb[37].mxu0  ;;  %v972_v51 = vpop.f32.mrb[37].mxu1 }
 0x143   : > { %1067 = vst [vmem:[%s1712_s22 + $0x80] sm:$0xff] %v1035_v46  ;;  %v1036_v52 = vmax.f32 %v960_v47, 0.0  ;;  %v1295_v53 = vadd.f32 %v1294_v49, %v1293_v42  ;;  %v1296_v54 = vpop.f32.mrb[38].mxu0  ;;  %v1748_v57 = vpop.f32.mrb[38].mxu1 }
 0x144   : > { %v1297_v58 = vpop.f32.mrb[39].mxu0  ;;  %v975_v59 = vpop.f32.mrb[39].mxu1 }
 0x145   : > { %1068 = vst [vmem:[%s1712_s22 + $0x88] sm:$0xff] %v1036_v52  ;;  %v804_v60 = vadd.f32 %v1295_v53, %v1703_v56  ;;  %v1298_v61 = vadd.f32 %v1297_v58, %v1296_v54 }
 0x147   : > { %v965_v62 = vadd.f32 %v1393_v29, %v804_v60  ;;  %v807_v63 = vadd.f32 %v1298_v61, %v1703_v56 }
 0x149   : > { %v1037_v1 = vmax.f32 %v965_v62, 0.0  ;;  %v968_v2 = vadd.f32 %v1394_v36, %v807_v63  ;;  %v1299_v3 = vpop.f32.mrb[40].mxu0  ;;  %v1401_v4 = vpop.f32.mrb[40].mxu1 }
 0x14a   : > { %v997_v6 = vadd.f32 %v1401_v4, %v836_v0  ;;  %v1300_v7 = vpop.f32.mrb[41].mxu0  ;;  %v988_v8 = vpop.f32.mrb[41].mxu1 }
 0x14b   : > { %1069 = vst [vmem:[%s1712_s22 + $0x90] sm:$0xff] %v1037_v1  ;;  %v1038_v10 = vmax.f32 %v968_v2, 0.0  ;;  %v1301_v11 = vadd.f32 %v1300_v7, %v1299_v3  ;;  %v989_v12 = vadd.f32 %v988_v8, %v828_v5  ;;  %v1302_v26 = vpop.f32.mrb[42].mxu0  ;;  %v1402_v13 = vpop.f32.mrb[42].mxu1 }
 0x14c   : > { %v1045_v14 = vmax.f32 %v997_v6, 0.0  ;;  %v1000_v16 = vadd.f32 %v1402_v13, %v839_v9  ;;  %v1303_v17 = vpop.f32.mrb[43].mxu0  ;;  %v991_v20 = vpop.f32.mrb[43].mxu1 }
 0x14d   : > { %1070 = vst [vmem:[%s1712_s22 + $0x98] sm:$0xff] %v1038_v10  ;;  %v812_v31 = vadd.f32 %v1301_v11, %v1703_v56  ;;  %v1043_v21 = vmax.f32 %v989_v12, 0.0  ;;  %v1304_v18 = vadd.f32 %v1303_v17, %v1302_v26  ;;  %v992_v22 = vadd.f32 %v991_v20, %v831_v15 }
 0x14e   : > { %1077 = vst [vmem:[%s1712_s22 + $0xd0] sm:$0xff] %v1045_v14  ;;  %v1046_v23 = vmax.f32 %v1000_v16, 0.0 }
 0x14f   : > { %v973_v24 = vadd.f32 %v972_v51, %v812_v31  ;;  %1075 = vst [vmem:[%s1712_s22 + $0xc0] sm:$0xff] %v1043_v21  ;;  %v815_v25 = vadd.f32 %v1304_v18, %v1703_v56  ;;  %v1044_v19 = vmax.f32 %v992_v22, 0.0 }
 0x150   : > { %1078 = vst [vmem:[%s1712_s22 + $0xd8] sm:$0xff] %v1046_v23 }
 0x151   : > { %v1039_v28 = vmax.f32 %v973_v24, 0.0  ;;  %v976_v29 = vadd.f32 %v975_v59, %v815_v25  ;;  %1076 = vst [vmem:[%s1712_s22 + $0xc8] sm:$0xff] %v1044_v19  ;;  %v1305_v30 = vpop.f32.mrb[44].mxu0  ;;  %v1405_v32 = vpop.f32.mrb[44].mxu1 }
 0x152   : > { %v1013_v34 = vadd.f32 %v1405_v32, %v852_v27  ;;  %v1306_v35 = vpop.f32.mrb[45].mxu0  ;;  %v1004_v36 = vpop.f32.mrb[45].mxu1 }
 0x153   : > { %1071 = vst [vmem:[%s1712_s22 + $0xa0] sm:$0xff] %v1039_v28  ;;  %v1040_v39 = vmax.f32 %v976_v29, 0.0  ;;  %v1307_v40 = vadd.f32 %v1306_v35, %v1305_v30  ;;  %v1005_v50 = vadd.f32 %v1004_v36, %v844_v33  ;;  %v1308_v41 = vpop.f32.mrb[46].mxu0  ;;  %v1406_v44 = vpop.f32.mrb[46].mxu1 }
 0x154   : > { %v1049_v38 = vmax.f32 %v1013_v34, 0.0  ;;  %v1016_v46 = vadd.f32 %v1406_v44, %v855_v37  ;;  %v1309_v47 = vpop.f32.mrb[47].mxu0  ;;  %v1007_v42 = vpop.f32.mrb[47].mxu1 }
 0x155   : > { %1072 = vst [vmem:[%s1712_s22 + $0xa8] sm:$0xff] %v1040_v39  ;;  %v820_v55 = vadd.f32 %v1307_v40, %v1703_v56  ;;  %v1047_v49 = vmax.f32 %v1005_v50, 0.0  ;;  %v1310_v51 = vadd.f32 %v1309_v47, %v1308_v41  ;;  %v1008_v52 = vadd.f32 %v1007_v42, %v847_v45 }
 0x156   : > { %1081 = vst [vmem:[%s1712_s22 + $0xf0] sm:$0xff] %v1049_v38  ;;  %v1050_v53 = vmax.f32 %v1016_v46, 0.0 }
 0x157   : > { %v981_v54 = vadd.f32 %v1745_v48, %v820_v55  ;;  %1079 = vst [vmem:[%s1712_s22 + $0xe0] sm:$0xff] %v1047_v49  ;;  %v823_v43 = vadd.f32 %v1310_v51, %v1703_v56  ;;  %v1048_v58 = vmax.f32 %v1008_v52, 0.0 }
 0x158   : > { %1082 = vst [vmem:[%s1712_s22 + $0xf8] sm:$0xff] %v1050_v53 }
 0x159   : > { %v1041_v59 = vmax.f32 %v981_v54, 0.0  ;;  %v984_v60 = vadd.f32 %v1748_v57, %v823_v43  ;;  %1080 = vst [vmem:[%s1712_s22 + $0xe8] sm:$0xff] %v1048_v58 }
 0x15b   : > { %1073 = vst [vmem:[%s1712_s22 + $0xb0] sm:$0xff] %v1041_v59  ;;  %v1042_v61 = vmax.f32 %v984_v60, 0.0 }
 0x15d   : > { %1074 = vst [vmem:[%s1712_s22 + $0xb8] sm:$0xff] %v1042_v61 }
 0x15e PF: > { %s13_s12 = sadd.s32 1, %s1526_s12  }
 0x15f   : > { %p10_p4 = scmp.ge.s32.totalorder %s13_s12, 4  }
 0x161   :  { %12 = sbr.rel (!%p10_p4) target bundleno = 1 (0x1), region = 62 }

// kernel: autoencoder_forward.11
= control target key start
LH: loop header
LB: loop body
LE: loop exit
PB: predicated region body
PF: predicated region fallthrough
CT: control target
= control target key end

     0   :  { %s1140_s12 = smov 0   ;;  %s1317_s0 = inlined_call_operand.vmem [shape: bf16[1792,256], index: 0, kind: input, shape index: {}]   ;;  %s1318_s1 = inlined_call_operand.vmem [shape: bf16[256,128], index: 1, kind: input, shape index: {}]   ;;  %s1319_s2 = inlined_call_operand.vmem [shape: f32[1,128], index: 2, kind: input, shape index: {}]   ;;  %s1320_s3 = inlined_call_operand.vmem [shape: f32[1792,128], index: 3, kind: output, shape index: {}]  }
   0x1 LB: > { %s786_s13 = sadd.s32 4294967295, %s1118_s12   ;;  %p790_p0 = scmp.ge.s32.totalorder %s1118_s12, 1  ;;  %s1118_s12 = sphi %s1140_s12, %s13_s12  }
   0x2   : > { %p139_p1 = scmp.lt.s32.totalorder %s1118_s12, 8 }
   0x4   : > { %p140_p2 = pnand %p790_p0, %p139_p1 }
   0x5   : > { %v984_v0 = vld [vmem:[%s1318_s1 + $0x40] sm:$0xff] (!%p140_p2)   ;;  %s791_s16 = sshll.u32 (!%p140_p2), %s786_s13, 5  ;;  %v986_v2 = vld [vmem:[%s1318_s1 + $0x48] sm:$0xff] (!%p140_p2)   ;;  %v988_v4 = vld [vmem:[%s1318_s1 + $0x50] sm:$0xff] (!%p140_p2)  }
   0x6   : > { %143 = sbr.rel (%p140_p2) target bundleno = 328 (0x148), region = 32  ;;  %v985_v1 = vld [vmem:[%s1318_s1] sm:$0xff] (!%p140_p2)   ;;  %848 = vmatprep.subr.bf16.mxu0 (!%p140_p2), %v984_v0  ;;  %960 = vmatprep.subr.bf16.mxu1 (!%p140_p2), %v984_v0  ;;  %v987_v3 = vld [vmem:[%s1318_s1 + $0x8] sm:$0xff] (!%p140_p2)   ;;  %p165_p3 = scmp.lt.s32.totalorder (!%p140_p2), %s791_s16, 223  ;;  %v989_v5 = vld [vmem:[%s1318_s1 + $0x10] sm:$0xff] (!%p140_p2)  }
   0x7   : > { %849 = vmatpush3.bf16.msra.mxu0 (!%p140_p2), %v985_v1  ;;  %968 = vmatpush3.bf16.msra.mxu1 (!%p140_p2), %v985_v1  ;;  %v990_v6 = vld [vmem:[%s1318_s1 + $0x58] sm:$0xff] (!%p140_p2)   ;;  %v992_v8 = vld [vmem:[%s1318_s1 + $0x60] sm:$0xff] (!%p140_p2)   ;;  %v994_v10 = vld [vmem:[%s1318_s1 + $0x68] sm:$0xff] (!%p140_p2)  }
   0x8   : > { %850 = vmatprep.subr.bf16.mxu0 (!%p140_p2), %v986_v2  ;;  %961 = vmatprep.subr.bf16.mxu1 (!%p140_p2), %v986_v2  ;;  %v991_v7 = vld [vmem:[%s1318_s1 + $0x18] sm:$0xff] (!%p140_p2)   ;;  %v993_v9 = vld [vmem:[%s1318_s1 + $0x20] sm:$0xff] (!%p140_p2)   ;;  %v995_v13 = vld [vmem:[%s1318_s1 + $0x28] sm:$0xff] (!%p140_p2)  }
   0x9   : > { %v996_v14 = vld [vmem:[%s1318_s1 + $0x70] sm:$0xff] (!%p140_p2)   ;;  %v998_v16 = vld [vmem:[%s1318_s1 + $0x78] sm:$0xff] (!%p140_p2)   ;;  %v1241_v50 = vld [vmem:[%s1319_s2] ss:$0 sm:$0xff] (!%p140_p2) }
   0xa   : > { %v997_v15 = vld [vmem:[%s1318_s1 + $0x30] sm:$0xff] (!%p140_p2)   ;;  %v999_v17 = vld [vmem:[%s1318_s1 + $0x38] sm:$0xff] (!%p140_p2)  }
   0xb   : > { %851 = vmatpush3.bf16.msra.mxu0 (!%p140_p2), %v987_v3  ;;  %969 = vmatpush3.bf16.msra.mxu1 (!%p140_p2), %v987_v3 }
   0xc   : > { %852 = vmatprep.subr.bf16.mxu0 (!%p140_p2), %v988_v4  ;;  %962 = vmatprep.subr.bf16.mxu1 (!%p140_p2), %v988_v4 }
   0xd   : > { %s1322_s16 = smov (!%p165_p3, %s791_s16), 223 }
   0xe   : > { %s847_s4 = sshll.u32 %s1322_s16, 3 }
   0xf   : > { %853 = vmatpush3.bf16.msra.mxu0 %v989_v5  ;;  %970 = vmatpush3.bf16.msra.mxu1 %v989_v5  ;;  %s1183_s9 = scalar_lea.vmem %s1317_s0, %s847_s4  ;;  %s1254_s30 = scalar_lea.vmem %s1320_s3, %s847_s4 }
  0x10   : > { %854 = vmatprep.subr.bf16.mxu0 %v990_v6  ;;  %963 = vmatprep.subr.bf16.mxu1 %v990_v6  ;;  %v1002_v11 = vld [vmem:[%s1183_s9 + $0x4] ss:$8 sps:$4 sm:$0xff]   ;;  %v1000_v18 = vld [vmem:[%s1183_s9] ss:$8 sps:$4 sm:$0xff]   ;;  %v1006_v20 = vld [vmem:[%s1183_s9 + $0x14] ss:$8 sps:$4 sm:$0xff]  }
  0x11   : > { %v1005_v12 = vld [vmem:[%s1183_s9 + $0x84] ss:$8 sps:$4 sm:$0xff]   ;;  %537 = vmatprep.mubr.bf16.mxu0 %v1002_v11  ;;  %v1003_v19 = vld [vmem:[%s1183_s9 + $0x80] ss:$8 sps:$4 sm:$0xff]   ;;  %v1008_v21 = vld [vmem:[%s1183_s9 + $0x94] ss:$8 sps:$4 sm:$0xff]  }
  0x12   : > { %601 = vmatprep.mubr.bf16.mxu1 %v1005_v12  ;;  %v1010_v22 = vld [vmem:[%s1183_s9 + $0x10] ss:$8 sps:$4 sm:$0xff]   ;;  %v1012_v24 = vld [vmem:[%s1183_s9 + $0x24] ss:$8 sps:$4 sm:$0xff]   ;;  %v1016_v26 = vld [vmem:[%s1183_s9 + $0x20] ss:$8 sps:$4 sm:$0xff]  }
  0x13   : > { %855 = vmatpush3.bf16.msra.mxu0 %v991_v7  ;;  %971 = vmatpush3.bf16.msra.mxu1 %v991_v7  ;;  %v1011_v23 = vld [vmem:[%s1183_s9 + $0x90] ss:$8 sps:$4 sm:$0xff]   ;;  %v1014_v25 = vld [vmem:[%s1183_s9 + $0xa4] ss:$8 sps:$4 sm:$0xff]   ;;  %v1017_v27 = vld [vmem:[%s1183_s9 + $0xa0] ss:$8 sps:$4 sm:$0xff]  }
  0x14   : > { %856 = vmatprep.subr.bf16.mxu0 %v992_v8  ;;  %964 = vmatprep.subr.bf16.mxu1 %v992_v8  ;;  %v1018_v28 = vld [vmem:[%s1183_s9 + $0x34] ss:$8 sps:$4 sm:$0xff]   ;;  %v1022_v30 = vld [vmem:[%s1183_s9 + $0x30] ss:$8 sps:$4 sm:$0xff]   ;;  %v1024_v32 = vld [vmem:[%s1183_s9 + $0x44] ss:$8 sps:$4 sm:$0xff]  }
  0x15   : > { %v1020_v29 = vld [vmem:[%s1183_s9 + $0xb4] ss:$8 sps:$4 sm:$0xff]   ;;  %v1023_v31 = vld [vmem:[%s1183_s9 + $0xb0] ss:$8 sps:$4 sm:$0xff]   ;;  %v1026_v33 = vld [vmem:[%s1183_s9 + $0xc4] ss:$8 sps:$4 sm:$0xff]  }
  0x16   : > { %v1028_v34 = vld [vmem:[%s1183_s9 + $0x40] ss:$8 sps:$4 sm:$0xff]   ;;  %v1030_v36 = vld [vmem:[%s1183_s9 + $0x54] ss:$8 sps:$4 sm:$0xff]   ;;  %v1034_v38 = vld [vmem:[%s1183_s9 + $0x50] ss:$8 sps:$4 sm:$0xff]  }
  0x17   : > { %857 = vmatpush3.bf16.msra.mxu0 %v993_v9  ;;  %972 = vmatpush3.bf16.msra.mxu1 %v993_v9  ;;  %v1029_v35 = vld [vmem:[%s1183_s9 + $0xc0] ss:$8 sps:$4 sm:$0xff]   ;;  %v1032_v37 = vld [vmem:[%s1183_s9 + $0xd4] ss:$8 sps:$4 sm:$0xff]   ;;  %v1035_v39 = vld [vmem:[%s1183_s9 + $0xd0] ss:$8 sps:$4 sm:$0xff]  }
  0x18   : > { %858 = vmatprep.subr.bf16.mxu0 %v994_v10  ;;  %965 = vmatprep.subr.bf16.mxu1 %v994_v10  ;;  %v1036_v40 = vld [vmem:[%s1183_s9 + $0x64] ss:$8 sps:$4 sm:$0xff]   ;;  %v1040_v42 = vld [vmem:[%s1183_s9 + $0x60] ss:$8 sps:$4 sm:$0xff]   ;;  %v1042_v44 = vld [vmem:[%s1183_s9 + $0x74] ss:$8 sps:$4 sm:$0xff]  }
  0x19   : > { %v1038_v41 = vld [vmem:[%s1183_s9 + $0xe4] ss:$8 sps:$4 sm:$0xff]   ;;  %v1041_v43 = vld [vmem:[%s1183_s9 + $0xe0] ss:$8 sps:$4 sm:$0xff]   ;;  %v1044_v45 = vld [vmem:[%s1183_s9 + $0xf4] ss:$8 sps:$4 sm:$0xff]  }
  0x1a   : > { %v1046_v46 = vld [vmem:[%s1183_s9 + $0x70] ss:$8 sps:$4 sm:$0xff]  }
  0x1b   : > { %859 = vmatpush3.bf16.msra.mxu0 %v995_v13  ;;  %973 = vmatpush3.bf16.msra.mxu1 %v995_v13  ;;  %v1047_v47 = vld [vmem:[%s1183_s9 + $0xf0] ss:$8 sps:$4 sm:$0xff]  }
  0x1c   : > { %860 = vmatprep.subr.bf16.mxu0 %v996_v14  ;;  %966 = vmatprep.subr.bf16.mxu1 %v996_v14 }
  0x1f   : > { %861 = vmatpush3.bf16.msra.mxu0 %v997_v15  ;;  %974 = vmatpush3.bf16.msra.mxu1 %v997_v15 }
  0x20   : > { %862 = vmatprep.subr.bf16.mxu0 %v998_v16  ;;  %967 = vmatprep.subr.bf16.mxu1 %v998_v16 }
  0x23   : > { %863 = vmatpush3.bf16.msra.mxu0 %v999_v17  ;;  %975 = vmatpush3.bf16.msra.mxu1 %v999_v17 }
  0x26   : > { %538 = vmatmul.mubr.bf16.vlgmr.msra.gmra.mrb[0].mxu0 %v1000_v18  ;;  %602 = vmatmul.mubr.bf16.vlgmr.msra.gmra.mrb[0].mxu1 %v1003_v19 }
  0x27   : > { %545 = vmatprep.mubr.bf16.mxu0 %v1006_v20  ;;  %609 = vmatprep.mubr.bf16.mxu1 %v1008_v21 }
  0x2e   : > { %546 = vmatmul.mubr.bf16.gmra.mrb[4].mxu0 %v1010_v22  ;;  %610 = vmatmul.mubr.bf16.gmra.mrb[4].mxu1 %v1011_v23 }
  0x2f   : > { %553 = vmatprep.mubr.bf16.mxu0 %v1012_v24  ;;  %617 = vmatprep.mubr.bf16.mxu1 %v1014_v25 }
  0x36   : > { %554 = vmatmul.mubr.bf16.gmra.mrb[8].mxu0 %v1016_v26  ;;  %618 = vmatmul.mubr.bf16.gmra.mrb[8].mxu1 %v1017_v27 }
  0x37   : > { %561 = vmatprep.mubr.bf16.mxu0 %v1018_v28  ;;  %625 = vmatprep.mubr.bf16.mxu1 %v1020_v29 }
  0x3e   : > { %562 = vmatmul.mubr.bf16.gmra.mrb[12].mxu0 %v1022_v30  ;;  %626 = vmatmul.mubr.bf16.gmra.mrb[12].mxu1 %v1023_v31 }
  0x3f   : > { %569 = vmatprep.mubr.bf16.mxu0 %v1024_v32  ;;  %633 = vmatprep.mubr.bf16.mxu1 %v1026_v33 }
  0x46   : > { %570 = vmatmul.mubr.bf16.gmra.mrb[16].mxu0 %v1028_v34  ;;  %634 = vmatmul.mubr.bf16.gmra.mrb[16].mxu1 %v1029_v35 }
  0x47   : > { %577 = vmatprep.mubr.bf16.mxu0 %v1030_v36  ;;  %641 = vmatprep.mubr.bf16.mxu1 %v1032_v37 }
  0x4e   : > { %578 = vmatmul.mubr.bf16.gmra.mrb[20].mxu0 %v1034_v38  ;;  %642 = vmatmul.mubr.bf16.gmra.mrb[20].mxu1 %v1035_v39 }
  0x4f   : > { %585 = vmatprep.mubr.bf16.mxu0 %v1036_v40  ;;  %649 = vmatprep.mubr.bf16.mxu1 %v1038_v41 }
  0x56   : > { %586 = vmatmul.mubr.bf16.gmra.mrb[24].mxu0 %v1040_v42  ;;  %650 = vmatmul.mubr.bf16.gmra.mrb[24].mxu1 %v1041_v43 }
  0x57   : > { %593 = vmatprep.mubr.bf16.mxu0 %v1042_v44  ;;  %657 = vmatprep.mubr.bf16.mxu1 %v1044_v45 }
  0x5e   : > { %594 = vmatmul.mubr.bf16.gmra.mrb[28].mxu0 %v1046_v46  ;;  %658 = vmatmul.mubr.bf16.gmra.mrb[28].mxu1 %v1047_v47 }
  0xf9   : > { %v864_v48 = vpop.f32.mrb[0].mxu0  ;;  %v912_v49 = vpop.f32.mrb[0].mxu1 }
  0xfa   : > { %v865_v51 = vpop.f32.mrb[1].mxu0  ;;  %v913_v52 = vpop.f32.mrb[1].mxu1 }
  0xfb   : > { %v866_v53 = vadd.f32 %v865_v51, %v864_v48  ;;  %v914_v54 = vadd.f32 %v913_v52, %v912_v49  ;;  %v867_v55 = vpop.f32.mrb[2].mxu0  ;;  %v915_v56 = vpop.f32.mrb[2].mxu1 }
  0xfc   : > { %v868_v57 = vpop.f32.mrb[3].mxu0  ;;  %v916_v58 = vpop.f32.mrb[3].mxu1 }
  0xfd   : > { %v540_v59 = vadd.f32 %v866_v53, %v1241_v50  ;;  %v604_v60 = vadd.f32 %v914_v54, %v1241_v50  ;;  %v869_v61 = vadd.f32 %v868_v57, %v867_v55  ;;  %v917_v62 = vadd.f32 %v916_v58, %v915_v56 }
  0xff   : > { %1048 = vtanh.f32 %v540_v59  ;;  %v543_v63 = vadd.f32 %v869_v61, %v1241_v50  ;;  %v607_v0 = vadd.f32 %v917_v62, %v1241_v50 }
 0x100   : > { %1050 = vtanh.f32 %v604_v60 }
 0x101   : > { %1052 = vtanh.f32 %v543_v63  ;;  %v870_v1 = vpop.f32.mrb[4].mxu0  ;;  %v918_v2 = vpop.f32.mrb[4].mxu1 }
 0x102   : > { %1054 = vtanh.f32 %v607_v0  ;;  %v871_v3 = vpop.f32.mrb[5].mxu0  ;;  %v919_v4 = vpop.f32.mrb[5].mxu1 }
 0x103   : > { %v872_v5 = vadd.f32 %v871_v3, %v870_v1  ;;  %v920_v6 = vadd.f32 %v919_v4, %v918_v2  ;;  %v873_v7 = vpop.f32.mrb[6].mxu0  ;;  %v921_v8 = vpop.f32.mrb[6].mxu1 }
 0x104   : > { %v874_v9 = vpop.f32.mrb[7].mxu0  ;;  %v922_v10 = vpop.f32.mrb[7].mxu1 }
 0x105   : > { %v548_v11 = vadd.f32 %v872_v5, %v1241_v50  ;;  %v612_v12 = vadd.f32 %v920_v6, %v1241_v50  ;;  %v875_v13 = vadd.f32 %v874_v9, %v873_v7  ;;  %v923_v14 = vadd.f32 %v922_v10, %v921_v8 }
 0x107   : > { %1056 = vtanh.f32 %v548_v11  ;;  %v551_v15 = vadd.f32 %v875_v13, %v1241_v50  ;;  %v615_v16 = vadd.f32 %v923_v14, %v1241_v50 }
 0x108   : > { %1058 = vtanh.f32 %v612_v12 }
 0x109   : > { %v1049_v17 = vpop.eup %1048  ;;  %1060 = vtanh.f32 %v551_v15  ;;  %v876_v18 = vpop.f32.mrb[8].mxu0 }
 0x10a   : > { %v924_v19 = vpop.f32.mrb[8].mxu1  ;;  %v1051_v20 = vpop.eup %1050  ;;  %698 = vst [vmem:[%s1254_s30] sm:$0xff] %v1049_v17  ;;  %1062 = vtanh.f32 %v615_v16 }
 0x10b   : > { %v877_v21 = vpop.f32.mrb[9].mxu0  ;;  %v925_v22 = vpop.f32.mrb[9].mxu1  ;;  %714 = vst [vmem:[%s1254_s30 + $0x80] sm:$0xff] %v1051_v20 }
 0x10c   : > { %v1053_v23 = vpop.eup %1052  ;;  %v878_v24 = vadd.f32 %v877_v21, %v876_v18  ;;  %v926_v25 = vadd.f32 %v925_v22, %v924_v19  ;;  %v879_v26 = vpop.f32.mrb[10].mxu0 }
 0x10d   : > { %v927_v27 = vpop.f32.mrb[10].mxu1  ;;  %v1055_v28 = vpop.eup %1054  ;;  %699 = vst [vmem:[%s1254_s30 + $0x8] sm:$0xff] %v1053_v23 }
 0x10e   : > { %v880_v29 = vpop.f32.mrb[11].mxu0  ;;  %v928_v30 = vpop.f32.mrb[11].mxu1  ;;  %715 = vst [vmem:[%s1254_s30 + $0x88] sm:$0xff] %v1055_v28  ;;  %v556_v31 = vadd.f32 %v878_v24, %v1241_v50  ;;  %v620_v32 = vadd.f32 %v926_v25, %v1241_v50 }
 0x10f   : > { %v881_v33 = vadd.f32 %v880_v29, %v879_v26  ;;  %v929_v34 = vadd.f32 %v928_v30, %v927_v27 }
 0x110   : > { %1064 = vtanh.f32 %v556_v31 }
 0x111   : > { %v559_v35 = vadd.f32 %v881_v33, %v1241_v50  ;;  %v623_v36 = vadd.f32 %v929_v34, %v1241_v50  ;;  %1066 = vtanh.f32 %v620_v32  ;;  %v1057_v37 = vpop.eup %1056  ;;  %v882_v38 = vpop.f32.mrb[12].mxu0 }
 0x112   : > { %v930_v39 = vpop.f32.mrb[12].mxu1  ;;  %v1059_v40 = vpop.eup %1058  ;;  %700 = vst [vmem:[%s1254_s30 + $0x10] sm:$0xff] %v1057_v37 }
 0x113   : > { %1068 = vtanh.f32 %v559_v35  ;;  %v883_v41 = vpop.f32.mrb[13].mxu0  ;;  %v931_v42 = vpop.f32.mrb[13].mxu1  ;;  %716 = vst [vmem:[%s1254_s30 + $0x90] sm:$0xff] %v1059_v40 }
 0x114   : > { %1070 = vtanh.f32 %v623_v36  ;;  %v1061_v43 = vpop.eup %1060  ;;  %v884_v44 = vadd.f32 %v883_v41, %v882_v38  ;;  %v932_v45 = vadd.f32 %v931_v42, %v930_v39  ;;  %v885_v46 = vpop.f32.mrb[14].mxu0 }
 0x115   : > { %v933_v47 = vpop.f32.mrb[14].mxu1  ;;  %v1063_v48 = vpop.eup %1062  ;;  %701 = vst [vmem:[%s1254_s30 + $0x18] sm:$0xff] %v1061_v43 }
 0x116   : > { %v886_v49 = vpop.f32.mrb[15].mxu0  ;;  %v934_v51 = vpop.f32.mrb[15].mxu1  ;;  %717 = vst [vmem:[%s1254_s30 + $0x98] sm:$0xff] %v1063_v48  ;;  %v564_v52 = vadd.f32 %v884_v44, %v1241_v50  ;;  %v628_v53 = vadd.f32 %v932_v45, %v1241_v50 }
 0x117   : > { %v887_v54 = vadd.f32 %v886_v49, %v885_v46  ;;  %v935_v55 = vadd.f32 %v934_v51, %v933_v47 }
 0x118   : > { %1072 = vtanh.f32 %v564_v52 }
 0x119   : > { %v567_v56 = vadd.f32 %v887_v54, %v1241_v50  ;;  %v631_v57 = vadd.f32 %v935_v55, %v1241_v50  ;;  %1074 = vtanh.f32 %v628_v53  ;;  %v888_v59 = vpop.f32.mrb[16].mxu0  ;;  %v936_v60 = vpop.f32.mrb[16].mxu1 }
 0x11a   : > { %v1065_v58 = vpop.eup %1064  ;;  %v889_v62 = vpop.f32.mrb[17].mxu0 }
 0x11b   : > { %1076 = vtanh.f32 %v567_v56  ;;  %v1067_v61 = vpop.eup %1066  ;;  %702 = vst [vmem:[%s1254_s30 + $0x20] sm:$0xff] %v1065_v58  ;;  %v937_v63 = vpop.f32.mrb[17].mxu1  ;;  %v890_v1 = vadd.f32 %v889_v62, %v888_v59 }
 0x11c   : > { %1078 = vtanh.f32 %v631_v57  ;;  %718 = vst [vmem:[%s1254_s30 + $0xa0] sm:$0xff] %v1067_v61  ;;  %v938_v2 = vadd.f32 %v937_v63, %v936_v60  ;;  %v891_v3 = vpop.f32.mrb[18].mxu0  ;;  %v939_v4 = vpop.f32.mrb[18].mxu1 }
 0x11d   : > { %v1069_v0 = vpop.eup %1068  ;;  %v892_v6 = vpop.f32.mrb[19].mxu0  ;;  %v572_v8 = vadd.f32 %v890_v1, %v1241_v50 }
 0x11e   : > { %v1071_v5 = vpop.eup %1070  ;;  %703 = vst [vmem:[%s1254_s30 + $0x28] sm:$0xff] %v1069_v0  ;;  %v940_v7 = vpop.f32.mrb[19].mxu1  ;;  %v636_v9 = vadd.f32 %v938_v2, %v1241_v50  ;;  %v893_v10 = vadd.f32 %v892_v6, %v891_v3 }
 0x11f   : > { %719 = vst [vmem:[%s1254_s30 + $0xa8] sm:$0xff] %v1071_v5  ;;  %v941_v11 = vadd.f32 %v940_v7, %v939_v4  ;;  %1080 = vtanh.f32 %v572_v8 }
 0x120   : > { %v575_v12 = vadd.f32 %v893_v10, %v1241_v50  ;;  %1082 = vtanh.f32 %v636_v9 }
 0x121   : > { %v639_v13 = vadd.f32 %v941_v11, %v1241_v50  ;;  %v894_v15 = vpop.f32.mrb[20].mxu0  ;;  %v942_v16 = vpop.f32.mrb[20].mxu1 }
 0x122   : > { %v1073_v14 = vpop.eup %1072  ;;  %1084 = vtanh.f32 %v575_v12  ;;  %v895_v18 = vpop.f32.mrb[21].mxu0 }
 0x123   : > { %v1075_v17 = vpop.eup %1074  ;;  %704 = vst [vmem:[%s1254_s30 + $0x30] sm:$0xff] %v1073_v14  ;;  %1086 = vtanh.f32 %v639_v13  ;;  %v943_v19 = vpop.f32.mrb[21].mxu1  ;;  %v896_v21 = vadd.f32 %v895_v18, %v894_v15 }
 0x124   : > { %720 = vst [vmem:[%s1254_s30 + $0xb0] sm:$0xff] %v1075_v17  ;;  %v944_v22 = vadd.f32 %v943_v19, %v942_v16  ;;  %v897_v23 = vpop.f32.mrb[22].mxu0  ;;  %v945_v24 = vpop.f32.mrb[22].mxu1 }
 0x125   : > { %v1077_v20 = vpop.eup %1076  ;;  %v898_v26 = vpop.f32.mrb[23].mxu0  ;;  %v580_v28 = vadd.f32 %v896_v21, %v1241_v50 }
 0x126   : > { %v1079_v25 = vpop.eup %1078  ;;  %705 = vst [vmem:[%s1254_s30 + $0x38] sm:$0xff] %v1077_v20  ;;  %v946_v27 = vpop.f32.mrb[23].mxu1  ;;  %v644_v29 = vadd.f32 %v944_v22, %v1241_v50  ;;  %v899_v30 = vadd.f32 %v898_v26, %v897_v23 }
 0x127   : > { %721 = vst [vmem:[%s1254_s30 + $0xb8] sm:$0xff] %v1079_v25  ;;  %v947_v31 = vadd.f32 %v946_v27, %v945_v24  ;;  %1088 = vtanh.f32 %v580_v28 }
 0x128   : > { %v583_v32 = vadd.f32 %v899_v30, %v1241_v50  ;;  %1090 = vtanh.f32 %v644_v29 }
 0x129   : > { %v647_v33 = vadd.f32 %v947_v31, %v1241_v50  ;;  %v1081_v34 = vpop.eup %1080  ;;  %v900_v35 = vpop.f32.mrb[24].mxu0 }
 0x12a   : > { %1092 = vtanh.f32 %v583_v32  ;;  %v948_v36 = vpop.f32.mrb[24].mxu1  ;;  %v1083_v37 = vpop.eup %1082  ;;  %706 = vst [vmem:[%s1254_s30 + $0x40] sm:$0xff] %v1081_v34 }
 0x12b   : > { %1094 = vtanh.f32 %v647_v33  ;;  %v901_v38 = vpop.f32.mrb[25].mxu0  ;;  %v949_v39 = vpop.f32.mrb[25].mxu1  ;;  %722 = vst [vmem:[%s1254_s30 + $0xc0] sm:$0xff] %v1083_v37 }
 0x12c   : > { %v1085_v40 = vpop.eup %1084  ;;  %v902_v41 = vadd.f32 %v901_v38, %v900_v35  ;;  %v950_v42 = vadd.f32 %v949_v39, %v948_v36  ;;  %v903_v43 = vpop.f32.mrb[26].mxu0 }
 0x12d   : > { %v951_v44 = vpop.f32.mrb[26].mxu1  ;;  %v1087_v45 = vpop.eup %1086  ;;  %707 = vst [vmem:[%s1254_s30 + $0x48] sm:$0xff] %v1085_v40 }
 0x12e   : > { %v904_v46 = vpop.f32.mrb[27].mxu0  ;;  %v952_v47 = vpop.f32.mrb[27].mxu1  ;;  %723 = vst [vmem:[%s1254_s30 + $0xc8] sm:$0xff] %v1087_v45  ;;  %v588_v48 = vadd.f32 %v902_v41, %v1241_v50  ;;  %v652_v49 = vadd.f32 %v950_v42, %v1241_v50 }
 0x12f   : > { %v905_v51 = vadd.f32 %v904_v46, %v903_v43  ;;  %v953_v52 = vadd.f32 %v952_v47, %v951_v44 }
 0x130   : > { %1096 = vtanh.f32 %v588_v48 }
 0x131   : > { %v591_v53 = vadd.f32 %v905_v51, %v1241_v50  ;;  %v655_v54 = vadd.f32 %v953_v52, %v1241_v50  ;;  %1098 = vtanh.f32 %v652_v49  ;;  %v1089_v55 = vpop.eup %1088  ;;  %v906_v56 = vpop.f32.mrb[28].mxu0 }
 0x132   : > { %v954_v57 = vpop.f32.mrb[28].mxu1  ;;  %v1091_v58 = vpop.eup %1090  ;;  %708 = vst [vmem:[%s1254_s30 + $0x50] sm:$0xff] %v1089_v55 }
 0x133   : > { %1100 = vtanh.f32 %v591_v53  ;;  %v907_v59 = vpop.f32.mrb[29].mxu0  ;;  %v955_v60 = vpop.f32.mrb[29].mxu1  ;;  %724 = vst [vmem:[%s1254_s30 + $0xd0] sm:$0xff] %v1091_v58 }
 0x134   : > { %1102 = vtanh.f32 %v655_v54  ;;  %v1093_v61 = vpop.eup %1092  ;;  %v908_v62 = vadd.f32 %v907_v59, %v906_v56  ;;  %v956_v63 = vadd.f32 %v955_v60, %v954_v57  ;;  %v909_v0 = vpop.f32.mrb[30].mxu0 }
 0x135   : > { %v957_v1 = vpop.f32.mrb[30].mxu1  ;;  %v1095_v2 = vpop.eup %1094  ;;  %709 = vst [vmem:[%s1254_s30 + $0x58] sm:$0xff] %v1093_v61 }
 0x136   : > { %v910_v3 = vpop.f32.mrb[31].mxu0  ;;  %v958_v4 = vpop.f32.mrb[31].mxu1  ;;  %725 = vst [vmem:[%s1254_s30 + $0xd8] sm:$0xff] %v1095_v2  ;;  %v596_v5 = vadd.f32 %v908_v62, %v1241_v50  ;;  %v660_v6 = vadd.f32 %v956_v63, %v1241_v50 }
 0x137   : > { %v911_v7 = vadd.f32 %v910_v3, %v909_v0  ;;  %v959_v8 = vadd.f32 %v958_v4, %v957_v1 }
 0x138   : > { %1104 = vtanh.f32 %v596_v5 }
 0x139   : > { %v599_v9 = vadd.f32 %v911_v7, %v1241_v50  ;;  %v663_v10 = vadd.f32 %v959_v8, %v1241_v50  ;;  %1106 = vtanh.f32 %v660_v6 }
 0x13a   : > { %v1097_v11 = vpop.eup %1096 }
 0x13b   : > { %1108 = vtanh.f32 %v599_v9  ;;  %v1099_v12 = vpop.eup %1098  ;;  %710 = vst [vmem:[%s1254_s30 + $0x60] sm:$0xff] %v1097_v11 }
 0x13c   : > { %1110 = vtanh.f32 %v663_v10  ;;  %726 = vst [vmem:[%s1254_s30 + $0xe0] sm:$0xff] %v1099_v12 }
 0x13d   : > { %v1101_v13 = vpop.eup %1100 }
 0x13e   : > { %v1103_v14 = vpop.eup %1102  ;;  %711 = vst [vmem:[%s1254_s30 + $0x68] sm:$0xff] %v1101_v13 }
 0x13f   : > { %727 = vst [vmem:[%s1254_s30 + $0xe8] sm:$0xff] %v1103_v14 }
 0x142   : > { %v1105_v15 = vpop.eup %1104 }
 0x143   : > { %v1107_v16 = vpop.eup %1106  ;;  %712 = vst [vmem:[%s1254_s30 + $0x70] sm:$0xff] %v1105_v15 }
 0x144   : > { %728 = vst [vmem:[%s1254_s30 + $0xf0] sm:$0xff] %v1107_v16 }
 0x145   : > { %v1109_v17 = vpop.eup %1108 }
 0x146   : > { %v1111_v50 = vpop.eup %1110  ;;  %713 = vst [vmem:[%s1254_s30 + $0x78] sm:$0xff] %v1109_v17 }
 0x147   : > { %729 = vst [vmem:[%s1254_s30 + $0xf8] sm:$0xff] %v1111_v50 }
 0x148 PF: > { %s13_s12 = sadd.s32 1, %s1118_s12  }
 0x149   : > { %p10_p4 = scmp.ge.s32.totalorder %s13_s12, 9  }
 0x14b   :  { %12 = sbr.rel (!%p10_p4) target bundleno = 1 (0x1), region = 62 }

</bundles_post_ra>
